<compile_context>
chip_gen: v5e
topology: v5e:2x2
jax: 0.10.0
libtpu: 0.0.40
codegen_flags: <defaults>
</compile_context>

<pallas_src>
import functools
import math

import jax
import jax.numpy as jnp
from jax.experimental import pallas as pl
from jax.experimental.pallas import tpu as pltpu


PARAM_NAMES = (
    "wq1", "bq1", "wk1", "bk1", "wv1", "bv1", "wo1", "bo1",     # masked self-attn
    "wq2", "bq2", "wk2", "bk2", "wv2", "bv2", "wo2", "bo2",     # enc-dec attn
    "g1", "be1", "g2", "be2", "g3", "be3",                      # layernorm 1/2/3
    "w1", "b1", "w2", "b2",                                     # FFN
)

# Weights that feed the MXU (shipped to the kernel as bf16).  wq1/wq2 also get
# the 1/sqrt(d_k) fold (handled separately in the wrapper).
_MXU_WEIGHTS = frozenset(
    {"wk1", "wv1", "wo1", "wk2", "wv2", "wo2", "w1", "w2"})


# ------------------------------ Pallas kernel --------------------------------
def decoder_kernel(x_ref, enc_ref, tgt_bias_ref, src_bias_ref,
                   wq1_ref, bq1_ref, wk1_ref, bk1_ref, wv1_ref, bv1_ref,
                   wo1_ref, bo1_ref,
                   wq2_ref, bq2_ref, wk2_ref, bk2_ref, wv2_ref, bv2_ref,
                   wo2_ref, bo2_ref,
                   g1_ref, be1_ref, g2_ref, be2_ref, g3_ref, be3_ref,
                   w1_ref, b1_ref, w2_ref, b2_ref,
                   wout_ref, bout_ref,
                   out_ref, *, num_heads):
    """Full decoder stack for ONE batch element (grid iterates over batch).

    x_ref    : (S, D)     f32   target embeddings + positional encoding
    enc_ref  : (S_enc, D) f32   encoder output
    *_bias   : (S, S) / (S, S_enc) f32 ADDITIVE masks (0 or -1e9)
    W*       : stacked per layer (L, in, out) bf16; biases / gamma / beta f32
    wq1/wq2 and bq1/bq2 already include the 1/sqrt(d_k) attention scale.
    out_ref  : (S, V_pad) f32   final vocab logits (lane-dense, padded)
    """
    S, D = x_ref.shape
    S_enc = enc_ref.shape[0]
    L = wq1_ref.shape[0]
    H = num_heads
    d_k = D // H
    eps = 1e-5
    bf16 = jnp.bfloat16

    x = x_ref[...]                                   # (S, D) f32
    enc_b = enc_ref[...].astype(bf16)                # (S_enc, D) bf16 (hoisted)
    tgt_bias = tgt_bias_ref[...]                     # (S, S)
    src_bias = src_bias_ref[...]                     # (S, S_enc)

    def layernorm(v, gamma, beta):
        # One-pass mean / variance (E[x], E[x^2]).
        mu = jnp.mean(v, axis=-1, keepdims=True)
        var = jnp.mean(v * v, axis=-1, keepdims=True) - mu * mu
        return (v - mu) * jax.lax.rsqrt(var + eps) * gamma + beta

    def mha(xq, xkv_b, Sq, Sk, wq, bq, wk, bk, wv, bv, wo, bo, bias):
        """Multi-head attention.  xq: (Sq, D) f32, xkv_b: (Sk, D) bf16."""
        xq_b = xq.astype(bf16)
        # Full-width QKV projections: bf16 MXU operands, f32 accumulate.
        q = jnp.dot(xq_b, wq, preferred_element_type=jnp.float32) + bq    # (Sq, D)
        k = jnp.dot(xkv_b, wk, preferred_element_type=jnp.float32) + bk   # (Sk, D)
        v = jnp.dot(xkv_b, wv, preferred_element_type=jnp.float32) + bv   # (Sk, D)

        qh = q.reshape(Sq, H, d_k).astype(bf16)
        kh = k.reshape(Sk, H, d_k).astype(bf16)
        vh = v.reshape(Sk, H, d_k).astype(bf16)

        # All heads at once; scale already folded into wq/bq.
        s = jnp.einsum("qhd,khd->hqk", qh, kh,
                       preferred_element_type=jnp.float32)                # (H, Sq, Sk)
        s = s + bias[None, :, :]                                          # additive mask
        s = s - jnp.max(s, axis=-1, keepdims=True)
        p = jnp.exp(s)
        p = p * pl.reciprocal(jnp.sum(p, axis=-1, keepdims=True), approx=True)

        # PV einsum on the bf16 MXU path; output already q-major -> reshape = concat.
        o = jnp.einsum("hqk,khd->qhd", p.astype(bf16), vh,
                       preferred_element_type=jnp.float32).reshape(Sq, D)
        # Single K=D output projection (no per-head partial matmuls).
        return jnp.dot(o.astype(bf16), wo, preferred_element_type=jnp.float32) + bo

    h = x
    for li in range(L):                              # static unrolled layer loop
        # ---- masked self-attention + residual + LN1 (dropout = eval identity)
        a1 = mha(h, h.astype(bf16), S, S,
                 wq1_ref[li], bq1_ref[li], wk1_ref[li], bk1_ref[li],
                 wv1_ref[li], bv1_ref[li], wo1_ref[li], bo1_ref[li], tgt_bias)
        out1 = layernorm(h + a1, g1_ref[li], be1_ref[li])

        # ---- encoder-decoder attention + residual + LN2
        a2 = mha(out1, enc_b, S, S_enc,
                 wq2_ref[li], bq2_ref[li], wk2_ref[li], bk2_ref[li],
                 wv2_ref[li], bv2_ref[li], wo2_ref[li], bo2_ref[li], src_bias)
        out2 = layernorm(out1 + a2, g2_ref[li], be2_ref[li])

        # ---- feed-forward network + residual + LN3
        f = jnp.dot(out2.astype(bf16), w1_ref[li],
                    preferred_element_type=jnp.float32) + b1_ref[li]
        f = jnp.maximum(f, 0.0)
        f = jnp.dot(f.astype(bf16), w2_ref[li],
                    preferred_element_type=jnp.float32) + b2_ref[li]
        h = layernorm(out2 + f, g3_ref[li], be3_ref[li])

    # ---- final Linear(d_model -> vocab_padded); lane-dense store
    logits = jnp.dot(h.astype(bf16), wout_ref[...],
                     preferred_element_type=jnp.float32) + bout_ref[...]
    out_ref[...] = logits.astype(out_ref.dtype)


# --------------------------------- wrapper ------------------------------------
@functools.partial(jax.jit, static_argnames=("num_heads",))
def decoder_forward(tokens, enc_out, tgt_mask, src_mask, params, num_heads):
    """tokens: (B, S) int32; enc_out: (B, S_enc, D) -> logits (B, S, V)."""
    emb, pe, st = params["emb"], params["pe"], params["layers"]
    B, S = tokens.shape
    D = emb.shape[1]
    S_enc = enc_out.shape[1]
    V = params["w_out"].shape[1]
    d_k = D // num_heads
    scale = 1.0 / math.sqrt(d_k)
    bf16 = jnp.bfloat16

    # Embedding gather + positional encoding (plain-JAX glue).
    x = emb[tokens] + pe[None, :S, :]                                    # (B, S, D)

    # Hoisted additive masks: masked_fill(mask==0, -1e9)  ==  scores + bias.
    tgt_bias = jnp.where(tgt_mask == 0.0, -1e9, 0.0).astype(jnp.float32)
    src_bias = jnp.where(src_mask == 0.0, -1e9, 0.0).astype(jnp.float32)

    # Vocab padded to a lane-dense multiple of 128 (zero columns; sliced off below).
    Vp = ((V + 127) // 128) * 128
    w_out = jnp.pad(params["w_out"], ((0, 0), (0, Vp - V))).astype(bf16)
    b_out = jnp.pad(params["b_out"], ((0, 0), (0, Vp - V))).astype(jnp.float32)

    # Per-layer stacked weights: fold the attention scale into wq/bq, cast the
    # MXU-feeding matrices to bf16, keep biases / LN params in f32.
    weight_args = []
    for name in PARAM_NAMES:
        a = st[name]
        if name in ("wq1", "wq2"):
            a = (a * scale).astype(bf16)
        elif name in ("bq1", "bq2"):
            a = (a * scale).astype(jnp.float32)
        elif name in _MXU_WEIGHTS:
            a = a.astype(bf16)
        else:
            a = a.astype(jnp.float32)
        weight_args.append(a)

    x2d = x.reshape(B * S, D).astype(jnp.float32)
    enc2d = enc_out.reshape(B * S_enc, D).astype(jnp.float32)

    def whole(a):
        nd = a.ndim
        return pl.BlockSpec(a.shape, lambda b, nd=nd: (0,) * nd)

    in_specs = [
        pl.BlockSpec((S, D), lambda b: (b, 0)),          # x (one batch element)
        pl.BlockSpec((S_enc, D), lambda b: (b, 0)),      # encoder output
        whole(tgt_bias),
        whole(src_bias),
    ]
    in_specs += [whole(a) for a in weight_args]
    in_specs += [whole(w_out), whole(b_out)]
    out_specs = pl.BlockSpec((S, Vp), lambda b: (b, 0))

    # VMEM budget from the actual footprint (weights resident + double-buffered
    # per-batch activation blocks), clamped to a cross-generation-safe range.
    def nbytes(a):
        return a.size * a.dtype.itemsize
    weight_bytes = (sum(nbytes(a) for a in weight_args)
                    + nbytes(w_out) + nbytes(b_out)
                    + nbytes(tgt_bias) + nbytes(src_bias))
    block_bytes = 4 * (S * D + S_enc * D + S * Vp)
    vmem_limit = 2 * (weight_bytes + 2 * block_bytes) + (8 << 20)
    vmem_limit = max(16 << 20, min(vmem_limit, 64 << 20))

    kernel = functools.partial(decoder_kernel, num_heads=num_heads)
    out2d = pl.pallas_call(
        kernel,
        out_shape=jax.ShapeDtypeStruct((B * S, Vp), jnp.float32),
        grid_spec=pltpu.PrefetchScalarGridSpec(
            num_scalar_prefetch=0,
            grid=(B,),
            in_specs=in_specs,
            out_specs=out_specs,
        ),
        compiler_params=pltpu.CompilerParams(
            dimension_semantics=("parallel",),
            vmem_limit_bytes=vmem_limit),
    )(x2d, enc2d, tgt_bias, src_bias, *weight_args, w_out, b_out)

    return out2d.reshape(B, S, Vp)[:, :, :V]


# --------------------------- parameter construction ---------------------------
def init_linear(key, in_dim, out_dim):
    """PyTorch-style uniform init; weight stored as (in, out), bias as (1, out)."""
    kw, kb = jax.random.split(key)
    bound = 1.0 / math.sqrt(in_dim)
    w = jax.random.uniform(kw, (in_dim, out_dim), jnp.float32, -bound, bound)
    b = jax.random.uniform(kb, (1, out_dim), jnp.float32, -bound, bound)
    return w, b


def positional_encoding(max_len, d_model):
    position = jnp.arange(max_len, dtype=jnp.float32)[:, None]
    div_term = jnp.exp(jnp.arange(0, d_model, 2, dtype=jnp.float32)
                       * (-math.log(10000.0) / d_model))
    pe = jnp.zeros((max_len, d_model), jnp.float32)
    pe = pe.at[:, 0::2].set(jnp.sin(position * div_term))
    pe = pe.at[:, 1::2].set(jnp.cos(position * div_term))
    return pe


def init_decoder_params(key, d_model, num_layers, d_ff, vocab_size, max_len):
    keys = jax.random.split(key, num_layers + 2)
    emb = jax.random.normal(keys[0], (vocab_size, d_model), jnp.float32)
    layer_dicts = []
    for li in range(num_layers):
        ks = jax.random.split(keys[li + 1], 10)
        wq1, bq1 = init_linear(ks[0], d_model, d_model)
        wk1, bk1 = init_linear(ks[1], d_model, d_model)
        wv1, bv1 = init_linear(ks[2], d_model, d_model)
        wo1, bo1 = init_linear(ks[3], d_model, d_model)
        wq2, bq2 = init_linear(ks[4], d_model, d_model)
        wk2, bk2 = init_linear(ks[5], d_model, d_model)
        wv2, bv2 = init_linear(ks[6], d_model, d_model)
        wo2, bo2 = init_linear(ks[7], d_model, d_model)
        w1, b1 = init_linear(ks[8], d_model, d_ff)
        w2, b2 = init_linear(ks[9], d_ff, d_model)
        ones = jnp.ones((1, d_model), jnp.float32)
        zeros = jnp.zeros((1, d_model), jnp.float32)
        layer_dicts.append(dict(
            wq1=wq1, bq1=bq1, wk1=wk1, bk1=bk1, wv1=wv1, bv1=bv1, wo1=wo1, bo1=bo1,
            wq2=wq2, bq2=bq2, wk2=wk2, bk2=bk2, wv2=wv2, bv2=bv2, wo2=wo2, bo2=bo2,
            g1=ones, be1=zeros, g2=ones, be2=zeros, g3=ones, be3=zeros,
            w1=w1, b1=b1, w2=w2, b2=b2))
    # Stack each parameter along a leading layer axis -> one fused kernel call.
    stacked = {n: jnp.stack([ld[n] for ld in layer_dicts], axis=0) for n in PARAM_NAMES}
    w_out, b_out = init_linear(keys[-1], d_model, vocab_size)
    return dict(emb=emb, pe=positional_encoding(max_len, d_model),
                layers=stacked, w_out=w_out, b_out=b_out)


# ----------------------------- pure-JAX reference -----------------------------
def decoder_forward_ref(tokens, enc_out, tgt_mask, src_mask, params, num_heads):
    emb, pe, st = params["emb"], params["pe"], params["layers"]
    B, S = tokens.shape
    D = emb.shape[1]
    d_k = D // num_heads
    L = st["wq1"].shape[0]
    x = emb[tokens] + pe[None, :S, :]

    def ln(v, g, b):
        mu = v.mean(-1, keepdims=True)
        var = ((v - mu) ** 2).mean(-1, keepdims=True)
        return (v - mu) / jnp.sqrt(var + 1e-5) * g + b

    def mha(xq, xkv, wq, bq, wk, bk, wv, bv, wo, bo, mask):
        Bq, Sq, _ = xq.shape
        Sk = xkv.shape[1]
        q = (xq @ wq + bq).reshape(Bq, Sq, num_heads, d_k).transpose(0, 2, 1, 3)
        k = (xkv @ wk + bk).reshape(Bq, Sk, num_heads, d_k).transpose(0, 2, 1, 3)
        v = (xkv @ wv + bv).reshape(Bq, Sk, num_heads, d_k).transpose(0, 2, 1, 3)
        sc = jnp.einsum("bhqd,bhkd->bhqk", q, k) / math.sqrt(d_k)
        sc = jnp.where(mask[None, None, :, :] == 0.0, -1e9, sc)
        a = jax.nn.softmax(sc, axis=-1)
        o = jnp.einsum("bhqk,bhkd->bhqd", a, v).transpose(0, 2, 1, 3).reshape(Bq, Sq, D)
        return o @ wo + bo

    for li in range(L):
        a1 = mha(x, x, st["wq1"][li], st["bq1"][li], st["wk1"][li], st["bk1"][li],
                 st["wv1"][li], st["bv1"][li], st["wo1"][li], st["bo1"][li], tgt_mask)
        out1 = ln(x + a1, st["g1"][li], st["be1"][li])
        a2 = mha(out1, enc_out, st["wq2"][li], st["bq2"][li], st["wk2"][li], st["bk2"][li],
                 st["wv2"][li], st["bv2"][li], st["wo2"][li], st["bo2"][li], src_mask)
        out2 = ln(out1 + a2, st["g2"][li], st["be2"][li])
        f = jnp.maximum(out2 @ st["w1"][li] + st["b1"][li], 0.0) @ st["w2"][li] + st["b2"][li]
        x = ln(out2 + f, st["g3"][li], st["be3"][li])
    return x @ params["w_out"] + params["b_out"]


# ------------------------------------ main -------------------------------------
if __name__ == "__main__":
    d_model, num_layers, num_heads, d_ff = 32, 2, 4, 64
    vocab_size, max_len = 50, 16
    batch, s_dec, s_enc = 2, 8, 16

    key = jax.random.PRNGKey(0)
    k_param, k_tok, k_enc = jax.random.split(key, 3)

    params = init_decoder_params(k_param, d_model, num_layers, d_ff, vocab_size, max_len)
    tokens = jax.random.randint(k_tok, (batch, s_dec), 0, vocab_size, dtype=jnp.int32)
    enc_out = jax.random.normal(k_enc, (batch, s_enc, d_model), jnp.float32)

    # Standard decoder usage: causal target mask, no source mask (all-ones ==
    # PyTorch mask=None path, since masked_fill(mask==0) is then a no-op).
    tgt_mask = jnp.tril(jnp.ones((s_dec, s_dec), jnp.float32))
    src_mask = jnp.ones((s_dec, s_enc), jnp.float32)

    out = decoder_forward(tokens, enc_out, tgt_mask, src_mask, params, num_heads)
    out = jax.block_until_ready(out)

    ref = decoder_forward_ref(tokens, enc_out, tgt_mask, src_mask, params, num_heads)
    assert out.shape == (batch, s_dec, vocab_size)
    # Tolerance accounts for bf16 MXU operands and the EUP approximate
    # reciprocal in the softmax (reference runs fully in f32).
    assert jnp.allclose(out, ref, atol=6e-2, rtol=6e-2), "Pallas output mismatch vs reference"

    print("KERNEL_OK")
</pallas_src>

<mosaic_0001>
module attributes {stable_mosaic.version = 11 : i64} {
  func.func @decoder_kernel(%arg0: i32, %arg1: memref<8x32xf32, #tpu.memory_space<vmem>>, %arg2: memref<16x32xf32, #tpu.memory_space<vmem>>, %arg3: memref<8x8xf32, #tpu.memory_space<vmem>>, %arg4: memref<8x16xf32, #tpu.memory_space<vmem>>, %arg5: memref<2x32x32xbf16, #tpu.memory_space<vmem>>, %arg6: memref<2x1x32xf32, #tpu.memory_space<vmem>>, %arg7: memref<2x32x32xbf16, #tpu.memory_space<vmem>>, %arg8: memref<2x1x32xf32, #tpu.memory_space<vmem>>, %arg9: memref<2x32x32xbf16, #tpu.memory_space<vmem>>, %arg10: memref<2x1x32xf32, #tpu.memory_space<vmem>>, %arg11: memref<2x32x32xbf16, #tpu.memory_space<vmem>>, %arg12: memref<2x1x32xf32, #tpu.memory_space<vmem>>, %arg13: memref<2x32x32xbf16, #tpu.memory_space<vmem>>, %arg14: memref<2x1x32xf32, #tpu.memory_space<vmem>>, %arg15: memref<2x32x32xbf16, #tpu.memory_space<vmem>>, %arg16: memref<2x1x32xf32, #tpu.memory_space<vmem>>, %arg17: memref<2x32x32xbf16, #tpu.memory_space<vmem>>, %arg18: memref<2x1x32xf32, #tpu.memory_space<vmem>>, %arg19: memref<2x32x32xbf16, #tpu.memory_space<vmem>>, %arg20: memref<2x1x32xf32, #tpu.memory_space<vmem>>, %arg21: memref<2x1x32xf32, #tpu.memory_space<vmem>>, %arg22: memref<2x1x32xf32, #tpu.memory_space<vmem>>, %arg23: memref<2x1x32xf32, #tpu.memory_space<vmem>>, %arg24: memref<2x1x32xf32, #tpu.memory_space<vmem>>, %arg25: memref<2x1x32xf32, #tpu.memory_space<vmem>>, %arg26: memref<2x1x32xf32, #tpu.memory_space<vmem>>, %arg27: memref<2x32x64xbf16, #tpu.memory_space<vmem>>, %arg28: memref<2x1x64xf32, #tpu.memory_space<vmem>>, %arg29: memref<2x64x32xbf16, #tpu.memory_space<vmem>>, %arg30: memref<2x1x32xf32, #tpu.memory_space<vmem>>, %arg31: memref<32x128xbf16, #tpu.memory_space<vmem>>, %arg32: memref<1x128xf32, #tpu.memory_space<vmem>>, %arg33: memref<8x128xf32, #tpu.memory_space<vmem>>) attributes {dimension_semantics = [#tpu.dimension_semantics<parallel>], iteration_bounds = array<i64: 2>, scalar_prefetch = 0 : i64, scratch_operands = 0 : i64, tpu.core_type = #tpu.core_type<tc>, window_params = [{transform_indices = @transform_0, window_bounds = array<i64: 8, 32>}, {transform_indices = @transform_1, window_bounds = array<i64: 16, 32>}, {pipeline_mode = #tpu.pipeline_mode<synchronous>, transform_indices = @transform_2, window_bounds = array<i64: 8, 8>}, {pipeline_mode = #tpu.pipeline_mode<synchronous>, transform_indices = @transform_3, window_bounds = array<i64: 8, 16>}, {pipeline_mode = #tpu.pipeline_mode<synchronous>, transform_indices = @transform_4, window_bounds = array<i64: 2, 32, 32>}, {pipeline_mode = #tpu.pipeline_mode<synchronous>, transform_indices = @transform_5, window_bounds = array<i64: 2, 1, 32>}, {pipeline_mode = #tpu.pipeline_mode<synchronous>, transform_indices = @transform_6, window_bounds = array<i64: 2, 32, 32>}, {pipeline_mode = #tpu.pipeline_mode<synchronous>, transform_indices = @transform_7, window_bounds = array<i64: 2, 1, 32>}, {pipeline_mode = #tpu.pipeline_mode<synchronous>, transform_indices = @transform_8, window_bounds = array<i64: 2, 32, 32>}, {pipeline_mode = #tpu.pipeline_mode<synchronous>, transform_indices = @transform_9, window_bounds = array<i64: 2, 1, 32>}, {pipeline_mode = #tpu.pipeline_mode<synchronous>, transform_indices = @transform_10, window_bounds = array<i64: 2, 32, 32>}, {pipeline_mode = #tpu.pipeline_mode<synchronous>, transform_indices = @transform_11, window_bounds = array<i64: 2, 1, 32>}, {pipeline_mode = #tpu.pipeline_mode<synchronous>, transform_indices = @transform_12, window_bounds = array<i64: 2, 32, 32>}, {pipeline_mode = #tpu.pipeline_mode<synchronous>, transform_indices = @transform_13, window_bounds = array<i64: 2, 1, 32>}, {pipeline_mode = #tpu.pipeline_mode<synchronous>, transform_indices = @transform_14, window_bounds = array<i64: 2, 32, 32>}, {pipeline_mode = #tpu.pipeline_mode<synchronous>, transform_indices = @transform_15, window_bounds = array<i64: 2, 1, 32>}, {pipeline_mode = #tpu.pipeline_mode<synchronous>, transform_indices = @transform_16, window_bounds = array<i64: 2, 32, 32>}, {pipeline_mode = #tpu.pipeline_mode<synchronous>, transform_indices = @transform_17, window_bounds = array<i64: 2, 1, 32>}, {pipeline_mode = #tpu.pipeline_mode<synchronous>, transform_indices = @transform_18, window_bounds = array<i64: 2, 32, 32>}, {pipeline_mode = #tpu.pipeline_mode<synchronous>, transform_indices = @transform_19, window_bounds = array<i64: 2, 1, 32>}, {pipeline_mode = #tpu.pipeline_mode<synchronous>, transform_indices = @transform_20, window_bounds = array<i64: 2, 1, 32>}, {pipeline_mode = #tpu.pipeline_mode<synchronous>, transform_indices = @transform_21, window_bounds = array<i64: 2, 1, 32>}, {pipeline_mode = #tpu.pipeline_mode<synchronous>, transform_indices = @transform_22, window_bounds = array<i64: 2, 1, 32>}, {pipeline_mode = #tpu.pipeline_mode<synchronous>, transform_indices = @transform_23, window_bounds = array<i64: 2, 1, 32>}, {pipeline_mode = #tpu.pipeline_mode<synchronous>, transform_indices = @transform_24, window_bounds = array<i64: 2, 1, 32>}, {pipeline_mode = #tpu.pipeline_mode<synchronous>, transform_indices = @transform_25, window_bounds = array<i64: 2, 1, 32>}, {pipeline_mode = #tpu.pipeline_mode<synchronous>, transform_indices = @transform_26, window_bounds = array<i64: 2, 32, 64>}, {pipeline_mode = #tpu.pipeline_mode<synchronous>, transform_indices = @transform_27, window_bounds = array<i64: 2, 1, 64>}, {pipeline_mode = #tpu.pipeline_mode<synchronous>, transform_indices = @transform_28, window_bounds = array<i64: 2, 64, 32>}, {pipeline_mode = #tpu.pipeline_mode<synchronous>, transform_indices = @transform_29, window_bounds = array<i64: 2, 1, 32>}, {pipeline_mode = #tpu.pipeline_mode<synchronous>, transform_indices = @transform_30, window_bounds = array<i64: 32, 128>}, {pipeline_mode = #tpu.pipeline_mode<synchronous>, transform_indices = @transform_31, window_bounds = array<i64: 1, 128>}, {transform_indices = @transform_32, window_bounds = array<i64: 8, 128>}]} {
    %c0 = arith.constant 0 : index
    %c0_0 = arith.constant 0 : index
    %0 = vector.load %arg1[%c0, %c0_0] : memref<8x32xf32, #tpu.memory_space<vmem>>, vector<8x32xf32>
    %c0_1 = arith.constant 0 : index
    %c0_2 = arith.constant 0 : index
    %1 = vector.load %arg2[%c0_1, %c0_2] : memref<16x32xf32, #tpu.memory_space<vmem>>, vector<16x32xf32>
    %2 = arith.truncf %1 : vector<16x32xf32> to vector<16x32xbf16>
    %c0_3 = arith.constant 0 : index
    %c0_4 = arith.constant 0 : index
    %3 = vector.load %arg3[%c0_3, %c0_4] : memref<8x8xf32, #tpu.memory_space<vmem>>, vector<8x8xf32>
    %c0_5 = arith.constant 0 : index
    %c0_6 = arith.constant 0 : index
    %4 = vector.load %arg4[%c0_5, %c0_6] : memref<8x16xf32, #tpu.memory_space<vmem>>, vector<8x16xf32>
    %5 = arith.truncf %0 : vector<8x32xf32> to vector<8x32xbf16>
    %c0_7 = arith.constant 0 : index
    %c0_8 = arith.constant 0 : index
    %c0_9 = arith.constant 0 : index
    %6 = vector.load %arg5[%c0_7, %c0_8, %c0_9] : memref<2x32x32xbf16, #tpu.memory_space<vmem>>, vector<1x32x32xbf16>
    %7 = vector.shape_cast %6 : vector<1x32x32xbf16> to vector<32x32xbf16>
    %c0_10 = arith.constant 0 : index
    %c0_11 = arith.constant 0 : index
    %c0_12 = arith.constant 0 : index
    %8 = vector.load %arg6[%c0_10, %c0_11, %c0_12] : memref<2x1x32xf32, #tpu.memory_space<vmem>>, vector<1x1x32xf32>
    %9 = vector.shape_cast %8 : vector<1x1x32xf32> to vector<1x32xf32>
    %c0_13 = arith.constant 0 : index
    %c0_14 = arith.constant 0 : index
    %c0_15 = arith.constant 0 : index
    %10 = vector.load %arg7[%c0_13, %c0_14, %c0_15] : memref<2x32x32xbf16, #tpu.memory_space<vmem>>, vector<1x32x32xbf16>
    %11 = vector.shape_cast %10 : vector<1x32x32xbf16> to vector<32x32xbf16>
    %c0_16 = arith.constant 0 : index
    %c0_17 = arith.constant 0 : index
    %c0_18 = arith.constant 0 : index
    %12 = vector.load %arg8[%c0_16, %c0_17, %c0_18] : memref<2x1x32xf32, #tpu.memory_space<vmem>>, vector<1x1x32xf32>
    %13 = vector.shape_cast %12 : vector<1x1x32xf32> to vector<1x32xf32>
    %c0_19 = arith.constant 0 : index
    %c0_20 = arith.constant 0 : index
    %c0_21 = arith.constant 0 : index
    %14 = vector.load %arg9[%c0_19, %c0_20, %c0_21] : memref<2x32x32xbf16, #tpu.memory_space<vmem>>, vector<1x32x32xbf16>
    %15 = vector.shape_cast %14 : vector<1x32x32xbf16> to vector<32x32xbf16>
    %c0_22 = arith.constant 0 : index
    %c0_23 = arith.constant 0 : index
    %c0_24 = arith.constant 0 : index
    %16 = vector.load %arg10[%c0_22, %c0_23, %c0_24] : memref<2x1x32xf32, #tpu.memory_space<vmem>>, vector<1x1x32xf32>
    %17 = vector.shape_cast %16 : vector<1x1x32xf32> to vector<1x32xf32>
    %c0_25 = arith.constant 0 : index
    %c0_26 = arith.constant 0 : index
    %c0_27 = arith.constant 0 : index
    %18 = vector.load %arg11[%c0_25, %c0_26, %c0_27] : memref<2x32x32xbf16, #tpu.memory_space<vmem>>, vector<1x32x32xbf16>
    %19 = vector.shape_cast %18 : vector<1x32x32xbf16> to vector<32x32xbf16>
    %c0_28 = arith.constant 0 : index
    %c0_29 = arith.constant 0 : index
    %c0_30 = arith.constant 0 : index
    %20 = vector.load %arg12[%c0_28, %c0_29, %c0_30] : memref<2x1x32xf32, #tpu.memory_space<vmem>>, vector<1x1x32xf32>
    %21 = vector.shape_cast %20 : vector<1x1x32xf32> to vector<1x32xf32>
    %22 = arith.truncf %0 : vector<8x32xf32> to vector<8x32xbf16>
    %cst = arith.constant dense<0.000000e+00> : vector<8x32xf32>
    %23 = tpu.matmul %22, %7, %cst {dimension_numbers = #tpu.dot_dimension_numbers<[1], [0], [0], [1], [0, 0, 1, 1], [], []>} : vector<8x32xbf16>, vector<32x32xbf16>, vector<8x32xf32> -> vector<8x32xf32>
    %24 = vector.broadcast %9 : vector<1x32xf32> to vector<8x32xf32>
    %25 = arith.addf %23, %24 : vector<8x32xf32>
    %cst_31 = arith.constant dense<0.000000e+00> : vector<8x32xf32>
    %26 = tpu.matmul %5, %11, %cst_31 {dimension_numbers = #tpu.dot_dimension_numbers<[1], [0], [0], [1], [0, 0, 1, 1], [], []>} : vector<8x32xbf16>, vector<32x32xbf16>, vector<8x32xf32> -> vector<8x32xf32>
    %27 = vector.broadcast %13 : vector<1x32xf32> to vector<8x32xf32>
    %28 = arith.addf %26, %27 : vector<8x32xf32>
    %cst_32 = arith.constant dense<0.000000e+00> : vector<8x32xf32>
    %29 = tpu.matmul %5, %15, %cst_32 {dimension_numbers = #tpu.dot_dimension_numbers<[1], [0], [0], [1], [0, 0, 1, 1], [], []>} : vector<8x32xbf16>, vector<32x32xbf16>, vector<8x32xf32> -> vector<8x32xf32>
    %30 = vector.broadcast %17 : vector<1x32xf32> to vector<8x32xf32>
    %31 = arith.addf %29, %30 : vector<8x32xf32>
    %32 = vector.shape_cast %25 : vector<8x32xf32> to vector<8x4x8xf32>
    %33 = arith.truncf %32 : vector<8x4x8xf32> to vector<8x4x8xbf16>
    %34 = vector.shape_cast %28 : vector<8x32xf32> to vector<8x4x8xf32>
    %35 = arith.truncf %34 : vector<8x4x8xf32> to vector<8x4x8xbf16>
    %36 = vector.shape_cast %31 : vector<8x32xf32> to vector<8x4x8xf32>
    %37 = arith.truncf %36 : vector<8x4x8xf32> to vector<8x4x8xbf16>
    "tpu.trace_start"() <{level = 10 : i32, message = "qhd,khd->hqk"}> : () -> ()
    %cst_33 = arith.constant dense<0.000000e+00> : vector<4x8x8xf32>
    %38 = tpu.matmul %33, %35, %cst_33 {dimension_numbers = #tpu.dot_dimension_numbers<[2], [2], [0], [0], [0, 1, 0, 0, 1, 0], [1], [1]>} : vector<8x4x8xbf16>, vector<8x4x8xbf16>, vector<4x8x8xf32> -> vector<4x8x8xf32>
    "tpu.trace_stop"() : () -> ()
    %39 = vector.shape_cast %3 : vector<8x8xf32> to vector<1x8x8xf32>
    %40 = vector.broadcast %39 : vector<1x8x8xf32> to vector<4x8x8xf32>
    %41 = arith.addf %38, %40 : vector<4x8x8xf32>
    %cst_34 = arith.constant dense<0xFF800000> : vector<4x8xf32>
    %42 = vector.multi_reduction <maximumf>, %41, %cst_34 [2] : vector<4x8x8xf32> to vector<4x8xf32>
    %43 = vector.shape_cast %42 : vector<4x8xf32> to vector<4x8x1xf32>
    %44 = vector.broadcast %43 : vector<4x8x1xf32> to vector<4x8x8xf32>
    %45 = arith.subf %41, %44 : vector<4x8x8xf32>
    %46 = math.exp %45 : vector<4x8x8xf32>
    %cst_35 = arith.constant dense<0.000000e+00> : vector<4x8xf32>
    %47 = vector.multi_reduction <add>, %46, %cst_35 [2] : vector<4x8x8xf32> to vector<4x8xf32>
    %48 = vector.shape_cast %47 : vector<4x8xf32> to vector<4x8x1xf32>
    %49 = tpu.reciprocal %48 {approx = true} : vector<4x8x1xf32> -> vector<4x8x1xf32>
    %50 = vector.broadcast %49 : vector<4x8x1xf32> to vector<4x8x8xf32>
    %51 = arith.mulf %46, %50 : vector<4x8x8xf32>
    %52 = arith.truncf %51 : vector<4x8x8xf32> to vector<4x8x8xbf16>
    "tpu.trace_start"() <{level = 10 : i32, message = "hqk,khd->qhd"}> : () -> ()
    %cst_36 = arith.constant dense<0.000000e+00> : vector<4x8x8xf32>
    %53 = tpu.matmul %37, %52, %cst_36 {dimension_numbers = #tpu.dot_dimension_numbers<[0], [2], [2], [1], [0, 1, 0, 2, 1, 1], [1], [0]>} : vector<8x4x8xbf16>, vector<4x8x8xbf16>, vector<4x8x8xf32> -> vector<4x8x8xf32>
    %54 = tpu.transpose %53, [2, 0, 1] : vector<4x8x8xf32> -> vector<8x4x8xf32>
    "tpu.trace_stop"() : () -> ()
    %55 = vector.shape_cast %54 : vector<8x4x8xf32> to vector<8x32xf32>
    %56 = arith.truncf %55 : vector<8x32xf32> to vector<8x32xbf16>
    %cst_37 = arith.constant dense<0.000000e+00> : vector<8x32xf32>
    %57 = tpu.matmul %56, %19, %cst_37 {dimension_numbers = #tpu.dot_dimension_numbers<[1], [0], [0], [1], [0, 0, 1, 1], [], []>} : vector<8x32xbf16>, vector<32x32xbf16>, vector<8x32xf32> -> vector<8x32xf32>
    %58 = vector.broadcast %21 : vector<1x32xf32> to vector<8x32xf32>
    %59 = arith.addf %57, %58 : vector<8x32xf32>
    %60 = arith.addf %0, %59 : vector<8x32xf32>
    %c0_38 = arith.constant 0 : index
    %c0_39 = arith.constant 0 : index
    %c0_40 = arith.constant 0 : index
    %61 = vector.load %arg21[%c0_38, %c0_39, %c0_40] : memref<2x1x32xf32, #tpu.memory_space<vmem>>, vector<1x1x32xf32>
    %62 = vector.shape_cast %61 : vector<1x1x32xf32> to vector<1x32xf32>
    %c0_41 = arith.constant 0 : index
    %c0_42 = arith.constant 0 : index
    %c0_43 = arith.constant 0 : index
    %63 = vector.load %arg22[%c0_41, %c0_42, %c0_43] : memref<2x1x32xf32, #tpu.memory_space<vmem>>, vector<1x1x32xf32>
    %64 = vector.shape_cast %63 : vector<1x1x32xf32> to vector<1x32xf32>
    %cst_44 = arith.constant dense<0.000000e+00> : vector<8xf32>
    %65 = vector.multi_reduction <add>, %60, %cst_44 [1] : vector<8x32xf32> to vector<8xf32>
    %66 = vector.shape_cast %65 : vector<8xf32> to vector<8x1xf32>
    %cst_45 = arith.constant 3.200000e+01 : f32
    %67 = vector.broadcast %cst_45 : f32 to vector<8x1xf32>
    %68 = arith.divf %66, %67 : vector<8x1xf32>
    %69 = arith.mulf %60, %60 : vector<8x32xf32>
    %cst_46 = arith.constant dense<0.000000e+00> : vector<8xf32>
    %70 = vector.multi_reduction <add>, %69, %cst_46 [1] : vector<8x32xf32> to vector<8xf32>
    %71 = vector.shape_cast %70 : vector<8xf32> to vector<8x1xf32>
    %cst_47 = arith.constant 3.200000e+01 : f32
    %72 = vector.broadcast %cst_47 : f32 to vector<8x1xf32>
    %73 = arith.divf %71, %72 : vector<8x1xf32>
    %74 = arith.mulf %68, %68 : vector<8x1xf32>
    %75 = arith.subf %73, %74 : vector<8x1xf32>
    %76 = vector.broadcast %68 : vector<8x1xf32> to vector<8x32xf32>
    %77 = arith.subf %60, %76 : vector<8x32xf32>
    %cst_48 = arith.constant 9.99999974E-6 : f32
    %78 = vector.broadcast %cst_48 : f32 to vector<8x1xf32>
    %79 = arith.addf %75, %78 : vector<8x1xf32>
    %80 = math.rsqrt %79 : vector<8x1xf32>
    %81 = vector.broadcast %80 : vector<8x1xf32> to vector<8x32xf32>
    %82 = arith.mulf %77, %81 : vector<8x32xf32>
    %83 = vector.broadcast %62 : vector<1x32xf32> to vector<8x32xf32>
    %84 = arith.mulf %82, %83 : vector<8x32xf32>
    %85 = vector.broadcast %64 : vector<1x32xf32> to vector<8x32xf32>
    %86 = arith.addf %84, %85 : vector<8x32xf32>
    %c0_49 = arith.constant 0 : index
    %c0_50 = arith.constant 0 : index
    %c0_51 = arith.constant 0 : index
    %87 = vector.load %arg13[%c0_49, %c0_50, %c0_51] : memref<2x32x32xbf16, #tpu.memory_space<vmem>>, vector<1x32x32xbf16>
    %88 = vector.shape_cast %87 : vector<1x32x32xbf16> to vector<32x32xbf16>
    %c0_52 = arith.constant 0 : index
    %c0_53 = arith.constant 0 : index
    %c0_54 = arith.constant 0 : index
    %89 = vector.load %arg14[%c0_52, %c0_53, %c0_54] : memref<2x1x32xf32, #tpu.memory_space<vmem>>, vector<1x1x32xf32>
    %90 = vector.shape_cast %89 : vector<1x1x32xf32> to vector<1x32xf32>
    %c0_55 = arith.constant 0 : index
    %c0_56 = arith.constant 0 : index
    %c0_57 = arith.constant 0 : index
    %91 = vector.load %arg15[%c0_55, %c0_56, %c0_57] : memref<2x32x32xbf16, #tpu.memory_space<vmem>>, vector<1x32x32xbf16>
    %92 = vector.shape_cast %91 : vector<1x32x32xbf16> to vector<32x32xbf16>
    %c0_58 = arith.constant 0 : index
    %c0_59 = arith.constant 0 : index
    %c0_60 = arith.constant 0 : index
    %93 = vector.load %arg16[%c0_58, %c0_59, %c0_60] : memref<2x1x32xf32, #tpu.memory_space<vmem>>, vector<1x1x32xf32>
    %94 = vector.shape_cast %93 : vector<1x1x32xf32> to vector<1x32xf32>
    %c0_61 = arith.constant 0 : index
    %c0_62 = arith.constant 0 : index
    %c0_63 = arith.constant 0 : index
    %95 = vector.load %arg17[%c0_61, %c0_62, %c0_63] : memref<2x32x32xbf16, #tpu.memory_space<vmem>>, vector<1x32x32xbf16>
    %96 = vector.shape_cast %95 : vector<1x32x32xbf16> to vector<32x32xbf16>
    %c0_64 = arith.constant 0 : index
    %c0_65 = arith.constant 0 : index
    %c0_66 = arith.constant 0 : index
    %97 = vector.load %arg18[%c0_64, %c0_65, %c0_66] : memref<2x1x32xf32, #tpu.memory_space<vmem>>, vector<1x1x32xf32>
    %98 = vector.shape_cast %97 : vector<1x1x32xf32> to vector<1x32xf32>
    %c0_67 = arith.constant 0 : index
    %c0_68 = arith.constant 0 : index
    %c0_69 = arith.constant 0 : index
    %99 = vector.load %arg19[%c0_67, %c0_68, %c0_69] : memref<2x32x32xbf16, #tpu.memory_space<vmem>>, vector<1x32x32xbf16>
    %100 = vector.shape_cast %99 : vector<1x32x32xbf16> to vector<32x32xbf16>
    %c0_70 = arith.constant 0 : index
    %c0_71 = arith.constant 0 : index
    %c0_72 = arith.constant 0 : index
    %101 = vector.load %arg20[%c0_70, %c0_71, %c0_72] : memref<2x1x32xf32, #tpu.memory_space<vmem>>, vector<1x1x32xf32>
    %102 = vector.shape_cast %101 : vector<1x1x32xf32> to vector<1x32xf32>
    %103 = arith.truncf %86 : vector<8x32xf32> to vector<8x32xbf16>
    %cst_73 = arith.constant dense<0.000000e+00> : vector<8x32xf32>
    %104 = tpu.matmul %103, %88, %cst_73 {dimension_numbers = #tpu.dot_dimension_numbers<[1], [0], [0], [1], [0, 0, 1, 1], [], []>} : vector<8x32xbf16>, vector<32x32xbf16>, vector<8x32xf32> -> vector<8x32xf32>
    %105 = vector.broadcast %90 : vector<1x32xf32> to vector<8x32xf32>
    %106 = arith.addf %104, %105 : vector<8x32xf32>
    %cst_74 = arith.constant dense<0.000000e+00> : vector<16x32xf32>
    %107 = tpu.matmul %2, %92, %cst_74 {dimension_numbers = #tpu.dot_dimension_numbers<[1], [0], [0], [1], [0, 0, 1, 1], [], []>} : vector<16x32xbf16>, vector<32x32xbf16>, vector<16x32xf32> -> vector<16x32xf32>
    %108 = vector.broadcast %94 : vector<1x32xf32> to vector<16x32xf32>
    %109 = arith.addf %107, %108 : vector<16x32xf32>
    %cst_75 = arith.constant dense<0.000000e+00> : vector<16x32xf32>
    %110 = tpu.matmul %2, %96, %cst_75 {dimension_numbers = #tpu.dot_dimension_numbers<[1], [0], [0], [1], [0, 0, 1, 1], [], []>} : vector<16x32xbf16>, vector<32x32xbf16>, vector<16x32xf32> -> vector<16x32xf32>
    %111 = vector.broadcast %98 : vector<1x32xf32> to vector<16x32xf32>
    %112 = arith.addf %110, %111 : vector<16x32xf32>
    %113 = vector.shape_cast %106 : vector<8x32xf32> to vector<8x4x8xf32>
    %114 = arith.truncf %113 : vector<8x4x8xf32> to vector<8x4x8xbf16>
    %115 = vector.shape_cast %109 : vector<16x32xf32> to vector<16x4x8xf32>
    %116 = arith.truncf %115 : vector<16x4x8xf32> to vector<16x4x8xbf16>
    %117 = vector.shape_cast %112 : vector<16x32xf32> to vector<16x4x8xf32>
    %118 = arith.truncf %117 : vector<16x4x8xf32> to vector<16x4x8xbf16>
    "tpu.trace_start"() <{level = 10 : i32, message = "qhd,khd->hqk"}> : () -> ()
    %cst_76 = arith.constant dense<0.000000e+00> : vector<4x8x16xf32>
    %119 = tpu.matmul %114, %116, %cst_76 {dimension_numbers = #tpu.dot_dimension_numbers<[2], [2], [0], [0], [0, 1, 0, 0, 1, 0], [1], [1]>} : vector<8x4x8xbf16>, vector<16x4x8xbf16>, vector<4x8x16xf32> -> vector<4x8x16xf32>
    "tpu.trace_stop"() : () -> ()
    %120 = vector.shape_cast %4 : vector<8x16xf32> to vector<1x8x16xf32>
    %121 = vector.broadcast %120 : vector<1x8x16xf32> to vector<4x8x16xf32>
    %122 = arith.addf %119, %121 : vector<4x8x16xf32>
    %cst_77 = arith.constant dense<0xFF800000> : vector<4x8xf32>
    %123 = vector.multi_reduction <maximumf>, %122, %cst_77 [2] : vector<4x8x16xf32> to vector<4x8xf32>
    %124 = vector.shape_cast %123 : vector<4x8xf32> to vector<4x8x1xf32>
    %125 = vector.broadcast %124 : vector<4x8x1xf32> to vector<4x8x16xf32>
    %126 = arith.subf %122, %125 : vector<4x8x16xf32>
    %127 = math.exp %126 : vector<4x8x16xf32>
    %cst_78 = arith.constant dense<0.000000e+00> : vector<4x8xf32>
    %128 = vector.multi_reduction <add>, %127, %cst_78 [2] : vector<4x8x16xf32> to vector<4x8xf32>
    %129 = vector.shape_cast %128 : vector<4x8xf32> to vector<4x8x1xf32>
    %130 = tpu.reciprocal %129 {approx = true} : vector<4x8x1xf32> -> vector<4x8x1xf32>
    %131 = vector.broadcast %130 : vector<4x8x1xf32> to vector<4x8x16xf32>
    %132 = arith.mulf %127, %131 : vector<4x8x16xf32>
    %133 = arith.truncf %132 : vector<4x8x16xf32> to vector<4x8x16xbf16>
    "tpu.trace_start"() <{level = 10 : i32, message = "hqk,khd->qhd"}> : () -> ()
    %cst_79 = arith.constant dense<0.000000e+00> : vector<4x8x8xf32>
    %134 = tpu.matmul %118, %133, %cst_79 {dimension_numbers = #tpu.dot_dimension_numbers<[0], [2], [2], [1], [0, 1, 0, 2, 1, 1], [1], [0]>} : vector<16x4x8xbf16>, vector<4x8x16xbf16>, vector<4x8x8xf32> -> vector<4x8x8xf32>
    %135 = tpu.transpose %134, [2, 0, 1] : vector<4x8x8xf32> -> vector<8x4x8xf32>
    "tpu.trace_stop"() : () -> ()
    %136 = vector.shape_cast %135 : vector<8x4x8xf32> to vector<8x32xf32>
    %137 = arith.truncf %136 : vector<8x32xf32> to vector<8x32xbf16>
    %cst_80 = arith.constant dense<0.000000e+00> : vector<8x32xf32>
    %138 = tpu.matmul %137, %100, %cst_80 {dimension_numbers = #tpu.dot_dimension_numbers<[1], [0], [0], [1], [0, 0, 1, 1], [], []>} : vector<8x32xbf16>, vector<32x32xbf16>, vector<8x32xf32> -> vector<8x32xf32>
    %139 = vector.broadcast %102 : vector<1x32xf32> to vector<8x32xf32>
    %140 = arith.addf %138, %139 : vector<8x32xf32>
    %141 = arith.addf %86, %140 : vector<8x32xf32>
    %c0_81 = arith.constant 0 : index
    %c0_82 = arith.constant 0 : index
    %c0_83 = arith.constant 0 : index
    %142 = vector.load %arg23[%c0_81, %c0_82, %c0_83] : memref<2x1x32xf32, #tpu.memory_space<vmem>>, vector<1x1x32xf32>
    %143 = vector.shape_cast %142 : vector<1x1x32xf32> to vector<1x32xf32>
    %c0_84 = arith.constant 0 : index
    %c0_85 = arith.constant 0 : index
    %c0_86 = arith.constant 0 : index
    %144 = vector.load %arg24[%c0_84, %c0_85, %c0_86] : memref<2x1x32xf32, #tpu.memory_space<vmem>>, vector<1x1x32xf32>
    %145 = vector.shape_cast %144 : vector<1x1x32xf32> to vector<1x32xf32>
    %cst_87 = arith.constant dense<0.000000e+00> : vector<8xf32>
    %146 = vector.multi_reduction <add>, %141, %cst_87 [1] : vector<8x32xf32> to vector<8xf32>
    %147 = vector.shape_cast %146 : vector<8xf32> to vector<8x1xf32>
    %cst_88 = arith.constant 3.200000e+01 : f32
    %148 = vector.broadcast %cst_88 : f32 to vector<8x1xf32>
    %149 = arith.divf %147, %148 : vector<8x1xf32>
    %150 = arith.mulf %141, %141 : vector<8x32xf32>
    %cst_89 = arith.constant dense<0.000000e+00> : vector<8xf32>
    %151 = vector.multi_reduction <add>, %150, %cst_89 [1] : vector<8x32xf32> to vector<8xf32>
    %152 = vector.shape_cast %151 : vector<8xf32> to vector<8x1xf32>
    %cst_90 = arith.constant 3.200000e+01 : f32
    %153 = vector.broadcast %cst_90 : f32 to vector<8x1xf32>
    %154 = arith.divf %152, %153 : vector<8x1xf32>
    %155 = arith.mulf %149, %149 : vector<8x1xf32>
    %156 = arith.subf %154, %155 : vector<8x1xf32>
    %157 = vector.broadcast %149 : vector<8x1xf32> to vector<8x32xf32>
    %158 = arith.subf %141, %157 : vector<8x32xf32>
    %cst_91 = arith.constant 9.99999974E-6 : f32
    %159 = vector.broadcast %cst_91 : f32 to vector<8x1xf32>
    %160 = arith.addf %156, %159 : vector<8x1xf32>
    %161 = math.rsqrt %160 : vector<8x1xf32>
    %162 = vector.broadcast %161 : vector<8x1xf32> to vector<8x32xf32>
    %163 = arith.mulf %158, %162 : vector<8x32xf32>
    %164 = vector.broadcast %143 : vector<1x32xf32> to vector<8x32xf32>
    %165 = arith.mulf %163, %164 : vector<8x32xf32>
    %166 = vector.broadcast %145 : vector<1x32xf32> to vector<8x32xf32>
    %167 = arith.addf %165, %166 : vector<8x32xf32>
    %168 = arith.truncf %167 : vector<8x32xf32> to vector<8x32xbf16>
    %c0_92 = arith.constant 0 : index
    %c0_93 = arith.constant 0 : index
    %c0_94 = arith.constant 0 : index
    %169 = vector.load %arg27[%c0_92, %c0_93, %c0_94] : memref<2x32x64xbf16, #tpu.memory_space<vmem>>, vector<1x32x64xbf16>
    %170 = vector.shape_cast %169 : vector<1x32x64xbf16> to vector<32x64xbf16>
    %cst_95 = arith.constant dense<0.000000e+00> : vector<8x64xf32>
    %171 = tpu.matmul %168, %170, %cst_95 {dimension_numbers = #tpu.dot_dimension_numbers<[1], [0], [0], [1], [0, 0, 1, 1], [], []>} : vector<8x32xbf16>, vector<32x64xbf16>, vector<8x64xf32> -> vector<8x64xf32>
    %c0_96 = arith.constant 0 : index
    %c0_97 = arith.constant 0 : index
    %c0_98 = arith.constant 0 : index
    %172 = vector.load %arg28[%c0_96, %c0_97, %c0_98] : memref<2x1x64xf32, #tpu.memory_space<vmem>>, vector<1x1x64xf32>
    %173 = vector.shape_cast %172 : vector<1x1x64xf32> to vector<1x64xf32>
    %174 = vector.broadcast %173 : vector<1x64xf32> to vector<8x64xf32>
    %175 = arith.addf %171, %174 : vector<8x64xf32>
    %cst_99 = arith.constant 0.000000e+00 : f32
    %176 = vector.broadcast %cst_99 : f32 to vector<8x64xf32>
    %177 = arith.maximumf %175, %176 : vector<8x64xf32>
    %178 = arith.truncf %177 : vector<8x64xf32> to vector<8x64xbf16>
    %c0_100 = arith.constant 0 : index
    %c0_101 = arith.constant 0 : index
    %c0_102 = arith.constant 0 : index
    %179 = vector.load %arg29[%c0_100, %c0_101, %c0_102] : memref<2x64x32xbf16, #tpu.memory_space<vmem>>, vector<1x64x32xbf16>
    %180 = vector.shape_cast %179 : vector<1x64x32xbf16> to vector<64x32xbf16>
    %cst_103 = arith.constant dense<0.000000e+00> : vector<8x32xf32>
    %181 = tpu.matmul %178, %180, %cst_103 {dimension_numbers = #tpu.dot_dimension_numbers<[1], [0], [0], [1], [0, 0, 1, 1], [], []>} : vector<8x64xbf16>, vector<64x32xbf16>, vector<8x32xf32> -> vector<8x32xf32>
    %c0_104 = arith.constant 0 : index
    %c0_105 = arith.constant 0 : index
    %c0_106 = arith.constant 0 : index
    %182 = vector.load %arg30[%c0_104, %c0_105, %c0_106] : memref<2x1x32xf32, #tpu.memory_space<vmem>>, vector<1x1x32xf32>
    %183 = vector.shape_cast %182 : vector<1x1x32xf32> to vector<1x32xf32>
    %184 = vector.broadcast %183 : vector<1x32xf32> to vector<8x32xf32>
    %185 = arith.addf %181, %184 : vector<8x32xf32>
    %186 = arith.addf %167, %185 : vector<8x32xf32>
    %c0_107 = arith.constant 0 : index
    %c0_108 = arith.constant 0 : index
    %c0_109 = arith.constant 0 : index
    %187 = vector.load %arg25[%c0_107, %c0_108, %c0_109] : memref<2x1x32xf32, #tpu.memory_space<vmem>>, vector<1x1x32xf32>
    %188 = vector.shape_cast %187 : vector<1x1x32xf32> to vector<1x32xf32>
    %c0_110 = arith.constant 0 : index
    %c0_111 = arith.constant 0 : index
    %c0_112 = arith.constant 0 : index
    %189 = vector.load %arg26[%c0_110, %c0_111, %c0_112] : memref<2x1x32xf32, #tpu.memory_space<vmem>>, vector<1x1x32xf32>
    %190 = vector.shape_cast %189 : vector<1x1x32xf32> to vector<1x32xf32>
    %cst_113 = arith.constant dense<0.000000e+00> : vector<8xf32>
    %191 = vector.multi_reduction <add>, %186, %cst_113 [1] : vector<8x32xf32> to vector<8xf32>
    %192 = vector.shape_cast %191 : vector<8xf32> to vector<8x1xf32>
    %cst_114 = arith.constant 3.200000e+01 : f32
    %193 = vector.broadcast %cst_114 : f32 to vector<8x1xf32>
    %194 = arith.divf %192, %193 : vector<8x1xf32>
    %195 = arith.mulf %186, %186 : vector<8x32xf32>
    %cst_115 = arith.constant dense<0.000000e+00> : vector<8xf32>
    %196 = vector.multi_reduction <add>, %195, %cst_115 [1] : vector<8x32xf32> to vector<8xf32>
    %197 = vector.shape_cast %196 : vector<8xf32> to vector<8x1xf32>
    %cst_116 = arith.constant 3.200000e+01 : f32
    %198 = vector.broadcast %cst_116 : f32 to vector<8x1xf32>
    %199 = arith.divf %197, %198 : vector<8x1xf32>
    %200 = arith.mulf %194, %194 : vector<8x1xf32>
    %201 = arith.subf %199, %200 : vector<8x1xf32>
    %202 = vector.broadcast %194 : vector<8x1xf32> to vector<8x32xf32>
    %203 = arith.subf %186, %202 : vector<8x32xf32>
    %cst_117 = arith.constant 9.99999974E-6 : f32
    %204 = vector.broadcast %cst_117 : f32 to vector<8x1xf32>
    %205 = arith.addf %201, %204 : vector<8x1xf32>
    %206 = math.rsqrt %205 : vector<8x1xf32>
    %207 = vector.broadcast %206 : vector<8x1xf32> to vector<8x32xf32>
    %208 = arith.mulf %203, %207 : vector<8x32xf32>
    %209 = vector.broadcast %188 : vector<1x32xf32> to vector<8x32xf32>
    %210 = arith.mulf %208, %209 : vector<8x32xf32>
    %211 = vector.broadcast %190 : vector<1x32xf32> to vector<8x32xf32>
    %212 = arith.addf %210, %211 : vector<8x32xf32>
    %213 = arith.truncf %212 : vector<8x32xf32> to vector<8x32xbf16>
    %c1 = arith.constant 1 : index
    %c0_118 = arith.constant 0 : index
    %c0_119 = arith.constant 0 : index
    %214 = vector.load %arg5[%c1, %c0_118, %c0_119] : memref<2x32x32xbf16, #tpu.memory_space<vmem>>, vector<1x32x32xbf16>
    %215 = vector.shape_cast %214 : vector<1x32x32xbf16> to vector<32x32xbf16>
    %c1_120 = arith.constant 1 : index
    %c0_121 = arith.constant 0 : index
    %c0_122 = arith.constant 0 : index
    %216 = vector.load %arg6[%c1_120, %c0_121, %c0_122] : memref<2x1x32xf32, #tpu.memory_space<vmem>>, vector<1x1x32xf32>
    %217 = vector.shape_cast %216 : vector<1x1x32xf32> to vector<1x32xf32>
    %c1_123 = arith.constant 1 : index
    %c0_124 = arith.constant 0 : index
    %c0_125 = arith.constant 0 : index
    %218 = vector.load %arg7[%c1_123, %c0_124, %c0_125] : memref<2x32x32xbf16, #tpu.memory_space<vmem>>, vector<1x32x32xbf16>
    %219 = vector.shape_cast %218 : vector<1x32x32xbf16> to vector<32x32xbf16>
    %c1_126 = arith.constant 1 : index
    %c0_127 = arith.constant 0 : index
    %c0_128 = arith.constant 0 : index
    %220 = vector.load %arg8[%c1_126, %c0_127, %c0_128] : memref<2x1x32xf32, #tpu.memory_space<vmem>>, vector<1x1x32xf32>
    %221 = vector.shape_cast %220 : vector<1x1x32xf32> to vector<1x32xf32>
    %c1_129 = arith.constant 1 : index
    %c0_130 = arith.constant 0 : index
    %c0_131 = arith.constant 0 : index
    %222 = vector.load %arg9[%c1_129, %c0_130, %c0_131] : memref<2x32x32xbf16, #tpu.memory_space<vmem>>, vector<1x32x32xbf16>
    %223 = vector.shape_cast %222 : vector<1x32x32xbf16> to vector<32x32xbf16>
    %c1_132 = arith.constant 1 : index
    %c0_133 = arith.constant 0 : index
    %c0_134 = arith.constant 0 : index
    %224 = vector.load %arg10[%c1_132, %c0_133, %c0_134] : memref<2x1x32xf32, #tpu.memory_space<vmem>>, vector<1x1x32xf32>
    %225 = vector.shape_cast %224 : vector<1x1x32xf32> to vector<1x32xf32>
    %c1_135 = arith.constant 1 : index
    %c0_136 = arith.constant 0 : index
    %c0_137 = arith.constant 0 : index
    %226 = vector.load %arg11[%c1_135, %c0_136, %c0_137] : memref<2x32x32xbf16, #tpu.memory_space<vmem>>, vector<1x32x32xbf16>
    %227 = vector.shape_cast %226 : vector<1x32x32xbf16> to vector<32x32xbf16>
    %c1_138 = arith.constant 1 : index
    %c0_139 = arith.constant 0 : index
    %c0_140 = arith.constant 0 : index
    %228 = vector.load %arg12[%c1_138, %c0_139, %c0_140] : memref<2x1x32xf32, #tpu.memory_space<vmem>>, vector<1x1x32xf32>
    %229 = vector.shape_cast %228 : vector<1x1x32xf32> to vector<1x32xf32>
    %230 = arith.truncf %212 : vector<8x32xf32> to vector<8x32xbf16>
    %cst_141 = arith.constant dense<0.000000e+00> : vector<8x32xf32>
    %231 = tpu.matmul %230, %215, %cst_141 {dimension_numbers = #tpu.dot_dimension_numbers<[1], [0], [0], [1], [0, 0, 1, 1], [], []>} : vector<8x32xbf16>, vector<32x32xbf16>, vector<8x32xf32> -> vector<8x32xf32>
    %232 = vector.broadcast %217 : vector<1x32xf32> to vector<8x32xf32>
    %233 = arith.addf %231, %232 : vector<8x32xf32>
    %cst_142 = arith.constant dense<0.000000e+00> : vector<8x32xf32>
    %234 = tpu.matmul %213, %219, %cst_142 {dimension_numbers = #tpu.dot_dimension_numbers<[1], [0], [0], [1], [0, 0, 1, 1], [], []>} : vector<8x32xbf16>, vector<32x32xbf16>, vector<8x32xf32> -> vector<8x32xf32>
    %235 = vector.broadcast %221 : vector<1x32xf32> to vector<8x32xf32>
    %236 = arith.addf %234, %235 : vector<8x32xf32>
    %cst_143 = arith.constant dense<0.000000e+00> : vector<8x32xf32>
    %237 = tpu.matmul %213, %223, %cst_143 {dimension_numbers = #tpu.dot_dimension_numbers<[1], [0], [0], [1], [0, 0, 1, 1], [], []>} : vector<8x32xbf16>, vector<32x32xbf16>, vector<8x32xf32> -> vector<8x32xf32>
    %238 = vector.broadcast %225 : vector<1x32xf32> to vector<8x32xf32>
    %239 = arith.addf %237, %238 : vector<8x32xf32>
    %240 = vector.shape_cast %233 : vector<8x32xf32> to vector<8x4x8xf32>
    %241 = arith.truncf %240 : vector<8x4x8xf32> to vector<8x4x8xbf16>
    %242 = vector.shape_cast %236 : vector<8x32xf32> to vector<8x4x8xf32>
    %243 = arith.truncf %242 : vector<8x4x8xf32> to vector<8x4x8xbf16>
    %244 = vector.shape_cast %239 : vector<8x32xf32> to vector<8x4x8xf32>
    %245 = arith.truncf %244 : vector<8x4x8xf32> to vector<8x4x8xbf16>
    "tpu.trace_start"() <{level = 10 : i32, message = "qhd,khd->hqk"}> : () -> ()
    %cst_144 = arith.constant dense<0.000000e+00> : vector<4x8x8xf32>
    %246 = tpu.matmul %241, %243, %cst_144 {dimension_numbers = #tpu.dot_dimension_numbers<[2], [2], [0], [0], [0, 1, 0, 0, 1, 0], [1], [1]>} : vector<8x4x8xbf16>, vector<8x4x8xbf16>, vector<4x8x8xf32> -> vector<4x8x8xf32>
    "tpu.trace_stop"() : () -> ()
    %247 = vector.shape_cast %3 : vector<8x8xf32> to vector<1x8x8xf32>
    %248 = vector.broadcast %247 : vector<1x8x8xf32> to vector<4x8x8xf32>
    %249 = arith.addf %246, %248 : vector<4x8x8xf32>
    %cst_145 = arith.constant dense<0xFF800000> : vector<4x8xf32>
    %250 = vector.multi_reduction <maximumf>, %249, %cst_145 [2] : vector<4x8x8xf32> to vector<4x8xf32>
    %251 = vector.shape_cast %250 : vector<4x8xf32> to vector<4x8x1xf32>
    %252 = vector.broadcast %251 : vector<4x8x1xf32> to vector<4x8x8xf32>
    %253 = arith.subf %249, %252 : vector<4x8x8xf32>
    %254 = math.exp %253 : vector<4x8x8xf32>
    %cst_146 = arith.constant dense<0.000000e+00> : vector<4x8xf32>
    %255 = vector.multi_reduction <add>, %254, %cst_146 [2] : vector<4x8x8xf32> to vector<4x8xf32>
    %256 = vector.shape_cast %255 : vector<4x8xf32> to vector<4x8x1xf32>
    %257 = tpu.reciprocal %256 {approx = true} : vector<4x8x1xf32> -> vector<4x8x1xf32>
    %258 = vector.broadcast %257 : vector<4x8x1xf32> to vector<4x8x8xf32>
    %259 = arith.mulf %254, %258 : vector<4x8x8xf32>
    %260 = arith.truncf %259 : vector<4x8x8xf32> to vector<4x8x8xbf16>
    "tpu.trace_start"() <{level = 10 : i32, message = "hqk,khd->qhd"}> : () -> ()
    %cst_147 = arith.constant dense<0.000000e+00> : vector<4x8x8xf32>
    %261 = tpu.matmul %245, %260, %cst_147 {dimension_numbers = #tpu.dot_dimension_numbers<[0], [2], [2], [1], [0, 1, 0, 2, 1, 1], [1], [0]>} : vector<8x4x8xbf16>, vector<4x8x8xbf16>, vector<4x8x8xf32> -> vector<4x8x8xf32>
    %262 = tpu.transpose %261, [2, 0, 1] : vector<4x8x8xf32> -> vector<8x4x8xf32>
    "tpu.trace_stop"() : () -> ()
    %263 = vector.shape_cast %262 : vector<8x4x8xf32> to vector<8x32xf32>
    %264 = arith.truncf %263 : vector<8x32xf32> to vector<8x32xbf16>
    %cst_148 = arith.constant dense<0.000000e+00> : vector<8x32xf32>
    %265 = tpu.matmul %264, %227, %cst_148 {dimension_numbers = #tpu.dot_dimension_numbers<[1], [0], [0], [1], [0, 0, 1, 1], [], []>} : vector<8x32xbf16>, vector<32x32xbf16>, vector<8x32xf32> -> vector<8x32xf32>
    %266 = vector.broadcast %229 : vector<1x32xf32> to vector<8x32xf32>
    %267 = arith.addf %265, %266 : vector<8x32xf32>
    %268 = arith.addf %212, %267 : vector<8x32xf32>
    %c1_149 = arith.constant 1 : index
    %c0_150 = arith.constant 0 : index
    %c0_151 = arith.constant 0 : index
    %269 = vector.load %arg21[%c1_149, %c0_150, %c0_151] : memref<2x1x32xf32, #tpu.memory_space<vmem>>, vector<1x1x32xf32>
    %270 = vector.shape_cast %269 : vector<1x1x32xf32> to vector<1x32xf32>
    %c1_152 = arith.constant 1 : index
    %c0_153 = arith.constant 0 : index
    %c0_154 = arith.constant 0 : index
    %271 = vector.load %arg22[%c1_152, %c0_153, %c0_154] : memref<2x1x32xf32, #tpu.memory_space<vmem>>, vector<1x1x32xf32>
    %272 = vector.shape_cast %271 : vector<1x1x32xf32> to vector<1x32xf32>
    %cst_155 = arith.constant dense<0.000000e+00> : vector<8xf32>
    %273 = vector.multi_reduction <add>, %268, %cst_155 [1] : vector<8x32xf32> to vector<8xf32>
    %274 = vector.shape_cast %273 : vector<8xf32> to vector<8x1xf32>
    %cst_156 = arith.constant 3.200000e+01 : f32
    %275 = vector.broadcast %cst_156 : f32 to vector<8x1xf32>
    %276 = arith.divf %274, %275 : vector<8x1xf32>
    %277 = arith.mulf %268, %268 : vector<8x32xf32>
    %cst_157 = arith.constant dense<0.000000e+00> : vector<8xf32>
    %278 = vector.multi_reduction <add>, %277, %cst_157 [1] : vector<8x32xf32> to vector<8xf32>
    %279 = vector.shape_cast %278 : vector<8xf32> to vector<8x1xf32>
    %cst_158 = arith.constant 3.200000e+01 : f32
    %280 = vector.broadcast %cst_158 : f32 to vector<8x1xf32>
    %281 = arith.divf %279, %280 : vector<8x1xf32>
    %282 = arith.mulf %276, %276 : vector<8x1xf32>
    %283 = arith.subf %281, %282 : vector<8x1xf32>
    %284 = vector.broadcast %276 : vector<8x1xf32> to vector<8x32xf32>
    %285 = arith.subf %268, %284 : vector<8x32xf32>
    %cst_159 = arith.constant 9.99999974E-6 : f32
    %286 = vector.broadcast %cst_159 : f32 to vector<8x1xf32>
    %287 = arith.addf %283, %286 : vector<8x1xf32>
    %288 = math.rsqrt %287 : vector<8x1xf32>
    %289 = vector.broadcast %288 : vector<8x1xf32> to vector<8x32xf32>
    %290 = arith.mulf %285, %289 : vector<8x32xf32>
    %291 = vector.broadcast %270 : vector<1x32xf32> to vector<8x32xf32>
    %292 = arith.mulf %290, %291 : vector<8x32xf32>
    %293 = vector.broadcast %272 : vector<1x32xf32> to vector<8x32xf32>
    %294 = arith.addf %292, %293 : vector<8x32xf32>
    %c1_160 = arith.constant 1 : index
    %c0_161 = arith.constant 0 : index
    %c0_162 = arith.constant 0 : index
    %295 = vector.load %arg13[%c1_160, %c0_161, %c0_162] : memref<2x32x32xbf16, #tpu.memory_space<vmem>>, vector<1x32x32xbf16>
    %296 = vector.shape_cast %295 : vector<1x32x32xbf16> to vector<32x32xbf16>
    %c1_163 = arith.constant 1 : index
    %c0_164 = arith.constant 0 : index
    %c0_165 = arith.constant 0 : index
    %297 = vector.load %arg14[%c1_163, %c0_164, %c0_165] : memref<2x1x32xf32, #tpu.memory_space<vmem>>, vector<1x1x32xf32>
    %298 = vector.shape_cast %297 : vector<1x1x32xf32> to vector<1x32xf32>
    %c1_166 = arith.constant 1 : index
    %c0_167 = arith.constant 0 : index
    %c0_168 = arith.constant 0 : index
    %299 = vector.load %arg15[%c1_166, %c0_167, %c0_168] : memref<2x32x32xbf16, #tpu.memory_space<vmem>>, vector<1x32x32xbf16>
    %300 = vector.shape_cast %299 : vector<1x32x32xbf16> to vector<32x32xbf16>
    %c1_169 = arith.constant 1 : index
    %c0_170 = arith.constant 0 : index
    %c0_171 = arith.constant 0 : index
    %301 = vector.load %arg16[%c1_169, %c0_170, %c0_171] : memref<2x1x32xf32, #tpu.memory_space<vmem>>, vector<1x1x32xf32>
    %302 = vector.shape_cast %301 : vector<1x1x32xf32> to vector<1x32xf32>
    %c1_172 = arith.constant 1 : index
    %c0_173 = arith.constant 0 : index
    %c0_174 = arith.constant 0 : index
    %303 = vector.load %arg17[%c1_172, %c0_173, %c0_174] : memref<2x32x32xbf16, #tpu.memory_space<vmem>>, vector<1x32x32xbf16>
    %304 = vector.shape_cast %303 : vector<1x32x32xbf16> to vector<32x32xbf16>
    %c1_175 = arith.constant 1 : index
    %c0_176 = arith.constant 0 : index
    %c0_177 = arith.constant 0 : index
    %305 = vector.load %arg18[%c1_175, %c0_176, %c0_177] : memref<2x1x32xf32, #tpu.memory_space<vmem>>, vector<1x1x32xf32>
    %306 = vector.shape_cast %305 : vector<1x1x32xf32> to vector<1x32xf32>
    %c1_178 = arith.constant 1 : index
    %c0_179 = arith.constant 0 : index
    %c0_180 = arith.constant 0 : index
    %307 = vector.load %arg19[%c1_178, %c0_179, %c0_180] : memref<2x32x32xbf16, #tpu.memory_space<vmem>>, vector<1x32x32xbf16>
    %308 = vector.shape_cast %307 : vector<1x32x32xbf16> to vector<32x32xbf16>
    %c1_181 = arith.constant 1 : index
    %c0_182 = arith.constant 0 : index
    %c0_183 = arith.constant 0 : index
    %309 = vector.load %arg20[%c1_181, %c0_182, %c0_183] : memref<2x1x32xf32, #tpu.memory_space<vmem>>, vector<1x1x32xf32>
    %310 = vector.shape_cast %309 : vector<1x1x32xf32> to vector<1x32xf32>
    %311 = arith.truncf %294 : vector<8x32xf32> to vector<8x32xbf16>
    %cst_184 = arith.constant dense<0.000000e+00> : vector<8x32xf32>
    %312 = tpu.matmul %311, %296, %cst_184 {dimension_numbers = #tpu.dot_dimension_numbers<[1], [0], [0], [1], [0, 0, 1, 1], [], []>} : vector<8x32xbf16>, vector<32x32xbf16>, vector<8x32xf32> -> vector<8x32xf32>
    %313 = vector.broadcast %298 : vector<1x32xf32> to vector<8x32xf32>
    %314 = arith.addf %312, %313 : vector<8x32xf32>
    %cst_185 = arith.constant dense<0.000000e+00> : vector<16x32xf32>
    %315 = tpu.matmul %2, %300, %cst_185 {dimension_numbers = #tpu.dot_dimension_numbers<[1], [0], [0], [1], [0, 0, 1, 1], [], []>} : vector<16x32xbf16>, vector<32x32xbf16>, vector<16x32xf32> -> vector<16x32xf32>
    %316 = vector.broadcast %302 : vector<1x32xf32> to vector<16x32xf32>
    %317 = arith.addf %315, %316 : vector<16x32xf32>
    %cst_186 = arith.constant dense<0.000000e+00> : vector<16x32xf32>
    %318 = tpu.matmul %2, %304, %cst_186 {dimension_numbers = #tpu.dot_dimension_numbers<[1], [0], [0], [1], [0, 0, 1, 1], [], []>} : vector<16x32xbf16>, vector<32x32xbf16>, vector<16x32xf32> -> vector<16x32xf32>
    %319 = vector.broadcast %306 : vector<1x32xf32> to vector<16x32xf32>
    %320 = arith.addf %318, %319 : vector<16x32xf32>
    %321 = vector.shape_cast %314 : vector<8x32xf32> to vector<8x4x8xf32>
    %322 = arith.truncf %321 : vector<8x4x8xf32> to vector<8x4x8xbf16>
    %323 = vector.shape_cast %317 : vector<16x32xf32> to vector<16x4x8xf32>
    %324 = arith.truncf %323 : vector<16x4x8xf32> to vector<16x4x8xbf16>
    %325 = vector.shape_cast %320 : vector<16x32xf32> to vector<16x4x8xf32>
    %326 = arith.truncf %325 : vector<16x4x8xf32> to vector<16x4x8xbf16>
    "tpu.trace_start"() <{level = 10 : i32, message = "qhd,khd->hqk"}> : () -> ()
    %cst_187 = arith.constant dense<0.000000e+00> : vector<4x8x16xf32>
    %327 = tpu.matmul %322, %324, %cst_187 {dimension_numbers = #tpu.dot_dimension_numbers<[2], [2], [0], [0], [0, 1, 0, 0, 1, 0], [1], [1]>} : vector<8x4x8xbf16>, vector<16x4x8xbf16>, vector<4x8x16xf32> -> vector<4x8x16xf32>
    "tpu.trace_stop"() : () -> ()
    %328 = vector.shape_cast %4 : vector<8x16xf32> to vector<1x8x16xf32>
    %329 = vector.broadcast %328 : vector<1x8x16xf32> to vector<4x8x16xf32>
    %330 = arith.addf %327, %329 : vector<4x8x16xf32>
    %cst_188 = arith.constant dense<0xFF800000> : vector<4x8xf32>
    %331 = vector.multi_reduction <maximumf>, %330, %cst_188 [2] : vector<4x8x16xf32> to vector<4x8xf32>
    %332 = vector.shape_cast %331 : vector<4x8xf32> to vector<4x8x1xf32>
    %333 = vector.broadcast %332 : vector<4x8x1xf32> to vector<4x8x16xf32>
    %334 = arith.subf %330, %333 : vector<4x8x16xf32>
    %335 = math.exp %334 : vector<4x8x16xf32>
    %cst_189 = arith.constant dense<0.000000e+00> : vector<4x8xf32>
    %336 = vector.multi_reduction <add>, %335, %cst_189 [2] : vector<4x8x16xf32> to vector<4x8xf32>
    %337 = vector.shape_cast %336 : vector<4x8xf32> to vector<4x8x1xf32>
    %338 = tpu.reciprocal %337 {approx = true} : vector<4x8x1xf32> -> vector<4x8x1xf32>
    %339 = vector.broadcast %338 : vector<4x8x1xf32> to vector<4x8x16xf32>
    %340 = arith.mulf %335, %339 : vector<4x8x16xf32>
    %341 = arith.truncf %340 : vector<4x8x16xf32> to vector<4x8x16xbf16>
    "tpu.trace_start"() <{level = 10 : i32, message = "hqk,khd->qhd"}> : () -> ()
    %cst_190 = arith.constant dense<0.000000e+00> : vector<4x8x8xf32>
    %342 = tpu.matmul %326, %341, %cst_190 {dimension_numbers = #tpu.dot_dimension_numbers<[0], [2], [2], [1], [0, 1, 0, 2, 1, 1], [1], [0]>} : vector<16x4x8xbf16>, vector<4x8x16xbf16>, vector<4x8x8xf32> -> vector<4x8x8xf32>
    %343 = tpu.transpose %342, [2, 0, 1] : vector<4x8x8xf32> -> vector<8x4x8xf32>
    "tpu.trace_stop"() : () -> ()
    %344 = vector.shape_cast %343 : vector<8x4x8xf32> to vector<8x32xf32>
    %345 = arith.truncf %344 : vector<8x32xf32> to vector<8x32xbf16>
    %cst_191 = arith.constant dense<0.000000e+00> : vector<8x32xf32>
    %346 = tpu.matmul %345, %308, %cst_191 {dimension_numbers = #tpu.dot_dimension_numbers<[1], [0], [0], [1], [0, 0, 1, 1], [], []>} : vector<8x32xbf16>, vector<32x32xbf16>, vector<8x32xf32> -> vector<8x32xf32>
    %347 = vector.broadcast %310 : vector<1x32xf32> to vector<8x32xf32>
    %348 = arith.addf %346, %347 : vector<8x32xf32>
    %349 = arith.addf %294, %348 : vector<8x32xf32>
    %c1_192 = arith.constant 1 : index
    %c0_193 = arith.constant 0 : index
    %c0_194 = arith.constant 0 : index
    %350 = vector.load %arg23[%c1_192, %c0_193, %c0_194] : memref<2x1x32xf32, #tpu.memory_space<vmem>>, vector<1x1x32xf32>
    %351 = vector.shape_cast %350 : vector<1x1x32xf32> to vector<1x32xf32>
    %c1_195 = arith.constant 1 : index
    %c0_196 = arith.constant 0 : index
    %c0_197 = arith.constant 0 : index
    %352 = vector.load %arg24[%c1_195, %c0_196, %c0_197] : memref<2x1x32xf32, #tpu.memory_space<vmem>>, vector<1x1x32xf32>
    %353 = vector.shape_cast %352 : vector<1x1x32xf32> to vector<1x32xf32>
    %cst_198 = arith.constant dense<0.000000e+00> : vector<8xf32>
    %354 = vector.multi_reduction <add>, %349, %cst_198 [1] : vector<8x32xf32> to vector<8xf32>
    %355 = vector.shape_cast %354 : vector<8xf32> to vector<8x1xf32>
    %cst_199 = arith.constant 3.200000e+01 : f32
    %356 = vector.broadcast %cst_199 : f32 to vector<8x1xf32>
    %357 = arith.divf %355, %356 : vector<8x1xf32>
    %358 = arith.mulf %349, %349 : vector<8x32xf32>
    %cst_200 = arith.constant dense<0.000000e+00> : vector<8xf32>
    %359 = vector.multi_reduction <add>, %358, %cst_200 [1] : vector<8x32xf32> to vector<8xf32>
    %360 = vector.shape_cast %359 : vector<8xf32> to vector<8x1xf32>
    %cst_201 = arith.constant 3.200000e+01 : f32
    %361 = vector.broadcast %cst_201 : f32 to vector<8x1xf32>
    %362 = arith.divf %360, %361 : vector<8x1xf32>
    %363 = arith.mulf %357, %357 : vector<8x1xf32>
    %364 = arith.subf %362, %363 : vector<8x1xf32>
    %365 = vector.broadcast %357 : vector<8x1xf32> to vector<8x32xf32>
    %366 = arith.subf %349, %365 : vector<8x32xf32>
    %cst_202 = arith.constant 9.99999974E-6 : f32
    %367 = vector.broadcast %cst_202 : f32 to vector<8x1xf32>
    %368 = arith.addf %364, %367 : vector<8x1xf32>
    %369 = math.rsqrt %368 : vector<8x1xf32>
    %370 = vector.broadcast %369 : vector<8x1xf32> to vector<8x32xf32>
    %371 = arith.mulf %366, %370 : vector<8x32xf32>
    %372 = vector.broadcast %351 : vector<1x32xf32> to vector<8x32xf32>
    %373 = arith.mulf %371, %372 : vector<8x32xf32>
    %374 = vector.broadcast %353 : vector<1x32xf32> to vector<8x32xf32>
    %375 = arith.addf %373, %374 : vector<8x32xf32>
    %376 = arith.truncf %375 : vector<8x32xf32> to vector<8x32xbf16>
    %c1_203 = arith.constant 1 : index
    %c0_204 = arith.constant 0 : index
    %c0_205 = arith.constant 0 : index
    %377 = vector.load %arg27[%c1_203, %c0_204, %c0_205] : memref<2x32x64xbf16, #tpu.memory_space<vmem>>, vector<1x32x64xbf16>
    %378 = vector.shape_cast %377 : vector<1x32x64xbf16> to vector<32x64xbf16>
    %cst_206 = arith.constant dense<0.000000e+00> : vector<8x64xf32>
    %379 = tpu.matmul %376, %378, %cst_206 {dimension_numbers = #tpu.dot_dimension_numbers<[1], [0], [0], [1], [0, 0, 1, 1], [], []>} : vector<8x32xbf16>, vector<32x64xbf16>, vector<8x64xf32> -> vector<8x64xf32>
    %c1_207 = arith.constant 1 : index
    %c0_208 = arith.constant 0 : index
    %c0_209 = arith.constant 0 : index
    %380 = vector.load %arg28[%c1_207, %c0_208, %c0_209] : memref<2x1x64xf32, #tpu.memory_space<vmem>>, vector<1x1x64xf32>
    %381 = vector.shape_cast %380 : vector<1x1x64xf32> to vector<1x64xf32>
    %382 = vector.broadcast %381 : vector<1x64xf32> to vector<8x64xf32>
    %383 = arith.addf %379, %382 : vector<8x64xf32>
    %cst_210 = arith.constant 0.000000e+00 : f32
    %384 = vector.broadcast %cst_210 : f32 to vector<8x64xf32>
    %385 = arith.maximumf %383, %384 : vector<8x64xf32>
    %386 = arith.truncf %385 : vector<8x64xf32> to vector<8x64xbf16>
    %c1_211 = arith.constant 1 : index
    %c0_212 = arith.constant 0 : index
    %c0_213 = arith.constant 0 : index
    %387 = vector.load %arg29[%c1_211, %c0_212, %c0_213] : memref<2x64x32xbf16, #tpu.memory_space<vmem>>, vector<1x64x32xbf16>
    %388 = vector.shape_cast %387 : vector<1x64x32xbf16> to vector<64x32xbf16>
    %cst_214 = arith.constant dense<0.000000e+00> : vector<8x32xf32>
    %389 = tpu.matmul %386, %388, %cst_214 {dimension_numbers = #tpu.dot_dimension_numbers<[1], [0], [0], [1], [0, 0, 1, 1], [], []>} : vector<8x64xbf16>, vector<64x32xbf16>, vector<8x32xf32> -> vector<8x32xf32>
    %c1_215 = arith.constant 1 : index
    %c0_216 = arith.constant 0 : index
    %c0_217 = arith.constant 0 : index
    %390 = vector.load %arg30[%c1_215, %c0_216, %c0_217] : memref<2x1x32xf32, #tpu.memory_space<vmem>>, vector<1x1x32xf32>
    %391 = vector.shape_cast %390 : vector<1x1x32xf32> to vector<1x32xf32>
    %392 = vector.broadcast %391 : vector<1x32xf32> to vector<8x32xf32>
    %393 = arith.addf %389, %392 : vector<8x32xf32>
    %394 = arith.addf %375, %393 : vector<8x32xf32>
    %c1_218 = arith.constant 1 : index
    %c0_219 = arith.constant 0 : index
    %c0_220 = arith.constant 0 : index
    %395 = vector.load %arg25[%c1_218, %c0_219, %c0_220] : memref<2x1x32xf32, #tpu.memory_space<vmem>>, vector<1x1x32xf32>
    %396 = vector.shape_cast %395 : vector<1x1x32xf32> to vector<1x32xf32>
    %c1_221 = arith.constant 1 : index
    %c0_222 = arith.constant 0 : index
    %c0_223 = arith.constant 0 : index
    %397 = vector.load %arg26[%c1_221, %c0_222, %c0_223] : memref<2x1x32xf32, #tpu.memory_space<vmem>>, vector<1x1x32xf32>
    %398 = vector.shape_cast %397 : vector<1x1x32xf32> to vector<1x32xf32>
    %cst_224 = arith.constant dense<0.000000e+00> : vector<8xf32>
    %399 = vector.multi_reduction <add>, %394, %cst_224 [1] : vector<8x32xf32> to vector<8xf32>
    %400 = vector.shape_cast %399 : vector<8xf32> to vector<8x1xf32>
    %cst_225 = arith.constant 3.200000e+01 : f32
    %401 = vector.broadcast %cst_225 : f32 to vector<8x1xf32>
    %402 = arith.divf %400, %401 : vector<8x1xf32>
    %403 = arith.mulf %394, %394 : vector<8x32xf32>
    %cst_226 = arith.constant dense<0.000000e+00> : vector<8xf32>
    %404 = vector.multi_reduction <add>, %403, %cst_226 [1] : vector<8x32xf32> to vector<8xf32>
    %405 = vector.shape_cast %404 : vector<8xf32> to vector<8x1xf32>
    %cst_227 = arith.constant 3.200000e+01 : f32
    %406 = vector.broadcast %cst_227 : f32 to vector<8x1xf32>
    %407 = arith.divf %405, %406 : vector<8x1xf32>
    %408 = arith.mulf %402, %402 : vector<8x1xf32>
    %409 = arith.subf %407, %408 : vector<8x1xf32>
    %410 = vector.broadcast %402 : vector<8x1xf32> to vector<8x32xf32>
    %411 = arith.subf %394, %410 : vector<8x32xf32>
    %cst_228 = arith.constant 9.99999974E-6 : f32
    %412 = vector.broadcast %cst_228 : f32 to vector<8x1xf32>
    %413 = arith.addf %409, %412 : vector<8x1xf32>
    %414 = math.rsqrt %413 : vector<8x1xf32>
    %415 = vector.broadcast %414 : vector<8x1xf32> to vector<8x32xf32>
    %416 = arith.mulf %411, %415 : vector<8x32xf32>
    %417 = vector.broadcast %396 : vector<1x32xf32> to vector<8x32xf32>
    %418 = arith.mulf %416, %417 : vector<8x32xf32>
    %419 = vector.broadcast %398 : vector<1x32xf32> to vector<8x32xf32>
    %420 = arith.addf %418, %419 : vector<8x32xf32>
    %421 = arith.truncf %420 : vector<8x32xf32> to vector<8x32xbf16>
    %c0_229 = arith.constant 0 : index
    %c0_230 = arith.constant 0 : index
    %422 = vector.load %arg31[%c0_229, %c0_230] : memref<32x128xbf16, #tpu.memory_space<vmem>>, vector<32x128xbf16>
    %cst_231 = arith.constant dense<0.000000e+00> : vector<8x128xf32>
    %423 = tpu.matmul %421, %422, %cst_231 {dimension_numbers = #tpu.dot_dimension_numbers<[1], [0], [0], [1], [0, 0, 1, 1], [], []>} : vector<8x32xbf16>, vector<32x128xbf16>, vector<8x128xf32> -> vector<8x128xf32>
    %c0_232 = arith.constant 0 : index
    %c0_233 = arith.constant 0 : index
    %424 = vector.load %arg32[%c0_232, %c0_233] : memref<1x128xf32, #tpu.memory_space<vmem>>, vector<1x128xf32>
    %425 = vector.broadcast %424 : vector<1x128xf32> to vector<8x128xf32>
    %426 = arith.addf %423, %425 : vector<8x128xf32>
    %c0_234 = arith.constant 0 : index
    %c0_235 = arith.constant 0 : index
    %427 = vector.load %arg33[%c0_234, %c0_235] : memref<8x128xf32, #tpu.memory_space<vmem>>, vector<8x128xf32>
    tpu.vector_store %arg33[%c0_234, %c0_235], %426 {strides = array<i32>} : memref<8x128xf32, #tpu.memory_space<vmem>>, vector<8x128xf32>,
    return
  }
  func.func @transform_0(%arg0: i32) -> (i32, i32) {
    %c0_i32 = arith.constant 0 : i32
    %c0_i32_0 = arith.constant 0 : i32
    return %arg0, %c0_i32 : i32, i32
  }
  func.func @transform_1(%arg0: i32) -> (i32, i32) {
    %c0_i32 = arith.constant 0 : i32
    %c0_i32_0 = arith.constant 0 : i32
    return %arg0, %c0_i32 : i32, i32
  }
  func.func @transform_2(%arg0: i32) -> (i32, i32) {
    %c0_i32 = arith.constant 0 : i32
    %c0_i32_0 = arith.constant 0 : i32
    %c0_i32_1 = arith.constant 0 : i32
    return %c0_i32, %c0_i32_0 : i32, i32
  }
  func.func @transform_3(%arg0: i32) -> (i32, i32) {
    %c0_i32 = arith.constant 0 : i32
    %c0_i32_0 = arith.constant 0 : i32
    %c0_i32_1 = arith.constant 0 : i32
    return %c0_i32, %c0_i32_0 : i32, i32
  }
  func.func @transform_4(%arg0: i32) -> (i32, i32, i32) {
    %c0_i32 = arith.constant 0 : i32
    %c0_i32_0 = arith.constant 0 : i32
    %c0_i32_1 = arith.constant 0 : i32
    %c0_i32_2 = arith.constant 0 : i32
    return %c0_i32, %c0_i32_0, %c0_i32_1 : i32, i32, i32
  }
  func.func @transform_5(%arg0: i32) -> (i32, i32, i32) {
    %c0_i32 = arith.constant 0 : i32
    %c0_i32_0 = arith.constant 0 : i32
    %c0_i32_1 = arith.constant 0 : i32
    %c0_i32_2 = arith.constant 0 : i32
    return %c0_i32, %c0_i32_0, %c0_i32_1 : i32, i32, i32
  }
  func.func @transform_6(%arg0: i32) -> (i32, i32, i32) {
    %c0_i32 = arith.constant 0 : i32
    %c0_i32_0 = arith.constant 0 : i32
    %c0_i32_1 = arith.constant 0 : i32
    %c0_i32_2 = arith.constant 0 : i32
    return %c0_i32, %c0_i32_0, %c0_i32_1 : i32, i32, i32
  }
  func.func @transform_7(%arg0: i32) -> (i32, i32, i32) {
    %c0_i32 = arith.constant 0 : i32
    %c0_i32_0 = arith.constant 0 : i32
    %c0_i32_1 = arith.constant 0 : i32
    %c0_i32_2 = arith.constant 0 : i32
    return %c0_i32, %c0_i32_0, %c0_i32_1 : i32, i32, i32
  }
  func.func @transform_8(%arg0: i32) -> (i32, i32, i32) {
    %c0_i32 = arith.constant 0 : i32
    %c0_i32_0 = arith.constant 0 : i32
    %c0_i32_1 = arith.constant 0 : i32
    %c0_i32_2 = arith.constant 0 : i32
    return %c0_i32, %c0_i32_0, %c0_i32_1 : i32, i32, i32
  }
  func.func @transform_9(%arg0: i32) -> (i32, i32, i32) {
    %c0_i32 = arith.constant 0 : i32
    %c0_i32_0 = arith.constant 0 : i32
    %c0_i32_1 = arith.constant 0 : i32
    %c0_i32_2 = arith.constant 0 : i32
    return %c0_i32, %c0_i32_0, %c0_i32_1 : i32, i32, i32
  }
  func.func @transform_10(%arg0: i32) -> (i32, i32, i32) {
    %c0_i32 = arith.constant 0 : i32
    %c0_i32_0 = arith.constant 0 : i32
    %c0_i32_1 = arith.constant 0 : i32
    %c0_i32_2 = arith.constant 0 : i32
    return %c0_i32, %c0_i32_0, %c0_i32_1 : i32, i32, i32
  }
  func.func @transform_11(%arg0: i32) -> (i32, i32, i32) {
    %c0_i32 = arith.constant 0 : i32
    %c0_i32_0 = arith.constant 0 : i32
    %c0_i32_1 = arith.constant 0 : i32
    %c0_i32_2 = arith.constant 0 : i32
    return %c0_i32, %c0_i32_0, %c0_i32_1 : i32, i32, i32
  }
  func.func @transform_12(%arg0: i32) -> (i32, i32, i32) {
    %c0_i32 = arith.constant 0 : i32
    %c0_i32_0 = arith.constant 0 : i32
    %c0_i32_1 = arith.constant 0 : i32
    %c0_i32_2 = arith.constant 0 : i32
    return %c0_i32, %c0_i32_0, %c0_i32_1 : i32, i32, i32
  }
  func.func @transform_13(%arg0: i32) -> (i32, i32, i32) {
    %c0_i32 = arith.constant 0 : i32
    %c0_i32_0 = arith.constant 0 : i32
    %c0_i32_1 = arith.constant 0 : i32
    %c0_i32_2 = arith.constant 0 : i32
    return %c0_i32, %c0_i32_0, %c0_i32_1 : i32, i32, i32
  }
  func.func @transform_14(%arg0: i32) -> (i32, i32, i32) {
    %c0_i32 = arith.constant 0 : i32
    %c0_i32_0 = arith.constant 0 : i32
    %c0_i32_1 = arith.constant 0 : i32
    %c0_i32_2 = arith.constant 0 : i32
    return %c0_i32, %c0_i32_0, %c0_i32_1 : i32, i32, i32
  }
  func.func @transform_15(%arg0: i32) -> (i32, i32, i32) {
    %c0_i32 = arith.constant 0 : i32
    %c0_i32_0 = arith.constant 0 : i32
    %c0_i32_1 = arith.constant 0 : i32
    %c0_i32_2 = arith.constant 0 : i32
    return %c0_i32, %c0_i32_0, %c0_i32_1 : i32, i32, i32
  }
  func.func @transform_16(%arg0: i32) -> (i32, i32, i32) {
    %c0_i32 = arith.constant 0 : i32
    %c0_i32_0 = arith.constant 0 : i32
    %c0_i32_1 = arith.constant 0 : i32
    %c0_i32_2 = arith.constant 0 : i32
    return %c0_i32, %c0_i32_0, %c0_i32_1 : i32, i32, i32
  }
  func.func @transform_17(%arg0: i32) -> (i32, i32, i32) {
    %c0_i32 = arith.constant 0 : i32
    %c0_i32_0 = arith.constant 0 : i32
    %c0_i32_1 = arith.constant 0 : i32
    %c0_i32_2 = arith.constant 0 : i32
    return %c0_i32, %c0_i32_0, %c0_i32_1 : i32, i32, i32
  }
  func.func @transform_18(%arg0: i32) -> (i32, i32, i32) {
    %c0_i32 = arith.constant 0 : i32
    %c0_i32_0 = arith.constant 0 : i32
    %c0_i32_1 = arith.constant 0 : i32
    %c0_i32_2 = arith.constant 0 : i32
    return %c0_i32, %c0_i32_0, %c0_i32_1 : i32, i32, i32
  }
  func.func @transform_19(%arg0: i32) -> (i32, i32, i32) {
    %c0_i32 = arith.constant 0 : i32
    %c0_i32_0 = arith.constant 0 : i32
    %c0_i32_1 = arith.constant 0 : i32
    %c0_i32_2 = arith.constant 0 : i32
    return %c0_i32, %c0_i32_0, %c0_i32_1 : i32, i32, i32
  }
  func.func @transform_20(%arg0: i32) -> (i32, i32, i32) {
    %c0_i32 = arith.constant 0 : i32
    %c0_i32_0 = arith.constant 0 : i32
    %c0_i32_1 = arith.constant 0 : i32
    %c0_i32_2 = arith.constant 0 : i32
    return %c0_i32, %c0_i32_0, %c0_i32_1 : i32, i32, i32
  }
  func.func @transform_21(%arg0: i32) -> (i32, i32, i32) {
    %c0_i32 = arith.constant 0 : i32
    %c0_i32_0 = arith.constant 0 : i32
    %c0_i32_1 = arith.constant 0 : i32
    %c0_i32_2 = arith.constant 0 : i32
    return %c0_i32, %c0_i32_0, %c0_i32_1 : i32, i32, i32
  }
  func.func @transform_22(%arg0: i32) -> (i32, i32, i32) {
    %c0_i32 = arith.constant 0 : i32
    %c0_i32_0 = arith.constant 0 : i32
    %c0_i32_1 = arith.constant 0 : i32
    %c0_i32_2 = arith.constant 0 : i32
    return %c0_i32, %c0_i32_0, %c0_i32_1 : i32, i32, i32
  }
  func.func @transform_23(%arg0: i32) -> (i32, i32, i32) {
    %c0_i32 = arith.constant 0 : i32
    %c0_i32_0 = arith.constant 0 : i32
    %c0_i32_1 = arith.constant 0 : i32
    %c0_i32_2 = arith.constant 0 : i32
    return %c0_i32, %c0_i32_0, %c0_i32_1 : i32, i32, i32
  }
  func.func @transform_24(%arg0: i32) -> (i32, i32, i32) {
    %c0_i32 = arith.constant 0 : i32
    %c0_i32_0 = arith.constant 0 : i32
    %c0_i32_1 = arith.constant 0 : i32
    %c0_i32_2 = arith.constant 0 : i32
    return %c0_i32, %c0_i32_0, %c0_i32_1 : i32, i32, i32
  }
  func.func @transform_25(%arg0: i32) -> (i32, i32, i32) {
    %c0_i32 = arith.constant 0 : i32
    %c0_i32_0 = arith.constant 0 : i32
    %c0_i32_1 = arith.constant 0 : i32
    %c0_i32_2 = arith.constant 0 : i32
    return %c0_i32, %c0_i32_0, %c0_i32_1 : i32, i32, i32
  }
  func.func @transform_26(%arg0: i32) -> (i32, i32, i32) {
    %c0_i32 = arith.constant 0 : i32
    %c0_i32_0 = arith.constant 0 : i32
    %c0_i32_1 = arith.constant 0 : i32
    %c0_i32_2 = arith.constant 0 : i32
    return %c0_i32, %c0_i32_0, %c0_i32_1 : i32, i32, i32
  }
  func.func @transform_27(%arg0: i32) -> (i32, i32, i32) {
    %c0_i32 = arith.constant 0 : i32
    %c0_i32_0 = arith.constant 0 : i32
    %c0_i32_1 = arith.constant 0 : i32
    %c0_i32_2 = arith.constant 0 : i32
    return %c0_i32, %c0_i32_0, %c0_i32_1 : i32, i32, i32
  }
  func.func @transform_28(%arg0: i32) -> (i32, i32, i32) {
    %c0_i32 = arith.constant 0 : i32
    %c0_i32_0 = arith.constant 0 : i32
    %c0_i32_1 = arith.constant 0 : i32
    %c0_i32_2 = arith.constant 0 : i32
    return %c0_i32, %c0_i32_0, %c0_i32_1 : i32, i32, i32
  }
  func.func @transform_29(%arg0: i32) -> (i32, i32, i32) {
    %c0_i32 = arith.constant 0 : i32
    %c0_i32_0 = arith.constant 0 : i32
    %c0_i32_1 = arith.constant 0 : i32
    %c0_i32_2 = arith.constant 0 : i32
    return %c0_i32, %c0_i32_0, %c0_i32_1 : i32, i32, i32
  }
  func.func @transform_30(%arg0: i32) -> (i32, i32) {
    %c0_i32 = arith.constant 0 : i32
    %c0_i32_0 = arith.constant 0 : i32
    %c0_i32_1 = arith.constant 0 : i32
    return %c0_i32, %c0_i32_0 : i32, i32
  }
  func.func @transform_31(%arg0: i32) -> (i32, i32) {
    %c0_i32 = arith.constant 0 : i32
    %c0_i32_0 = arith.constant 0 : i32
    %c0_i32_1 = arith.constant 0 : i32
    return %c0_i32, %c0_i32_0 : i32, i32
  }
  func.func @transform_32(%arg0: i32) -> (i32, i32) {
    %c0_i32 = arith.constant 0 : i32
    %c0_i32_0 = arith.constant 0 : i32
    return %arg0, %c0_i32 : i32, i32
  }
}

</mosaic_0001>

<bundles_post_ra>
// kernel: decoder_forward.1
= control target key start
LH: loop header
LB: loop body
LE: loop exit
PB: predicated region body
PF: predicated region fallthrough
CT: control target
= control target key end

     0   :  { %s10257_s6 = smov 1   ;;  %s10258_s10 = smov 2   ;;  %s12080_s0 = inlined_call_operand.smem [shape: u32[33], index: -1, kind: input, shape index: {}] }
   0x1   :  { %s10306_s5 = sld [smem:[%s12080_s0]]   ;;  %s10259_s14 = smov 3  }
   0x2   :  { %s10311_s9 = sld [smem:[%s12080_s0 + %s10257_s6]]   ;;  %s10260_s18 = smov 4  }
   0x3   :  { %s10316_s13 = sld [smem:[%s12080_s0 + %s10258_s10]]   ;;  %s10261_s22 = smov 5  }
   0x4   :  { %s10321_s17 = sld [smem:[%s12080_s0 + %s10259_s14]]   ;;  %s10262_s26 = smov 6  }
   0x5   :  { %s10326_s21 = sld [smem:[%s12080_s0 + %s10260_s18]]   ;;  %s10263_s30 = smov 7  }
   0x6   :  { %s10331_s25 = sld [smem:[%s12080_s0 + %s10261_s22]]   ;;  %s10264_s4 = smov 8  }
   0x7   :  { %12132 = sst [smem:[#allocation5_spill]] %s10306_s5  ;;  %s10265_s10 = smov 9  }
   0x8   :  { %12133 = sst [smem:[#allocation6_spill]] %s10311_s9  ;;  %s10266_s15 = smov 10  }
   0x9   :  { %s10336_s29 = sld [smem:[%s12080_s0 + %s10262_s26]]   ;;  %s10267_s20 = smov 11  }
   0xa   :  { %12134 = sst [smem:[#allocation7_spill]] %s10321_s17  ;;  %s10268_s26 = smov 12  }
   0xb   :  { %s10341_s3 = sld [smem:[%s12080_s0 + %s10263_s30]]   ;;  %s10269_s1 = smov 13  }
   0xc   :  { %s10346_s8 = sld [smem:[%s12080_s0 + %s10264_s4]]   ;;  %s10270_s7 = smov 14  }
   0xd   :  { %s10351_s14 = sld [smem:[%s12080_s0 + %s10265_s10]]   ;;  %s10272_s22 = smov 16  }
   0xe   :  { %s10356_s19 = sld [smem:[%s12080_s0 + %s10266_s15]]   ;;  %s10271_s15 = smov 15  }
   0xf   :  { %s10361_s24 = sld [smem:[%s12080_s0 + %s10267_s20]]   ;;  %s10273_s28 = smov 17  }
  0x10   :  { %s10366_s30 = sld [smem:[%s12080_s0 + %s10268_s26]]  }
  0x11   :  { %12135 = sst [smem:[#allocation8_spill]] %s10341_s3 }
  0x12   :  { %12136 = sst [smem:[#allocation9_spill]] %s10346_s8 }
  0x13   :  { %s10371_s6 = sld [smem:[%s12080_s0 + %s10269_s1]]  }
  0x14   :  { %s10376_s12 = sld [smem:[%s12080_s0 + %s10270_s7]]   ;;  %s10274_s7 = smov 18  }
  0x15   :  { %s10381_s20 = sld [smem:[%s12080_s0 + %s10271_s15]]   ;;  %s10275_s15 = smov 19  }
  0x16   :  { %12137 = sst [smem:[#allocation10_spill]] %s10366_s30 }
  0x17   :  { %s10386_s27 = sld [smem:[%s12080_s0 + %s10272_s22]]   ;;  %s10276_s22 = smov 20  }
  0x18   :  { %s10391_s4 = sld [smem:[%s12080_s0 + %s10273_s28]]   ;;  %s10277_s28 = smov 21  }
  0x19   :  { %12138 = sst [smem:[#allocation11_spill]] %s10371_s6 }
  0x1a   :  { %12139 = sst [smem:[#allocation12_spill]] %s10376_s12 }
  0x1b   :  { %s10396_s17 = sld [smem:[%s12080_s0 + %s10274_s7]]   ;;  %s10278_s7 = smov 22  }
  0x1c   :  { %s10401_s6 = sld [smem:[%s12080_s0 + %s10275_s15]]   ;;  %s10279_s15 = smov 23  }
  0x1d   :  { %s10406_s30 = sld [smem:[%s12080_s0 + %s10276_s22]]   ;;  %s10280_s22 = smov 24  }
  0x1e   :  { %12140 = sst [smem:[#allocation13_spill]] %s10391_s4 }
  0x1f   :  { %s10411_s4 = sld [smem:[%s12080_s0 + %s10277_s28]]   ;;  %s10281_s28 = smov 25  }
  0x21   :  { %12141 = sst [smem:[#allocation14_spill]] %s10396_s17 }
  0x22   :  { %12142 = sst [smem:[#allocation15_spill]] %s10401_s6 }
  0x23   :  { %12143 = sst [smem:[#allocation16_spill]] %s10406_s30 }
  0x24   :  { %s10416_s17 = sld [smem:[%s12080_s0 + %s10278_s7]]   ;;  %s10282_s7 = smov 26  }
  0x25   :  { %12144 = sst [smem:[#allocation17_spill]] %s10411_s4 }
  0x26   :  { %s10421_s6 = sld [smem:[%s12080_s0 + %s10279_s15]]   ;;  %s10283_s15 = smov 27  }
  0x27   :  { %s10426_s30 = sld [smem:[%s12080_s0 + %s10280_s22]]   ;;  %s10284_s22 = smov 28  }
  0x28   :  { %s10431_s4 = sld [smem:[%s12080_s0 + %s10281_s28]]   ;;  %s10285_s28 = smov 29  }
  0x2a   :  { %12145 = sst [smem:[#allocation18_spill]] %s10416_s17 }
  0x2b   :  { %s10436_s17 = sld [smem:[%s12080_s0 + %s10282_s7]]   ;;  %s10286_s7 = smov 30  }
  0x2c   :  { %12146 = sst [smem:[#allocation19_spill]] %s10421_s6 }
  0x2d   :  { %12147 = sst [smem:[#allocation20_spill]] %s10426_s30 }
  0x2e   :  { %12148 = sst [smem:[#allocation21_spill]] %s10431_s4 }
  0x2f   :  { %s10441_s6 = sld [smem:[%s12080_s0 + %s10283_s15]]   ;;  %s10287_s15 = smov 31  }
  0x30   :  { %s10446_s30 = sld [smem:[%s12080_s0 + %s10284_s22]]   ;;  %s10288_s22 = smov 32  }
  0x31   :  { %12149 = sst [smem:[#allocation22_spill]] %s10436_s17 }
  0x32   :  { %s10451_s4 = sld [smem:[%s12080_s0 + %s10285_s28]]  }
  0x33   :  { %s10456_s17 = sld [smem:[%s12080_s0 + %s10286_s7]]  }
  0x35   :  { %12150 = sst [smem:[#allocation23_spill]] %s10441_s6 }
  0x36   :  { %12151 = sst [smem:[#allocation24_spill]] %s10446_s30 }
  0x37   :  { %s10461_s6 = sld [smem:[%s12080_s0 + %s10287_s15]]  }
  0x38   :  { %12152 = sst [smem:[#allocation25_spill]] %s10451_s4 }
  0x39   :  { %12153 = sst [smem:[#allocation26_spill]] %s10456_s17 }
  0x3a   :  { %s10466_s30 = sld [smem:[%s12080_s0 + %s10288_s22]]  }
  0x3d   :  { %12154 = sst [smem:[#allocation27_spill]] %s10461_s6 }
  0x40   :  { %12155 = sst [smem:[#allocation28_spill]] %s10466_s30 }
  0x41   :  { %70 = vsyncpa [#allocation3], 0 }
  0x42   :  { %72 = vsyncpa [#allocation3 + $0x1], 0  ;;  %s10468_s28 = smov 0   ;;  %s10470_s1 = smov 0  }
  0x43   :  { %s10472_s2 = smov 0   ;;  %s10474_s7 = smov 0  }
  0x44 LB: > { %s12156_s12 = sld [smem:[#allocation12_spill]]  ;;  %s10489_s0 = sadd.s32 4294967295, %s10255_s7   ;;  %s10251_s2 = sphi %s10472_s2, %s12220_s2   ;;  %s10247_s1 = sphi %s10470_s1, %s12219_s1   ;;  %s10243_s28 = sphi %s10468_s28, %s12218_s28   ;;  %s10255_s7 = sphi %s10474_s7, %s12217_s7  }
  0x45   : > { %s12157_s8 = sld [smem:[#allocation9_spill]]  ;;  %s9276_s10 = sadd.s32 4294967294, %s10255_s7  }
  0x46   : > { %s12158_s3 = sld [smem:[#allocation8_spill]]  ;;  %s10493_s11 = sadd.s32 1, %s10255_s7  }
  0x47   : > { %12159 = sst [smem:[#allocation29_spill]] %s10243_s28  ;;  %s767_s15 = sadd.s32 1, %s10251_s2 }
  0x48   : > { %12160 = sst [smem:[#allocation30_spill]] %s10247_s1  ;;  %s764_s16 = ssub.s32 %s10255_s7, %s10493_s11 }
  0x49   : > { %12161 = sst [smem:[#allocation31_spill]] %s10251_s2  ;;  %p777_p0 = scmp.ne.s32.totalorder %s10251_s2, %s10247_s1 }
  0x4a   : > { %12162 = sst [smem:[#allocation32_spill]] %s10255_s7  ;;  %p765_p1 = scmp.eq.s32.totalorder %s764_s16, 0 }
  0x4b   : > { %12163 = sst [smem:[#allocation33_spill]] %s10489_s0  ;;  %p778_p2 = scmp.eq.s32.totalorder %s10489_s0, 1 }
  0x4c   : > { %12164 = sst [smem:[#allocation34_spill]] %s10493_s11  ;;  %p783_p3 = scmp.ne.s32.totalorder %s10247_s1, %s10243_s28 }
  0x4d   : > { %p784_p4 = scmp.eq.s32.totalorder %s9276_s10, 1  ;;  %p10506_p5 = por %p778_p2, %p777_p0 }
  0x4e   : > { %s10504_s18 = scalar_select %p765_p1, %s10251_s2, %s767_s15  }
  0x4f   : > { %s12166_s22 = scalar_select %p10506_p5, 1, 0 }
  0x50   : > { %12165 = sst [smem:[#allocation35_spill]] %s10504_s18  ;;  %p10510_p6 = por %p784_p4, %p783_p3 }
  0x51   : > { %12167 = sst [smem:[#allocation36_spill]] %s12166_s22  ;;  %p9279_p7 = scmp.ge.s32.totalorder %s10255_s7, 1 }
  0x52   : > { %s12168_s23 = scalar_select %p10510_p6, 1, 0 }
  0x53   : > { %p908_p8 = scmp.lt.s32.totalorder %s10255_s7, 3 }
  0x54   : > { %12169 = sst [smem:[#allocation37_spill]] %s12168_s23 }
  0x55   : > { %p909_p9 = pnand %p9279_p7, %p908_p8 }
  0x56   : > { %s12170_s5 = sld [smem:[#allocation5_spill]] (!%p909_p9)  ;;  %p994_p10 = scmp.lt.s32.totalorder (!%p909_p9), %s10489_s0, 1 }
  0x57   : > { %912 = sbr.rel (%p909_p9) target bundleno = 9543 (0x2547), region = 148  ;;  %s12100_s16 = smov (!%p909_p9), 112  }
  0x58   : > { %s12171_s9 = sld [smem:[#allocation6_spill]] (!%p909_p9)  ;;  %s12174_s18 = smov (!%p909_p9), 104  }
  0x59   : > { %s12179_s2 = sld [smem:[#allocation11_spill]] (!%p909_p9)  ;;  %s12185_s28 = smov (!%p909_p9), 24  }
  0x5a   : > { %s12186_s7 = smov (!%p909_p9), 16   ;;  %s12187_s6 = sld [smem:[#allocation15_spill]] (!%p909_p9) }
  0x5b   : > { %s12188_s30 = smov (!%p909_p9), 8   ;;  %s12192_s1 = sld [smem:[#allocation18_spill]] (!%p909_p9) }
  0x5c   : > { %v9586_v0 = vld [vmem:[%s10326_s21 + $0x8] sm:$0xff]  ;;  %v9585_v2 = vld [vmem:[%s10326_s21] sm:$0xff]  ;;  %s995_s26 = scalar_select %p994_p10, %s10489_s0, 1  ;;  %vm1047_vm0 = vcmask 261120   ;;  %v10292_v16 = vmov 1983009808  }
  0x5d   : > { %v9588_v1 = vld [vmem:[%s10336_s29 + $0x8] sm:$0xff]  ;;  %1057 = vmatpush.bf16.msra.mxu0 %v9586_v0  ;;  %v9587_v3 = vld [vmem:[%s10336_s29] sm:$0xff]  ;;  %v1136_v17 = vunpack.c.l.s4 %v10292_v16  ;;  %vm1131_vm1 = vcmask 1047556   ;;  %v10293_v26 = vmov 1934713408   ;;  %vm1796_vm2 = vcmask 1043456  }
  0x5e   : > { %1085 = vmatpush.bf16.msra.mxu1 %v9588_v1  ;;  %s9281_s10 = sshll.u32 %s995_s26, 3  ;;  %v10079_v6 = vld [vmem:[%s10331_s25] ss:$0 sm:$0xff]  ;;  %s12098_s26 = smov 120   ;;  %v9590_v24 = vld [vmem:[%s12157_s8 + $0x8] sm:$0xff]  ;;  %v1160_v27 = vunpack.c.l.s4 %v10293_v26  ;;  %vm1792_vm3 = vcmask 64512  }
  0x5f   : > { %s10523_s15 = scalar_lea.vmem %s12170_s5, %s9281_s10  ;;  %v10080_v7 = vld [vmem:[%s12158_s3] ss:$0 sm:$0xff]  ;;  %s12096_s10 = smov 104   ;;  %v10544_v23 = vunpack.c.0.s8 %v1136_v17  ;;  %1113 = vmatpush.bf16.msra.mxu2 %v9590_v24  ;;  %vm2641_vm4 = vcmask 130048   ;;  %vm2643_vm5 = vcmask 195584   ;;  %vm5009_vm13 = vcmask 523264  }
  0x60   : > { %v1005_v4 = vld [vmem:[%s10523_s15] sm:$0xff]  ;;  %v10552_v35 = vunpack.c.0.s8 %v1160_v27  ;;  %s12102_s5 = smov 8   ;;  %s12180_s11 = smov %s12179_s2 }
  0x61   : > { %1058 = vmatpush.bf16.msra.mxu0 %v9585_v2  ;;  %v1011_v5 = vpack.c.bf16 %v1005_v4, %v1005_v4  ;;  %v9589_v29 = vld [vmem:[%s12157_s8] sm:$0xff]  ;;  %s12196_s4 = sld [smem:[#allocation25_spill]] }
  0x62   : > { %1086 = vmatpush.bf16.msra.mxu1 %v9587_v3 }
  0x63   : > { %1114 = vmatpush.bf16.msra.mxu2 %v9589_v29 }
  0x64   : > { %9292 = vmatmul.msk.bf16.vlgmr.msra.gmra.mxu0 %vm1047_vm0, %v1011_v5 }
  0x65   : > { %9301 = vmatmul.msk.bf16.vlgmr.msra.gmra.mxu1 %vm1047_vm0, %v1011_v5 }
  0x66   : > { %9310 = vmatmul.msk.bf16.vlgmr.msra.gmra.mxu2 %vm1047_vm0, %v1011_v5 }
  0xe1   : > { %v1060_v8 = vpop.f32.mrf.mxu0 }
  0xe2   : > { %v1088_v9 = vpop.f32.mrf.mxu1  ;;  %v10530_v10 = vadd.f32 %v10079_v6, %v1060_v8 }
  0xe3   : > { %v1089_v11 = vadd.f32 %v10080_v7, %v1088_v9 }
  0xe4   : > { %1124 = vrot.lane.b32.xlu2 %v10530_v10, %s12100_s16 }
  0xe5   : > { %1199 = vrot.lane.b32.xlu1 %v1089_v11, %s12100_s16  ;;  %v9713_v12 = vpack.i.bf16 %v10530_v10, %v1089_v11  ;;  %v1207_v20 = vrot.slane %v1089_v11, 4 }
  0xe7   : > { %9714 = vrot.lane.b32.xlu0 %v9713_v12, %s12098_s26 }
  0xe9   : > { %v1062_v13 = vpop.f32.mrf.mxu0 }
  0xea   : > { %v1090_v14 = vpop.f32.mrf.mxu1 }
  0xef   : > { %1202 = vrot.lane.b32.xlu0 %v1089_v11, %s12096_s10 }
  0xf7   : > { %1127 = vrot.lane.b32.xlu0 %v10530_v10, %s12096_s10 }
 0x13e   : > { %v10570_v3 = vpop.permute.xlu2 %1124 }
 0x157   : > { %v1200_v15 = vpop.permute.xlu1 %1199 }
 0x158   : > { %v1205_v19 = vrot.slane %v1200_v15, 4  ;;  %v1208_v21 = vsel %vm1131_vm1, %v1200_v15, %v1207_v20 }
 0x159   : > { %v10540_v18 = vpop.permute.xlu0 %9714  ;;  %v1216_v28 = vperm.slane %v1208_v21, %v10544_v23 }
 0x15a   : > { %v9716_v22 = vunpack.i.l.bf16 %v10540_v18  ;;  %v1206_v25 = vsel %vm1131_vm1, %v1205_v19, %v1089_v11 }
 0x15b   : > { %v1212_v31 = vperm.slane %v1206_v25, %v10544_v23  ;;  %v1243_v36 = vrot.slane %v1216_v28, 4 }
 0x15c   : > { %v1219_v30 = vrot.slane %v9716_v22, 4 }
 0x15d   : > { %v1231_v39 = vrot.slane %v1212_v31, 4 }
 0x161   : > { %v1203_v32 = vpop.permute.xlu0 %1202 }
 0x162   : > { %v1217_v33 = vrot.slane %v1203_v32, 4  ;;  %v1220_v34 = vsel %vm1131_vm1, %v1203_v32, %v1219_v30 }
 0x163   : > { %v1228_v37 = vperm.slane %v1220_v34, %v10544_v23 }
 0x164   : > { %v1218_v38 = vsel %vm1131_vm1, %v1217_v33, %v9716_v22 }
 0x165   : > { %v1224_v40 = vperm.slane %v1218_v38, %v10544_v23  ;;  %v1241_v41 = vrot.slane %v1228_v37, 4  ;;  %v1244_v42 = vsel %vm1131_vm1, %v1228_v37, %v1243_v36 }
 0x166   : > { %v1252_v43 = vperm.slane %v1244_v42, %v10552_v35 }
 0x167   : > { %v1242_v44 = vsel %vm1131_vm1, %v1241_v41, %v1216_v28  ;;  %v1232_v45 = vsel %vm1131_vm1, %v1224_v40, %v1231_v39  ;;  %v1229_v49 = vrot.slane %v1224_v40, 4 }
 0x168   : > { %v1259_v46 = vrot.slane %v1252_v43, 4  ;;  %v1248_v47 = vperm.slane %v1242_v44, %v10552_v35  ;;  %v1240_v48 = vperm.slane %v1232_v45, %v10552_v35  ;;  %v1267_v52 = vpack.c.bf16 %v1252_v43, %v1252_v43 }
 0x169   : > { %v1230_v58 = vsel %vm1131_vm1, %v1229_v49, %v1212_v31  ;;  %v10572_v5 = vpop.permute.xlu0 %1127  ;;  %v10081_v49 = vld [vmem:[%s10351_s14] ss:$0 sm:$0xff] }
 0x16a   : > { %v1260_v50 = vsel %vm1131_vm1, 0.0, %v1259_v46  ;;  %v1257_v51 = vrot.slane %v1248_v47, 4  ;;  %v1255_v54 = vrot.slane %v1240_v48, 4  ;;  %v1265_v56 = vpack.c.bf16 %v1248_v47, %v1248_v47 }
 0x16b   : > { %v1268_v53 = vpack.c.bf16 %v1260_v50, %v1260_v50  ;;  %v1263_v60 = vpack.c.bf16 %v1240_v48, %v1240_v48  ;;  %v1236_v62 = vperm.slane %v1230_v58, %v10552_v35  ;;  %v1116_v50 = vpop.f32.mrf.mxu2 }
 0x16c   : > { %v1258_v55 = vsel %vm1131_vm1, 0.0, %v1257_v51  ;;  %v1256_v59 = vsel %vm1131_vm1, 0.0, %v1255_v54  ;;  %v10591_v51 = vadd.f32 %v10081_v49, %v1116_v50 }
 0x16d   : > { %9718 = vxpose.binary.xlu2.c.b16.start.end [1/2] (short) (narrow) %v1268_v53, %v1267_v52, 16  ;;  %v1266_v57 = vpack.c.bf16 %v1258_v55, %v1258_v55  ;;  %v1264_v61 = vpack.c.bf16 %v1256_v59, %v1256_v59  ;;  %v1253_v63 = vrot.slane %v1236_v62, 4  ;;  %v1261_v1 = vpack.c.bf16 %v1236_v62, %v1236_v62 }
 0x16f   : > { %9721 = vxpose.binary.xlu1.c.b16.start.end [1/2] (short) (narrow) %v1266_v57, %v1265_v56, 16  ;;  %v1254_v0 = vsel %vm1131_vm1, 0.0, %v1253_v63 }
 0x170   : > { %9727 = vxpose.binary.xlu0.c.b16.start.end [1/2] (short) (narrow) %v1264_v61, %v1263_v60, 16  ;;  %v1262_v2 = vpack.c.bf16 %v1254_v0, %v1254_v0 }
 0x173   : > { %v1118_v55 = vpop.f32.mrf.mxu2 }
 0x17d   : > { %9724 = vxpose.binary.xlu2.c.b16.start.end [1/2] (short) (narrow) %v1262_v2, %v1261_v1, 16 }
 0x1e6   : > { %1276 = vrot.lane.b32.xlu2 %v10591_v51, %s12096_s10  ;;  %s9282_s10 = sshll.u32 %s10489_s0, 1  ;;  %s12189_s0 = sld [smem:[#allocation22_spill]] }
 0x1e7   : > { %p999_p11 = scmp.lt.s32.totalorder %s9282_s10, 3 }
 0x1e9   : > { %s12222_s10 = smov (!%p999_p11, %s9282_s10), 3 }
 0x1ee   : > { %1273 = vrot.lane.b32.xlu2 %v10591_v51, %s12100_s16 }
 0x20e   : > { %v9719_v4 = vpop.trf.xlu2 }
 0x20f   : > { %v1530_v8 = vrot.slane %v9719_v4, 4 }
 0x216   : > { %v9720_v6 = vpop.trf.xlu2 }
 0x217   : > { %v1558_v20 = vrot.slane %v9720_v6, 4 }
 0x21b   : > { %v9722_v7 = vpop.trf.xlu1 }
 0x21c   : > { %v1524_v9 = vrot.slane %v9722_v7, 4  ;;  %v9728_v11 = vpop.trf.xlu0 }
 0x21d   : > { %v1531_v12 = vsel %vm1131_vm1, %v1530_v8, %v9728_v11  ;;  %v1133_v11 = vrot.slane %v10530_v10, 4 }
 0x21e   : > { %v9725_v13 = vpop.trf.xlu2  ;;  %v1535_v14 = vperm.slane %v1531_v12, %v10544_v23  ;;  %v1130_v12 = vrot.slane %v10570_v3, 4 }
 0x21f   : > { %v1525_v15 = vsel %vm1131_vm1, %v1524_v9, %v9725_v13  ;;  %v9717_v9 = vunpack.i.h.bf16 %v10540_v18  ;;  %v1134_v13 = vsel %vm1131_vm1, %v10570_v3, %v1133_v11 }
 0x220   : > { %v1536_v16 = vrot.slane %v1535_v14, 4  ;;  %v1529_v17 = vperm.slane %v1525_v15, %v10544_v23 }
 0x222   : > { %v1537_v26 = vsel %vm1131_vm1, %v1536_v16, %v1529_v17  ;;  %v1538_v40 = vrot.slane %v1529_v17, 4  ;;  %v1143_v16 = vrot.slane %v10572_v5, 4 }
 0x223   : > { %v9723_v19 = vpop.trf.xlu1  ;;  %v1543_v31 = vperm.slane %v1537_v26, %v10552_v35 }
 0x224   : > { %v1552_v21 = vrot.slane %v9723_v19, 4  ;;  %v9729_v22 = vpop.trf.xlu0  ;;  %v1539_v42 = vsel %vm1131_vm1, %v1535_v14, %v1538_v40  ;;  %v1145_v14 = vrot.slane %v9717_v9, 4  ;;  %v1142_v19 = vperm.slane %v1134_v13, %v10544_v23 }
 0x225   : > { %v1559_v24 = vsel %vm1131_vm1, %v1558_v20, %v9729_v22  ;;  %v1584_v34 = vshrl.u32 %v1543_v31, 16  ;;  %v1547_v44 = vperm.slane %v1539_v42, %v10552_v35  ;;  %v1548_v53 = vrot.slane %v1543_v31, 4 }
 0x226   : > { %v9726_v25 = vpop.trf.xlu2  ;;  %v1563_v27 = vperm.slane %v1559_v24, %v10544_v23  ;;  %v1146_v17 = vsel %vm1131_vm1, %v10572_v5, %v1145_v14  ;;  %v1132_v20 = vsel %vm1131_vm1, %v1130_v12, %v10530_v10  ;;  %v1169_v24 = vrot.slane %v1142_v19, 4 }
 0x227   : > { %v1553_v28 = vsel %vm1131_vm1, %v1552_v21, %v9726_v25  ;;  %v1600_v46 = vshrl.u32 %v1547_v44, 16  ;;  %v1549_v56 = vsel %vm1131_vm1, 0, %v1548_v53  ;;  %v1550_v62 = vrot.slane %v1547_v44, 4 }
 0x228   : > { %v1557_v29 = vperm.slane %v1553_v28, %v10544_v23  ;;  %v1564_v30 = vrot.slane %v1563_v27, 4  ;;  %v1592_v58 = vshrl.u32 %v1549_v56, 16  ;;  %v1154_v18 = vperm.slane %v1146_v17, %v10544_v23 }
 0x229   : > { %v1551_v0 = vsel %vm1131_vm1, 0, %v1550_v62  ;;  %v1144_v21 = vsel %vm1131_vm1, %v1143_v16, %v9717_v9  ;;  %v1138_v22 = vperm.slane %v1132_v20, %v10544_v23 }
 0x22a   : > { %v1565_v32 = vsel %vm1131_vm1, %v1564_v30, %v1557_v29  ;;  %v1566_v39 = vrot.slane %v1557_v29, 4  ;;  %v1608_v2 = vshrl.u32 %v1551_v0, 16  ;;  %v1150_v25 = vperm.slane %v1144_v21, %v10544_v23 }
 0x22b   : > { %v1571_v33 = vperm.slane %v1565_v32, %v10552_v35  ;;  %v1167_v26 = vrot.slane %v1154_v18, 4  ;;  %v1157_v28 = vrot.slane %v1138_v22, 4 }
 0x22c   : > { %v1567_v41 = vsel %vm1131_vm1, %v1563_v27, %v1566_v39  ;;  %v1170_v27 = vsel %vm1131_vm1, %v1154_v18, %v1169_v24  ;;  %v1155_v29 = vrot.slane %v1150_v25, 4 }
 0x22d   : > { %v1585_v36 = vshrl.u32 %v1571_v33, 16  ;;  %v1582_v37 = vpack.i.b16 %v1571_v33, %v1543_v31  ;;  %v1575_v43 = vperm.slane %v1567_v41, %v10552_v35  ;;  %v1576_v52 = vrot.slane %v1571_v33, 4 }
 0x22e   : > { %v1178_v5 = vperm.slane %v1170_v27, %v10552_v35  ;;  %v1158_v30 = vsel %vm1131_vm1, %v1150_v25, %v1157_v28  ;;  %v1168_v10 = vsel %vm1131_vm1, %v1167_v26, %v1142_v19 }
 0x22f   : > { %v1586_v38 = vpack.i.b16 %v1585_v36, %v1584_v34  ;;  %v1601_v45 = vshrl.u32 %v1575_v43, 16  ;;  %v1598_v47 = vpack.i.b16 %v1575_v43, %v1547_v44  ;;  %v1577_v54 = vsel %vm1131_vm1, 0, %v1576_v52 }
 0x230   : > { %v1593_v57 = vshrl.u32 %v1577_v54, 16  ;;  %v1590_v59 = vpack.i.b16 %v1577_v54, %v1549_v56  ;;  %v1578_v61 = vrot.slane %v1575_v43, 4  ;;  %v1166_v31 = vperm.slane %v1158_v30, %v10552_v35 }
 0x231   : > { %9730 = vxpose.binary.xlu1.c.b16.start.end [1/2] (short) (narrow) %v1586_v38, %v1582_v37, 16  ;;  %v1602_v48 = vpack.i.b16 %v1601_v45, %v1600_v46  ;;  %v1174_v32 = vperm.slane %v1168_v10, %v10552_v35  ;;  %v1185_v33 = vrot.slane %v1178_v5, 4  ;;  %v1156_v36 = vsel %vm1131_vm1, %v1155_v29, %v1138_v22 }
 0x232   : > { %v1594_v60 = vpack.i.b16 %v1593_v57, %v1592_v58  ;;  %v1579_v63 = vsel %vm1131_vm1, 0, %v1578_v61  ;;  %v1162_v37 = vperm.slane %v1156_v36, %v10552_v35  ;;  %v1181_v38 = vrot.slane %v1166_v31, 4 }
 0x233   : > { %v1609_v1 = vshrl.u32 %v1579_v63, 16  ;;  %v1606_v4 = vpack.i.b16 %v1579_v63, %v1551_v0  ;;  %v1183_v39 = vrot.slane %v1174_v32, 4  ;;  %v1186_v40 = vsel %vm1131_vm1, 0.0, %v1185_v33 }
 0x234   : > { %v1194_v41 = vpack.c.bf16 %v1186_v40, %v1186_v40  ;;  %v1179_v42 = vrot.slane %v1162_v37, 4  ;;  %v1182_v43 = vsel %vm1131_vm1, 0.0, %v1181_v38  ;;  %v1193_v45 = vpack.c.bf16 %v1178_v5, %v1178_v5 }
 0x235   : > { %v1610_v6 = vpack.i.b16 %v1609_v1, %v1608_v2  ;;  %v1184_v44 = vsel %vm1131_vm1, 0.0, %v1183_v39  ;;  %v1189_v50 = vpack.c.bf16 %v1166_v31, %v1166_v31  ;;  %v1191_v52 = vpack.c.bf16 %v1174_v32, %v1174_v32 }
 0x236   : > { %v1370_v49 = vrot.slane %v1194_v41, 4  ;;  %v1350_v53 = vrot.slane %v1193_v45, 4  ;;  %v1180_v54 = vsel %vm1131_vm1, 0.0, %v1179_v42 }
 0x237   : > { %v1188_v57 = vpack.c.bf16 %v1180_v54, %v1180_v54  ;;  %v1281_v54 = vrot.slane %v10591_v51, 4 }
 0x238   : > { %v1351_v62 = vsel %vm1131_vm1, %v1350_v53, %v1189_v50 }
 0x240   : > { %v1277_v10 = vpop.permute.xlu2 %1276 }
 0x241   : > { %9733 = vxpose.binary.xlu1.c.b16.start.end [1/2] (short) (narrow) %v1602_v48, %v1598_v47, 16  ;;  %v1190_v47 = vpack.c.bf16 %v1182_v43, %v1182_v43  ;;  %v1192_v48 = vpack.c.bf16 %v1184_v44, %v1184_v44 }
 0x243   : > { %v1364_v55 = vrot.slane %v1192_v48, 4  ;;  %v1371_v58 = vsel %vm1131_vm1, %v1370_v49, %v1190_v47 }
 0x244   : > { %v1375_v0 = vperm.slane %v1371_v58, %v10544_v23 }
 0x251   : > { %9736 = vxpose.binary.xlu1.c.b16.start.end [1/2] (short) (narrow) %v1594_v60, %v1590_v59, 16  ;;  %v1187_v59 = vpack.c.bf16 %v1162_v37, %v1162_v37  ;;  %v1343_v60 = vrot.slane %v1191_v52, 4 }
 0x253   : > { %v1345_v11 = vsel %vm1131_vm1, %v1343_v60, %v1187_v59 }
 0x254   : > { %v1349_v17 = vperm.slane %v1345_v11, %v10544_v23 }
 0x261   : > { %9739 = vxpose.binary.xlu1.c.b16.start.end [1/2] (short) (narrow) %v1610_v6, %v1606_v4, 16  ;;  %v1355_v4 = vperm.slane %v1351_v62, %v10544_v23  ;;  %v1365_v6 = vsel %vm1131_vm1, %v1364_v55, %v1188_v57  ;;  %v1274_v55 = vpop.permute.xlu2 %1273  ;;  %v1291_v62 = vrot.slane %v1277_v10, 4 }
 0x262   : > { %v1369_v14 = vperm.slane %v1365_v6, %v10544_v23  ;;  %v1279_v60 = vrot.slane %v1274_v55, 4 }
 0x2bb   : > { %1270 = vrot.lane.b32.xlu1 %v10591_v51, %s12098_s26  ;;  %s9283_s26 = sshll.u32 %s12222_s10, 3  ;;  %s12104_s10 = smov 16  }
 0x2bc   : > { %s1002_s16 = scalar_lea.vmem %s12171_s9, %s9283_s26  ;;  %s12106_s26 = smov 24  }
 0x2bd   : > { %s12173_s9 = smov 120  }
 0x2dd   : > { %v9731_v7 = vpop.trf.xlu1 }
 0x2e5   : > { %v10603_v8 = vpop.trf.xlu1 }
 0x2ed   : > { %v9734_v15 = vpop.trf.xlu1 }
 0x2ee   : > { %v1740_v56 = vrot.slane %v9734_v15, 4  ;;  %v1376_v15 = vrot.slane %v1375_v0, 4 }
 0x2f0   : > { %v1741_v1 = vsel %vm1131_vm1, %v1740_v56, %v9731_v7  ;;  %v1356_v7 = vrot.slane %v1355_v4, 4  ;;  %v1377_v21 = vsel %vm1131_vm1, %v1376_v15, %v1369_v14 }
 0x2f1   : > { %v1745_v12 = vperm.slane %v1741_v1, %v10544_v23  ;;  %v10653_v27 = vperm.slane %v1377_v21, %v10552_v35  ;;  %v1280_v1 = vsel %vm1131_vm1, %v1279_v60, %v10591_v51 }
 0x2f2   : > { %v1357_v26 = vsel %vm1131_vm1, %v1356_v7, %v1349_v17 }
 0x2f3   : > { %v1361_v29 = vperm.slane %v1357_v26, %v10552_v35  ;;  %v1382_v32 = vrot.slane %v10653_v27, 4  ;;  %v1388_v11 = vshrl.u32 %v10653_v27, 16 }
 0x2f5   : > { %v9735_v3 = vpop.trf.xlu1  ;;  %v1383_v43 = vsel %vm1131_vm1, 0, %v1382_v32  ;;  %v1386_v48 = vpack.i.b16 %v10653_v27, %v1361_v29  ;;  %v1009_v32 = vld [vmem:[%s10316_s13] sm:$0xff] }
 0x2f6   : > { %v1760_v16 = vrot.slane %v9735_v3, 4  ;;  %v1394_v53 = vshrl.u32 %v1383_v43, 16 }
 0x2f8   : > { %v1761_v22 = vsel %vm1131_vm1, %v1760_v16, %v10603_v8  ;;  %v1387_v16 = vshrl.u32 %v1361_v29, 16 }
 0x2f9   : > { %v1765_v28 = vperm.slane %v1761_v22, %v10544_v23 }
 0x2fd   : > { %v9737_v34 = vpop.trf.xlu1 }
 0x305   : > { %v9738_v46 = vpop.trf.xlu1 }
 0x30d   : > { %v9740_v61 = vpop.trf.xlu1 }
 0x30e   : > { %v1746_v63 = vrot.slane %v9740_v61, 4  ;;  %v1282_v61 = vsel %vm1131_vm1, %v1274_v55, %v1281_v54 }
 0x310   : > { %v1747_v2 = vsel %vm1131_vm1, %v1746_v63, %v9737_v34  ;;  %v1362_v34 = vrot.slane %v1361_v29, 4  ;;  %v1290_v63 = vperm.slane %v1282_v61, %v10544_v23 }
 0x311   : > { %v1751_v9 = vperm.slane %v1747_v2, %v10544_v23 }
 0x312   : > { %v1363_v49 = vsel %vm1131_vm1, 0, %v1362_v34 }
 0x313   : > { %v1752_v13 = vrot.slane %v1751_v9, 4  ;;  %v1392_v57 = vpack.i.b16 %v1383_v43, %v1363_v49  ;;  %v1393_v58 = vshrl.u32 %v1363_v49, 16 }
 0x315   : > { %v9741_v19 = vpop.trf.xlu1  ;;  %v1753_v20 = vsel %vm1131_vm1, %v1752_v13, %v1745_v12  ;;  %v1395_v59 = vpack.i.b16 %v1394_v53, %v1393_v58  ;;  %v1286_v12 = vperm.slane %v1280_v1, %v10544_v23  ;;  %v1317_v13 = vrot.slane %v1290_v63, 4 }
 0x316   : > { %v1766_v18 = vrot.slane %v9741_v19, 4  ;;  %v1757_v25 = vperm.slane %v1753_v20, %v10552_v35  ;;  %v1389_v19 = vpack.i.b16 %v1388_v11, %v1387_v16 }
 0x318   : > { %v1767_v24 = vsel %vm1131_vm1, %v1766_v18, %v9738_v46  ;;  %v1758_v30 = vrot.slane %v1757_v25, 4  ;;  %v1783_v33 = vshrl.u32 %v1757_v25, 16 }
 0x319   : > { %v1771_v3 = vperm.slane %v1767_v24, %v10544_v23 }
 0x31a   : > { %v1759_v38 = vsel %vm1131_vm1, 0, %v1758_v30 }
 0x31b   : > { %v1772_v5 = vrot.slane %v1771_v3, 4  ;;  %v1789_v45 = vshrl.u32 %v1759_v38, 16 }
 0x31d   : > { %v1773_v8 = vsel %vm1131_vm1, %v1772_v5, %v1765_v28 }
 0x31e   : > { %v1777_v31 = vperm.slane %v1773_v8, %v10552_v35 }
 0x320   : > { %v1782_v36 = vpack.i.b16 %v1777_v31, %v1757_v25  ;;  %v1784_v37 = vshrl.u32 %v1777_v31, 16  ;;  %v1778_v39 = vrot.slane %v1777_v31, 4 }
 0x322   : > { %v1798_v40 = vsel %vm1796_vm2, %v1782_v36, 0  ;;  %v1785_v41 = vpack.i.b16 %v1784_v37, %v1783_v33  ;;  %v1779_v42 = vsel %vm1131_vm1, 0, %v1778_v39 }
 0x323   : > { %1807 = vmatpush.bf16.msra.mxu3 %v1798_v40  ;;  %v1788_v44 = vpack.i.b16 %v1779_v42, %v1759_v38  ;;  %v1790_v46 = vshrl.u32 %v1779_v42, 16 }
 0x324   : > { %v1817_v47 = vsel %vm1796_vm2, %v1785_v41, 0 }
 0x325   : > { %v1836_v50 = vsel %vm1796_vm2, %v1788_v44, 0  ;;  %v1791_v52 = vpack.i.b16 %v1790_v46, %v1789_v45 }
 0x326   : > { %9311 = vmatmul.msk.bf16.vlgmr.msra.gmra.mxu3 %vm1792_vm3, %v1386_v48  ;;  %1845 = vmatpush.bf16.msrb.mxu0 %v1836_v50  ;;  %v1305_v50 = vrot.slane %v1286_v12, 4 }
 0x327   : > { %1826 = vmatpush.bf16.msrb.mxu3 %v1817_v47  ;;  %v1855_v56 = vsel %vm1796_vm2, %v1791_v52, 0 }
 0x328   : > { %1864 = vmatpush.bf16.msrb.mxu1 %v1855_v56 }
 0x329   : > { %9313 = vmatmul.msk.bf16.vlgmr.msrb.gmra.mxu0 %vm1792_vm3, %v1392_v57 }
 0x32b   : > { %9314 = vmatmul.msk.bf16.vlgmr.msrb.gmra.mxu1 %vm1792_vm3, %v1395_v59 }
 0x32d   : > { %v1271_v0 = vpop.permute.xlu1 %1270 }
 0x32e   : > { %v1292_v2 = vsel %vm1131_vm1, %v1291_v62, %v1271_v0  ;;  %v1293_v4 = vrot.slane %v1271_v0, 4 }
 0x32f   : > { %v1298_v6 = vperm.slane %v1292_v2, %v10544_v23 }
 0x330   : > { %v1294_v9 = vsel %vm1131_vm1, %v1277_v10, %v1293_v4 }
 0x331   : > { %v1302_v14 = vperm.slane %v1294_v9, %v10544_v23  ;;  %v1303_v15 = vrot.slane %v1298_v6, 4  ;;  %v1306_v52 = vsel %vm1131_vm1, %v1298_v6, %v1305_v50 }
 0x332   : > { %v1314_v53 = vperm.slane %v1306_v52, %v10552_v35 }
 0x333   : > { %v1315_v17 = vrot.slane %v1302_v14, 4  ;;  %v1318_v7 = vsel %vm1131_vm1, %v1302_v14, %v1317_v13  ;;  %v1304_v51 = vsel %vm1131_vm1, %v1303_v15, %v1286_v12 }
 0x334   : > { %v1326_v20 = vperm.slane %v1318_v7, %v10552_v35  ;;  %v1310_v18 = vperm.slane %v1304_v51, %v10552_v35  ;;  %v1329_v54 = vrot.slane %v1314_v53, 4  ;;  %v1337_v56 = vpack.c.bf16 %v1314_v53, %v1314_v53 }
 0x335   : > { %v1316_v21 = vsel %vm1131_vm1, %v1315_v17, %v1290_v63 }
 0x336   : > { %9312 = vmatmul.msk.bf16.vlgmr.msrb.gmra.mxu3 %vm1792_vm3, %v1389_v19  ;;  %v1333_v22 = vrot.slane %v1326_v20, 4  ;;  %v1327_v24 = vrot.slane %v1310_v18, 4  ;;  %v1322_v25 = vperm.slane %v1316_v21, %v10552_v35  ;;  %v1341_v27 = vpack.c.bf16 %v1326_v20, %v1326_v20 }
 0x337   : > { %v1335_v30 = vpack.c.bf16 %v1310_v18, %v1310_v18  ;;  %v1330_v55 = vsel %vm1131_vm1, 0.0, %v1329_v54 }
 0x338   : > { %v1334_v26 = vsel %vm1131_vm1, 0.0, %v1333_v22  ;;  %v1328_v3 = vsel %vm1131_vm1, 0.0, %v1327_v24  ;;  %v1331_v29 = vrot.slane %v1322_v25, 4  ;;  %v1339_v8 = vpack.c.bf16 %v1322_v25, %v1322_v25 }
 0x339   : > { %v1342_v28 = vpack.c.bf16 %v1334_v26, %v1334_v26  ;;  %v1336_v5 = vpack.c.bf16 %v1328_v3, %v1328_v3  ;;  %v1338_v57 = vpack.c.bf16 %v1330_v55, %v1330_v55 }
 0x33a   : > { %v1332_v10 = vsel %vm1131_vm1, 0.0, %v1331_v29 }
 0x33b   : > { %9748 = vxpose.binary.xlu1.c.b16.start.end [1/2] (short) (narrow) %v1342_v28, %v1341_v27, 16  ;;  %v1340_v31 = vpack.c.bf16 %v1332_v10, %v1332_v10 }
 0x33c   : > { %9745 = vxpose.binary.xlu2.c.b16.start.end [1/2] (short) (narrow) %v1336_v5, %v1335_v30, 16 }
 0x33d   : > { %9742 = vxpose.binary.xlu0.c.b16.start.end [1/2] (short) (narrow) %v1340_v31, %v1339_v8, 16 }
 0x3a6   : > { %v1847_v33 = vpop.f32.mrf.mxu0 }
 0x3a7   : > { %v1848_v34 = vadd.f32 %v1847_v33, %v1009_v32 }
 0x3a8   : > { %v1866_v36 = vpop.f32.mrf.mxu1 }
 0x3a9   : > { %v1809_v37 = vpop.f32.mrf.mxu3  ;;  %v1876_v38 = vsel %vm1792_vm3, %v1848_v34, -inf  ;;  %v10695_v40 = vadd.f32 %v1866_v36, %v1009_v32 }
 0x3aa   : > { %v10699_v44 = vadd.f32 %v1809_v37, %v1009_v32 }
 0x3ab   : > { %v1879_v43 = vsel %vm1792_vm3, %v10695_v40, -inf }
 0x3ac   : > { %v1870_v47 = vsel %vm1792_vm3, %v10699_v44, -inf }
 0x3ad   : > { %1877 = vmax.xlane.f32.xlu2 %v1876_v38 }
 0x3ae   : > { %v1849_v39 = vpop.f32.mrf.mxu0 }
 0x3b0   : > { %v1868_v41 = vpop.f32.mrf.mxu1 }
 0x3b1   : > { %v1811_v42 = vpop.f32.mrf.mxu3 }
 0x3b5   : > { %1880 = vmax.xlane.f32.xlu2 %v1879_v43 }
 0x3b9   : > { %v1828_v45 = vpop.f32.mrf.mxu3 }
 0x3ba   : > { %v1829_v46 = vadd.f32 %v1828_v45, %v1009_v32 }
 0x3bc   : > { %v1873_v48 = vsel %vm1792_vm3, %v1829_v46, -inf }
 0x3bd   : > { %1871 = vmax.xlane.f32.xlu2 %v1870_v47  ;;  %1874 = vmax.xlane.f32.xlu0 %v1873_v48 }
 0x3c1   : > { %v1830_v49 = vpop.f32.mrf.mxu3 }
 0x3dd   : > { %v9746_v58 = vpop.trf.xlu2 }
 0x3e5   : > { %v9747_v59 = vpop.trf.xlu2 }
 0x3e6   : > { %9751 = vxpose.binary.xlu0.c.b16.start.end [1/2] (short) (narrow) %v1338_v57, %v1337_v56, 16 }
 0x3e7   : > { %v9749_v14 = vpop.trf.xlu1 }
 0x3e8   : > { %v2052_v16 = vrot.slane %v9749_v14, 4 }
 0x3e9   : > { %v9743_v1 = vpop.trf.xlu0 }
 0x3ea   : > { %v2046_v13 = vrot.slane %v9743_v1, 4 }
 0x3ec   : > { %v2047_v15 = vsel %vm1131_vm1, %v2046_v13, %v9746_v58 }
 0x3ed   : > { %v2051_v17 = vperm.slane %v2047_v15, %v10544_v23 }
 0x3ef   : > { %v2060_v20 = vrot.slane %v2051_v17, 4  ;;  %v9750_v21 = vpop.trf.xlu1 }
 0x3f0   : > { %v2080_v26 = vrot.slane %v9750_v21, 4 }
 0x3f1   : > { %v9744_v2 = vpop.trf.xlu0 }
 0x3f2   : > { %v2074_v7 = vrot.slane %v9744_v2, 4 }
 0x3f4   : > { %v2075_v22 = vsel %vm1131_vm1, %v2074_v7, %v9747_v59 }
 0x3f5   : > { %v2079_v3 = vperm.slane %v2075_v22, %v10544_v23 }
 0x3f7   : > { %v2088_v10 = vrot.slane %v2079_v3, 4 }
 0x420   : > { %v1878_v60 = vpop.xlane.xlu2 %1877 }
 0x421   : > { %v1884_v61 = vsub.f32 %v1848_v34, %v1878_v60 }
 0x423   : > { %v1890_v62 = vmul.f32 1.442695, %v1884_v61 }
 0x425   : > { %10112 = vpow2.f32 %v1890_v62 }
 0x42b   : > { %v10707_v63 = vpop.eup %10112 }
 0x42c   : > { %v1900_v0 = vsel %vm1792_vm3, %v10707_v63, 0.0 }
 0x42d   : > { %1901 = vadd.xlane.f32.xlu1 %v1900_v0 }
 0x430   : > { %v1875_v4 = vpop.xlane.xlu0 %1874 }
 0x431   : > { %v1883_v6 = vsub.f32 %v1829_v46, %v1875_v4 }
 0x433   : > { %v1888_v9 = vmul.f32 1.442695, %v1883_v6 }
 0x435   : > { %10114 = vpow2.f32 %v1888_v9 }
 0x43b   : > { %v10711_v11 = vpop.eup %10114 }
 0x43c   : > { %v1897_v12 = vsel %vm1792_vm3, %v10711_v11, 0.0 }
 0x457   : > { %1898 = vadd.xlane.f32.xlu0 %v1897_v12 }
 0x492   : > { %v9752_v51 = vpop.trf.xlu0 }
 0x493   : > { %v2053_v19 = vsel %vm1131_vm1, %v2052_v16, %v9752_v51 }
 0x494   : > { %v2057_v18 = vperm.slane %v2053_v19, %v10544_v23 }
 0x496   : > { %v2058_v24 = vrot.slane %v2057_v18, 4  ;;  %v2061_v25 = vsel %vm1131_vm1, %v2057_v18, %v2060_v20 }
 0x497   : > { %v2069_v28 = vperm.slane %v2061_v25, %v10552_v35 }
 0x498   : > { %v2059_v27 = vsel %vm1131_vm1, %v2058_v24, %v2051_v17  ;;  %v1881_v17 = vpop.xlane.xlu2 %1880 }
 0x499   : > { %v10725_v5 = vperm.slane %v2059_v27, %v10552_v35  ;;  %v2072_v31 = vrot.slane %v2069_v28, 4  ;;  %v2122_v39 = vshrl.u32 %v2069_v28, 16  ;;  %v1885_v7 = vsub.f32 %v10695_v40, %v1881_v17 }
 0x49a   : > { %v9753_v29 = vpop.trf.xlu0 }
 0x49b   : > { %v2081_v30 = vsel %vm1131_vm1, %v2080_v26, %v9753_v29  ;;  %v2070_v34 = vrot.slane %v10725_v5, 4  ;;  %v2073_v43 = vsel %vm1131_vm1, 0, %v2072_v31  ;;  %v2106_v48 = vshrl.u32 %v10725_v5, 16  ;;  %v9596_v31 = vld [vmem:[%s12156_s12 + $0x8] sm:$0xff] }
 0x49c   : > { %v2085_v8 = vperm.slane %v2081_v30, %v10544_v23  ;;  %v2130_v55 = vshrl.u32 %v2073_v43, 16  ;;  %v1892_v51 = vmul.f32 1.442695, %v1885_v7 }
 0x49d   : > { %v2071_v47 = vsel %vm1131_vm1, 0, %v2070_v34  ;;  %v9595_v34 = vld [vmem:[%s12156_s12] sm:$0xff] }
 0x49e   : > { %v2086_v32 = vrot.slane %v2085_v8, 4  ;;  %v2089_v33 = vsel %vm1131_vm1, %v2085_v8, %v2088_v10  ;;  %v2114_v59 = vshrl.u32 %v2071_v47, 16 }
 0x49f   : > { %v2097_v36 = vperm.slane %v2089_v33, %v10552_v35 }
 0x4a0   : > { %v2087_v37 = vsel %vm1131_vm1, %v2086_v32, %v2079_v3  ;;  %v1902_v38 = vpop.xlane.xlu1 %1901 }
 0x4a1   : > { %v2093_v41 = vperm.slane %v2087_v37, %v10552_v35  ;;  %10116 = vrcp.f32 %v1902_v38  ;;  %v2123_v42 = vshrl.u32 %v2097_v36, 16  ;;  %v2120_v45 = vpack.i.b16 %v2097_v36, %v2069_v28 }
 0x4a2   : > { %v2100_v46 = vrot.slane %v2097_v36, 4 }
 0x4a3   : > { %v2124_v49 = vpack.i.b16 %v2123_v42, %v2122_v39  ;;  %v2098_v50 = vrot.slane %v2093_v41, 4  ;;  %v2104_v52 = vpack.i.b16 %v2093_v41, %v10725_v5  ;;  %v2107_v53 = vshrl.u32 %v2093_v41, 16 }
 0x4a4   : > { %v2101_v54 = vsel %vm1131_vm1, 0, %v2100_v46 }
 0x4a5   : > { %9760 = vxpose.binary.xlu0.c.b16.start.end [1/2] (short) (narrow) %v2124_v49, %v2120_v45, 16  ;;  %v2131_v56 = vshrl.u32 %v2101_v54, 16  ;;  %v2099_v57 = vsel %vm1131_vm1, 0, %v2098_v50  ;;  %v2108_v58 = vpack.i.b16 %v2107_v53, %v2106_v48  ;;  %v2128_v62 = vpack.i.b16 %v2101_v54, %v2073_v43 }
 0x4a6   : > { %v2115_v60 = vshrl.u32 %v2099_v57, 16  ;;  %v2112_v1 = vpack.i.b16 %v2099_v57, %v2071_v47 }
 0x4a7   : > { %v10117_v61 = vpop.eup %10116  ;;  %v2132_v0 = vpack.i.b16 %v2131_v56, %v2130_v55 }
 0x4a8   : > { %v2116_v2 = vpack.i.b16 %v2115_v60, %v2114_v59  ;;  %v1912_v4 = vmul.f32 %v10117_v61, %v10707_v63  ;;  %v1872_v63 = vpop.xlane.xlu2 %1871 }
 0x4a9   : > { %9754 = vxpose.binary.xlu1.c.b16.start.end [1/2] (short) (narrow) %v2132_v0, %v2128_v62, 16  ;;  %v1882_v19 = vsub.f32 %v10699_v44, %v1872_v63 }
 0x4aa   : > { %9757 = vxpose.binary.xlu2.c.b16.start.end [1/2] (short) (narrow) %v2116_v2, %v2112_v1, 16  ;;  %v1916_v6 = vpack.c.bf16 %v1912_v4, %v1912_v4 }
 0x4ab   : > { %v1886_v20 = vmul.f32 1.442695, %v1882_v19 }
 0x4ac   : > { %v2356_v9 = vsel %vm1792_vm3, %v1916_v6, 0 }
 0x4ad   : > { %2365 = vmatpush.bf16.xpose.msra.mxu0 %v2356_v9 }
 0x4b5   : > { %2795 = vmatpush.bf16.msrb.mxu0 %v9596_v31 }
 0x4b9   : > { %2796 = vmatpush.bf16.msrb.mxu0 %v9595_v34 }
 0x4ca   : > { %v1899_v12 = vpop.xlane.xlu0 %1898 }
 0x4cb   : > { %10118 = vrcp.f32 %v1899_v12 }
 0x4cc   : > { %10120 = vpow2.f32 %v1892_v51 }
 0x4cd   : > { %10122 = vpow2.f32 %v1886_v20 }
 0x4d1   : > { %v10119_v13 = vpop.eup %10118 }
 0x4d2   : > { %v1911_v14 = vmul.f32 %v10119_v13, %v10711_v11  ;;  %v10121_v18 = vpop.eup %10120 }
 0x4d3   : > { %v1903_v21 = vsel %vm1792_vm3, %v10121_v18, 0.0  ;;  %v10123_v22 = vpop.eup %10122 }
 0x4d4   : > { %v1915_v15 = vpack.c.bf16 %v1911_v14, %v1911_v14  ;;  %v1894_v11 = vsel %vm1792_vm3, %v10123_v22, 0.0 }
 0x4d6   : > { %v2337_v16 = vsel %vm1792_vm3, %v1915_v15, 0  ;;  %v1006_v15 = vld [vmem:[%s1002_s16] sm:$0xff] }
 0x4d7   : > { %2346 = vmatpush.bf16.xpose.msra.mxu3 %v2337_v16  ;;  %v1007_v16 = vld [vmem:[%s1002_s16 + $0x8] sm:$0xff]  ;;  %s12172_s16 = smov 112  }
 0x4d8   : > { %v10772_v17 = vpack.c.bf16 %v1007_v16, %v1006_v15 }
 0x51b   : > { %1904 = vadd.xlane.f32.xlu2 %v1903_v21 }
 0x523   : > { %1895 = vadd.xlane.f32.xlu2 %v1894_v11 }
 0x54b   : > { %v9758_v24 = vpop.trf.xlu2 }
 0x54c   : > { %9763 = vxpose.binary.xlu2.c.b16.start.end [1/2] (short) (narrow) %v2108_v58, %v2104_v52, 16 }
 0x551   : > { %v9761_v33 = vpop.trf.xlu0 }
 0x552   : > { %v2262_v38 = vrot.slane %v9761_v33, 4 }
 0x553   : > { %v9759_v25 = vpop.trf.xlu2 }
 0x555   : > { %v9755_v8 = vpop.trf.xlu1 }
 0x556   : > { %v2268_v32 = vrot.slane %v9755_v8, 4 }
 0x558   : > { %v2269_v36 = vsel %vm1131_vm1, %v2268_v32, %v9758_v24 }
 0x559   : > { %v2273_v39 = vperm.slane %v2269_v36, %v10544_v23  ;;  %v9762_v47 = vpop.trf.xlu0 }
 0x55a   : > { %v2282_v50 = vrot.slane %v9762_v47, 4 }
 0x55b   : > { %v2274_v45 = vrot.slane %v2273_v39, 4 }
 0x55d   : > { %v9756_v37 = vpop.trf.xlu1 }
 0x55e   : > { %v2288_v41 = vrot.slane %v9756_v37, 4 }
 0x560   : > { %v2289_v48 = vsel %vm1131_vm1, %v2288_v41, %v9759_v25 }
 0x561   : > { %v2293_v52 = vperm.slane %v2289_v48, %v10544_v23 }
 0x563   : > { %v2294_v56 = vrot.slane %v2293_v52, 4 }
 0x58e   : > { %v1905_v40 = vpop.xlane.xlu2 %1904 }
 0x58f   : > { %10124 = vrcp.f32 %v1905_v40  ;;  %v10082_v40 = vld [vmem:[%s10381_s20] ss:$0 sm:$0xff] }
 0x595   : > { %v10125_v26 = vpop.eup %10124 }
 0x596   : > { %v1896_v3 = vpop.xlane.xlu2 %1895  ;;  %v1913_v44 = vmul.f32 %v10125_v26, %v10121_v18 }
 0x597   : > { %10126 = vrcp.f32 %v1896_v3 }
 0x598   : > { %v1917_v27 = vpack.c.bf16 %v1913_v44, %v1913_v44 }
 0x59a   : > { %v2375_v28 = vsel %vm1792_vm3, %v1917_v27, 0 }
 0x59b   : > { %2384 = vmatpush.bf16.xpose.msra.mxu1 %v2375_v28 }
 0x59d   : > { %v10127_v5 = vpop.eup %10126 }
 0x59e   : > { %v1910_v29 = vmul.f32 %v10127_v5, %v10123_v22 }
 0x5a0   : > { %v1914_v30 = vpack.c.bf16 %v1910_v29, %v1910_v29 }
 0x5a2   : > { %v2318_v10 = vsel %vm1792_vm3, %v1914_v30, 0 }
 0x5a3   : > { %2327 = vmatpush.bf16.xpose.msrb.mxu2 %v2318_v10 }
 0x5ed   : > { %v9764_v42 = vpop.trf.xlu2 }
 0x5ee   : > { %v2263_v43 = vsel %vm1131_vm1, %v2262_v38, %v9764_v42 }
 0x5ef   : > { %v2267_v46 = vperm.slane %v2263_v43, %v10544_v23 }
 0x5f1   : > { %v2275_v49 = vsel %vm1131_vm1, %v2274_v45, %v2267_v46 }
 0x5f2   : > { %v2279_v53 = vperm.slane %v2275_v49, %v10552_v35 }
 0x5f4   : > { %v2280_v58 = vrot.slane %v2279_v53, 4  ;;  %v2305_v61 = vshrl.u32 %v2279_v53, 16 }
 0x5f5   : > { %v9765_v54 = vpop.trf.xlu2 }
 0x5f6   : > { %v2283_v55 = vsel %vm1131_vm1, %v2282_v50, %v9765_v54  ;;  %v2281_v2 = vsel %vm1131_vm1, 0, %v2280_v58 }
 0x5f7   : > { %v2287_v57 = vperm.slane %v2283_v55, %v10544_v23  ;;  %v2311_v12 = vshrl.u32 %v2281_v2, 16 }
 0x5f9   : > { %v2295_v59 = vsel %vm1131_vm1, %v2294_v56, %v2287_v57 }
 0x5fa   : > { %v2299_v60 = vperm.slane %v2295_v59, %v10552_v35 }
 0x5fc   : > { %v2300_v62 = vrot.slane %v2299_v60, 4  ;;  %v2306_v0 = vshrl.u32 %v2299_v60, 16  ;;  %v2304_v1 = vpack.i.b16 %v2299_v60, %v2279_v53 }
 0x5fe   : > { %9315 = vmatmul.msk.bf16.vlgmr.msrb.gmra.mxu2 %vm1792_vm3, %v2304_v1  ;;  %v2307_v4 = vpack.i.b16 %v2306_v0, %v2305_v61  ;;  %v2301_v6 = vsel %vm1131_vm1, 0, %v2300_v62 }
 0x5ff   : > { %v2310_v9 = vpack.i.b16 %v2301_v6, %v2281_v2  ;;  %v2312_v13 = vshrl.u32 %v2301_v6, 16 }
 0x600   : > { %9316 = vmatmul.msk.bf16.vlgmr.msra.gmra.mxu3 %vm1792_vm3, %v2307_v4 }
 0x601   : > { %9317 = vmatmul.msk.bf16.vlgmr.msra.gmra.mxu0 %vm1792_vm3, %v2310_v9  ;;  %v2313_v14 = vpack.i.b16 %v2312_v13, %v2311_v12 }
 0x603   : > { %9318 = vmatmul.msk.bf16.vlgmr.msra.gmra.mxu1 %vm1792_vm3, %v2313_v14 }
 0x611   : > { %9345 = vmatmul.msk.bf16.vlgmr.msrb.gmra.mxu0 %vm1047_vm0, %v10772_v17 }
 0x67e   : > { %v2367_v7 = vpop.f32.mrf.mxu0 }
 0x680   : > { %v2386_v51 = vpop.f32.mrf.mxu1 }
 0x681   : > { %v2329_v63 = vpop.f32.mrf.mxu2 }
 0x682   : > { %v9766_v19 = vpack.i.bf16 %v2329_v63, %v2367_v7 }
 0x683   : > { %v2348_v20 = vpop.f32.mrf.mxu3 }
 0x684   : > { %v9773_v18 = vpack.i.bf16 %v2348_v20, %v2386_v51  ;;  %9767 = vxpose.xlu0.b32.start.end [1/1] (short) (narrow) %v9766_v19, 8 }
 0x686   : > { %9774 = vxpose.xlu2.b32.start.end [1/1] (short) (narrow) %v9773_v18, 8  ;;  %v2369_v21 = vpop.f32.mrf.mxu0 }
 0x688   : > { %v2388_v22 = vpop.f32.mrf.mxu1 }
 0x689   : > { %v2331_v11 = vpop.f32.mrf.mxu2 }
 0x68b   : > { %v2350_v24 = vpop.f32.mrf.mxu3 }
 0x68e   : > { %v2798_v25 = vpop.f32.mrf.mxu0 }
 0x68f   : > { %v10777_v26 = vadd.f32 %v10082_v40, %v2798_v25 }
 0x696   : > { %v2800_v3 = vpop.f32.mrf.mxu0 }
 0x697   : > { %v10779_v44 = vadd.f32 %v10082_v40, %v2800_v3 }
 0x699   : > { %v10783_v27 = vpack.i.bf16 %v10779_v44, %v10777_v26 }
 0x69b   : > { %9791 = vrot.lane.b32.xlu1 %v10783_v27, %s12172_s16 }
 0x71f   : > { %v9775_v28 = vpop.trf.xlu2 }
 0x720   : > { %v9779_v5 = vunpack.i.h.bf16 %v9775_v28  ;;  %v9776_v29 = vunpack.i.l.bf16 %v9775_v28 }
 0x722   : > { %v2532_v30 = vrot.slane %v9779_v5, 4  ;;  %v2530_v10 = vrot.slane %v9776_v29, 4 }
 0x724   : > { %v2531_v8 = vsel %vm1131_vm1, %v2530_v10, %v9779_v5  ;;  %v2533_v31 = vsel %vm1131_vm1, %v9776_v29, %v2532_v30 }
 0x725   : > { %v2537_v32 = vperm.slane %v2531_v8, %v10544_v23  ;;  %v2541_v33 = vperm.slane %v2533_v31, %v10544_v23 }
 0x727   : > { %v2542_v41 = vrot.slane %v2537_v32, 4  ;;  %v2554_v42 = vrot.slane %v2541_v33, 4 }
 0x728   : > { %v9768_v34 = vpop.trf.xlu0 }
 0x729   : > { %v9772_v36 = vunpack.i.h.bf16 %v9768_v34  ;;  %v9769_v37 = vunpack.i.l.bf16 %v9768_v34 }
 0x72b   : > { %v2520_v38 = vrot.slane %v9772_v36, 4  ;;  %v2518_v39 = vrot.slane %v9769_v37, 4 }
 0x72d   : > { %v2519_v43 = vsel %vm1131_vm1, %v2518_v39, %v9772_v36  ;;  %v2521_v45 = vsel %vm1131_vm1, %v9769_v37, %v2520_v38  ;;  %v9592_v36 = vld [vmem:[%s10356_s19 + $0x8] sm:$0xff]  ;;  %v9591_v37 = vld [vmem:[%s10356_s19] sm:$0xff] }
 0x72e   : > { %v2525_v46 = vperm.slane %v2519_v43, %v10544_v23  ;;  %v2529_v47 = vperm.slane %v2521_v45, %v10544_v23  ;;  %2670 = vmatpush.bf16.msra.mxu2 %v9592_v36 }
 0x730   : > { %v2543_v48 = vsel %vm1131_vm1, %v2542_v41, %v2525_v46  ;;  %v2544_v49 = vrot.slane %v2525_v46, 4  ;;  %v2555_v50 = vsel %vm1131_vm1, %v2554_v42, %v2529_v47  ;;  %v2556_v52 = vrot.slane %v2529_v47, 4  ;;  %v10838_v41 = vpop.permute.xlu1 %9791 }
 0x731   : > { %v2549_v53 = vperm.slane %v2543_v48, %v10552_v35  ;;  %v2561_v54 = vperm.slane %v2555_v50, %v10552_v35  ;;  %v2928_v42 = vrot.slane %v10777_v26, 4  ;;  %v9793_v43 = vunpack.i.l.bf16 %v10838_v41 }
 0x732   : > { %v2545_v55 = vsel %vm1131_vm1, %v2537_v32, %v2544_v49  ;;  %v2557_v56 = vsel %vm1131_vm1, %v2541_v33, %v2556_v52  ;;  %2671 = vmatpush.bf16.msra.mxu2 %v9591_v37  ;;  %v9794_v46 = vunpack.i.h.bf16 %v10838_v41 }
 0x733   : > { %v2553_v57 = vperm.slane %v2545_v55, %v10552_v35  ;;  %v2565_v58 = vperm.slane %v2557_v56, %v10552_v35  ;;  %v2566_v59 = vrot.slane %v2549_v53, 4  ;;  %v2570_v61 = vrot.slane %v2561_v54, 4 }
 0x734   : > { %v2929_v47 = vsel %vm1131_vm1, %v9793_v43, %v2928_v42 }
 0x735   : > { %v2568_v60 = vrot.slane %v2553_v57, 4  ;;  %v2572_v62 = vrot.slane %v2565_v58, 4  ;;  %v2567_v14 = vsel %vm1131_vm1, 0.0, %v2566_v59  ;;  %v2571_v15 = vsel %vm1131_vm1, 0.0, %v2570_v61 }
 0x736   : > { %v2937_v49 = vperm.slane %v2929_v47, %v10544_v23 }
 0x737   : > { %v2569_v0 = vsel %vm1131_vm1, 0.0, %v2568_v60  ;;  %v2573_v1 = vsel %vm1131_vm1, 0.0, %v2572_v62  ;;  %v2574_v2 = vsel %vm1131_vm1, %v2568_v60, %v2549_v53  ;;  %v2585_v4 = vsel %vm1131_vm1, %v2572_v62, %v2561_v54 }
 0x738   : > { %v2578_v6 = vperm.slane %v2574_v2, %v10544_v23  ;;  %v2579_v9 = vrot.slane %v2569_v0, 4  ;;  %v2589_v12 = vperm.slane %v2585_v4, %v10544_v23  ;;  %v2590_v13 = vrot.slane %v2573_v1, 4 }
 0x739   : > { %v2982_v54 = vrot.slane %v9794_v46, 4  ;;  %v2964_v61 = vrot.slane %v2937_v49, 4 }
 0x73a   : > { %v2580_v16 = vsel %vm1131_vm1, %v2579_v9, %v2567_v14  ;;  %v2591_v7 = vsel %vm1131_vm1, %v2590_v13, %v2571_v15  ;;  %v2598_v51 = vrot.slane %v2578_v6, 4  ;;  %v2610_v63 = vrot.slane %v2589_v12, 4 }
 0x73b   : > { %v2584_v19 = vperm.slane %v2580_v16, %v10544_v23  ;;  %v2595_v20 = vperm.slane %v2591_v7, %v10544_v23  ;;  %v2983_v4 = vsel %vm1131_vm1, %v2982_v54, %v10779_v44 }
 0x73c   : > { %v2989_v16 = vperm.slane %v2983_v4, %v10544_v23 }
 0x73d   : > { %v2599_v18 = vsel %vm1131_vm1, %v2584_v19, %v2598_v51  ;;  %v2611_v21 = vsel %vm1131_vm1, %v2595_v20, %v2610_v63  ;;  %v2596_v22 = vrot.slane %v2584_v19, 4  ;;  %v2608_v11 = vrot.slane %v2595_v20, 4 }
 0x73e   : > { %v2607_v24 = vperm.slane %v2599_v18, %v10552_v35  ;;  %v2619_v25 = vperm.slane %v2611_v21, %v10552_v35 }
 0x73f   : > { %v2597_v40 = vsel %vm1131_vm1, %v2596_v22, %v2578_v6  ;;  %v2609_v3 = vsel %vm1131_vm1, %v2608_v11, %v2589_v12 }
 0x740   : > { %v2626_v28 = vrot.slane %v2607_v24, 4  ;;  %v2624_v5 = vrot.slane %v2619_v25, 4  ;;  %v2603_v29 = vperm.slane %v2597_v40, %v10552_v35  ;;  %v2615_v30 = vperm.slane %v2609_v3, %v10552_v35 }
 0x742   : > { %v2627_v10 = vsel %vm1131_vm1, %v2619_v25, %v2626_v28  ;;  %v2625_v8 = vsel %vm1131_vm1, %v2624_v5, %v2607_v24  ;;  %v2620_v31 = vrot.slane %v2615_v30, 4  ;;  %v2622_v32 = vrot.slane %v2603_v29, 4 }
 0x743   : > { %2637 = vrot.lane.b32.xlu2 %v2627_v10, %s12106_s26  ;;  %2633 = vrot.lane.b32.xlu0 %v2625_v8, %s12104_s10  ;;  %s12177_s10 = sld [smem:[#allocation17_spill]] }
 0x744   : > { %v2623_v33 = vsel %vm1131_vm1, %v2615_v30, %v2622_v32  ;;  %v2621_v34 = vsel %vm1131_vm1, %v2620_v31, %v2603_v29  ;;  %v3008_v29 = vrot.slane %v2989_v16, 4  ;;  %s12178_s26 = sld [smem:[#allocation13_spill]] }
 0x745   : > { %2629 = vrot.lane.b32.xlu1 %v2623_v33, %s12102_s5  ;;  %s12176_s5 = sld [smem:[#allocation16_spill]] }
 0x74b   : > { %9781 = vrot.lane.b32.xlu2 %v10783_v27, %s12173_s9 }
 0x753   : > { %9786 = vrot.lane.b32.xlu2 %v10783_v27, %s12174_s18  ;;  %v2926_v27 = vrot.slane %v9793_v43, 4 }
 0x755   : > { %v2927_v59 = vsel %vm1131_vm1, %v2926_v27, %v10777_v26 }
 0x756   : > { %v2933_v6 = vperm.slane %v2927_v59, %v10544_v23 }
 0x758   : > { %v2952_v32 = vrot.slane %v2933_v6, 4 }
 0x79d   : > { %v2638_v38 = vpop.permute.xlu2 %2637 }
 0x7a5   : > { %v10836_v39 = vpop.permute.xlu2 %9781 }
 0x7a6   : > { %v9783_v45 = vunpack.i.l.bf16 %v10836_v39  ;;  %v9784_v55 = vunpack.i.h.bf16 %v10836_v39 }
 0x7a8   : > { %v2940_v50 = vrot.slane %v9783_v45, 4  ;;  %v2996_v39 = vrot.slane %v9784_v55, 4 }
 0x7ad   : > { %v9787_v48 = vpop.permute.xlu2 %9786 }
 0x7ae   : > { %v9789_v52 = vunpack.i.h.bf16 %v9787_v48  ;;  %v9788_v53 = vunpack.i.l.bf16 %v9787_v48 }
 0x7b0   : > { %v2994_v56 = vrot.slane %v9789_v52, 4  ;;  %v2938_v57 = vrot.slane %v9788_v53, 4  ;;  %v2941_v58 = vsel %vm1131_vm1, %v9788_v53, %v2940_v50  ;;  %v2997_v43 = vsel %vm1131_vm1, %v9789_v52, %v2996_v39 }
 0x7b1   : > { %v2949_v60 = vperm.slane %v2941_v58, %v10544_v23  ;;  %v3005_v27 = vperm.slane %v2997_v43, %v10544_v23 }
 0x7b2   : > { %v2939_v62 = vsel %vm1131_vm1, %v2938_v57, %v9783_v45  ;;  %v2995_v0 = vsel %vm1131_vm1, %v2994_v56, %v9784_v55  ;;  %v2984_v45 = vrot.slane %v10779_v44, 4 }
 0x7b3   : > { %v2945_v1 = vperm.slane %v2939_v62, %v10544_v23  ;;  %v2962_v2 = vrot.slane %v2949_v60, 4  ;;  %v2965_v9 = vsel %vm1131_vm1, %v2949_v60, %v2964_v61  ;;  %v3001_v26 = vperm.slane %v2995_v0, %v10544_v23 }
 0x7b4   : > { %v2973_v13 = vperm.slane %v2965_v9, %v10552_v35  ;;  %v2985_v48 = vsel %vm1131_vm1, %v9794_v46, %v2984_v45  ;;  %v3018_v50 = vrot.slane %v3005_v27, 4  ;;  %v10190_v9 = vld [vmem:[%s10523_s15] sm:$0xff]  ;;  %s12175_s15 = sld [smem:[#allocation10_spill]] }
 0x7b5   : > { %v2950_v12 = vrot.slane %v2945_v1, 4  ;;  %v2963_v14 = vsel %vm1131_vm1, %v2962_v2, %v2937_v49  ;;  %v2634_v19 = vpop.permute.xlu0 %2633  ;;  %v3006_v22 = vrot.slane %v3001_v26, 4  ;;  %v3009_v37 = vsel %vm1131_vm1, %v3001_v26, %v3008_v29  ;;  %v10083_v2 = vld [vmem:[%s10361_s24] ss:$0 sm:$0xff] }
 0x7b6   : > { %v2969_v15 = vperm.slane %v2963_v14, %v10552_v35  ;;  %v2980_v51 = vrot.slane %v2973_v13, 4  ;;  %v3044_v25 = vpack.c.bf16 %v2973_v13, %v2973_v13  ;;  %v2993_v53 = vperm.slane %v2985_v48, %v10544_v23 }
 0x7b7   : > { %v2630_v7 = vpop.permute.xlu1 %2629  ;;  %v2951_v63 = vsel %vm1131_vm1, %v2950_v12, %v2933_v6  ;;  %v3007_v36 = vsel %vm1131_vm1, %v3006_v22, %v2989_v16 }
 0x7b8   : > { %v2640_v20 = vsel %vm1792_vm3, %v2621_v34, %v2630_v7  ;;  %v2978_v18 = vrot.slane %v2969_v15, 4  ;;  %v2957_v21 = vperm.slane %v2951_v63, %v10552_v35  ;;  %v2981_v24 = vsel %vm1131_vm1, 0.0, %v2980_v51 }
 0x7b9   : > { %v2642_v11 = vsel %vm2641_vm4, %v2640_v20, %v2634_v19  ;;  %v3045_v3 = vpack.c.bf16 %v2981_v24, %v2981_v24  ;;  %v3042_v8 = vpack.c.bf16 %v2969_v15, %v2969_v15  ;;  %v3019_v52 = vsel %vm1131_vm1, %v3018_v50, %v2993_v53 }
 0x7ba   : > { %v2644_v40 = vsel %vm2643_vm5, %v2642_v11, %v2638_v38  ;;  %v2979_v28 = vsel %vm1131_vm1, 0.0, %v2978_v18  ;;  %v2974_v5 = vrot.slane %v2957_v21, 4  ;;  %v3038_v33 = vpack.c.bf16 %v2957_v21, %v2957_v21 }
 0x7bb   : > { %v2645_v30 = vpack.c.bf16 %v2644_v40, %v2644_v40  ;;  %v3043_v10 = vpack.c.bf16 %v2979_v28, %v2979_v28  ;;  %9795 = vxpose.binary.xlu0.c.b16.start.end [1/2] (short) (narrow) %v3045_v3, %v3044_v25, 16  ;;  %v2953_v38 = vsel %vm1131_vm1, %v2945_v1, %v2952_v32  ;;  %v3020_v41 = vrot.slane %v2993_v53, 4  ;;  %v9594_v32 = vld [vmem:[%s12175_s15 + $0x8] sm:$0xff] }
 0x7bc   : > { %v2975_v31 = vsel %vm1131_vm1, 0.0, %v2974_v5  ;;  %v2961_v42 = vperm.slane %v2953_v38, %v10552_v35  ;;  %v3025_v44 = vperm.slane %v3019_v52, %v10552_v35  ;;  %v3013_v16 = vperm.slane %v3007_v36, %v10552_v35  ;;  %2764 = vmatpush.bf16.msrb.mxu3 %v9594_v32  ;;  %v9593_v36 = vld [vmem:[%s12175_s15] sm:$0xff] }
 0x7bd   : > { %9327 = vmatmul.msk.bf16.vlgmr.msra.gmra.mxu2 %vm1047_vm0, %v2645_v30  ;;  %v3039_v34 = vpack.c.bf16 %v2975_v31, %v2975_v31  ;;  %v3021_v59 = vsel %vm1131_vm1, %v3005_v27, %v3020_v41  ;;  %v3017_v20 = vperm.slane %v3009_v37, %v10552_v35  ;;  %v10297_v24 = vmov 32.0   ;;  %v9598_v31 = vld [vmem:[%s10386_s27 + $0x8] sm:$0xff]  ;;  %v10084_v52 = vld [vmem:[%s12176_s5] ss:$0 sm:$0xff] }
 0x7be   : > { %9798 = vxpose.binary.xlu2.c.b16.start.end [1/2] (short) (narrow) %v3043_v10, %v3042_v8, 16  ;;  %v2976_v47 = vrot.slane %v2961_v42, 4  ;;  %v3040_v54 = vpack.c.bf16 %v2961_v42, %v2961_v42  ;;  %v3034_v56 = vrot.slane %v3025_v44, 4  ;;  %v3050_v58 = vpack.c.bf16 %v3025_v44, %v3025_v44 }
 0x7bf   : > { %9801 = vxpose.binary.xlu1.c.b16.start.end [1/2] (short) (narrow) %v3039_v34, %v3038_v33, 16  ;;  %v3029_v60 = vperm.slane %v3021_v59, %v10552_v35  ;;  %v3030_v7 = vrot.slane %v3013_v16, 4  ;;  %v3046_v63 = vpack.c.bf16 %v3013_v16, %v3013_v16  ;;  %v3032_v18 = vrot.slane %v3017_v20, 4  ;;  %v9597_v34 = vld [vmem:[%s10386_s27] sm:$0xff] }
 0x7c0   : > { %v2977_v49 = vsel %vm1131_vm1, 0.0, %v2976_v47  ;;  %v3035_v57 = vsel %vm1131_vm1, 0.0, %v3034_v56  ;;  %v3048_v22 = vpack.c.bf16 %v3017_v20, %v3017_v20  ;;  %10128 = vrcp.f32 %v10297_v24  ;;  %2824 = vmatpush.bf16.msrb.mxu1 %v9598_v31  ;;  %2765 = vmatpush.bf16.msrb.mxu3 %v9593_v36 }
 0x7c1   : > { %v3041_v55 = vpack.c.bf16 %v2977_v49, %v2977_v49  ;;  %v3051_v46 = vpack.c.bf16 %v3035_v57, %v3035_v57  ;;  %v3036_v61 = vrot.slane %v3029_v60, 4  ;;  %v3052_v0 = vpack.c.bf16 %v3029_v60, %v3029_v60  ;;  %v10085_v57 = vld [vmem:[%s12177_s10] ss:$0 sm:$0xff] }
 0x7c2   : > { %v3031_v51 = vsel %vm1131_vm1, 0.0, %v3030_v7  ;;  %v3033_v21 = vsel %vm1131_vm1, 0.0, %v3032_v18 }
 0x7c3   : > { %v3037_v62 = vsel %vm1131_vm1, 0.0, %v3036_v61  ;;  %v3047_v19 = vpack.c.bf16 %v3031_v51, %v3031_v51  ;;  %v3049_v11 = vpack.c.bf16 %v3033_v21, %v3033_v21 }
 0x7c4   : > { %v3053_v1 = vpack.c.bf16 %v3037_v62, %v3037_v62  ;;  %2825 = vmatpush.bf16.msrb.mxu1 %v9597_v34 }
 0x7c6   : > { %v10129_v25 = vpop.eup %10128 }
 0x7c7   : > { %v2684_v3 = vmul.f32 32.0, %v10129_v25  ;;  %vm2688_vm6 = vweird.f32 %v10129_v25  ;;  %9354 = vmatmul.msk.bf16.vlgmr.msrb.gmra.mxu1 %vm1047_vm0, %v10772_v17 }
 0x7c9   : > { %v2685_v5 = vsub.f32 1.0, %v2684_v3 }
 0x7cb   : > { %v2686_v30 = vmul.f32 %v10129_v25, %v2685_v5 }
 0x7cd   : > { %v2687_v8 = vadd.f32 %v10129_v25, %v2686_v30 }
 0x7ce   : > { %9804 = vxpose.binary.xlu2.c.b16.start.end [1/2] (short) (narrow) %v3041_v55, %v3040_v54, 16 }
 0x7cf   : > { %v10910_v33 = vsel %vm2688_vm6, %v10129_v25, %v2687_v8 }
 0x7de   : > { %9807 = vxpose.binary.xlu2.c.b16.start.end [1/2] (short) (narrow) %v3051_v46, %v3050_v58, 16 }
 0x7ee   : > { %9813 = vxpose.binary.xlu2.c.b16.start.end [1/2] (short) (narrow) %v3053_v1, %v3052_v0, 16 }
 0x840   : > { %v2673_v4 = vpop.f32.mrf.mxu2 }
 0x841   : > { %v2674_v6 = vadd.f32 %v10083_v2, %v2673_v4  ;;  %v10086_v4 = vld [vmem:[%s12178_s26] ss:$0 sm:$0xff] }
 0x843   : > { %v2677_v12 = vadd.f32 %v10190_v9, %v2674_v6  ;;  %v10087_v6 = vld [vmem:[%s12179_s2] ss:$0 sm:$0xff]  ;;  %s12181_s2 = sld [smem:[#allocation7_spill]] }
 0x844   : > { %v2827_v2 = vpop.f32.mrf.mxu1 }
 0x845   : > { %v2680_v26 = vsel %vm1047_vm0, %v2677_v12, 0.0  ;;  %v2691_v13 = vmul.f32 %v2677_v12, %v2677_v12  ;;  %v10927_v9 = vadd.f32 %v10086_v4, %v2827_v2 }
 0x846   : > { %2681 = vadd.xlane.f32.xlu1 %v2680_v26 }
 0x847   : > { %v2692_v14 = vsel %vm1047_vm0, %v2691_v13, 0.0 }
 0x848   : > { %v2675_v15 = vpop.f32.mrf.mxu2  ;;  %2693 = vadd.xlane.f32.xlu0 %v2692_v14 }
 0x849   : > { %s12182_s23 = smov %s12181_s2 }
 0x84c   : > { %v2829_v15 = vpop.f32.mrf.mxu1 }
 0x84d   : > { %v10938_v51 = vadd.f32 %v10086_v4, %v2829_v15 }
 0x85f   : > { %v9799_v59 = vpop.trf.xlu2 }
 0x860   : > { %v3510_v32 = vrot.slane %v9799_v59, 4 }
 0x867   : > { %v10902_v28 = vpop.trf.xlu0  ;;  %v9800_v60 = vpop.trf.xlu2 }
 0x868   : > { %v3566_v5 = vrot.slane %v9800_v60, 4 }
 0x86b   : > { %v10900_v40 = vpop.trf.xlu1 }
 0x86f   : > { %v10906_v10 = vpop.trf.xlu0  ;;  %v9805_v61 = vpop.trf.xlu2 }
 0x870   : > { %v3572_v18 = vrot.slane %v10906_v10, 4 }
 0x871   : > { %9810 = vxpose.binary.xlu0.c.b16.start.end [1/2] (short) (narrow) %v3047_v19, %v3046_v63, 16  ;;  %v10944_v19 = vpack.i.bf16 %v10938_v51, %v10927_v9 }
 0x873   : > { %v10904_v29 = vpop.trf.xlu1 }
 0x877   : > { %v9806_v62 = vpop.trf.xlu2 }
 0x878   : > { %v3573_v30 = vsel %vm1131_vm1, %v3572_v18, %v9806_v62 }
 0x87f   : > { %v9808_v0 = vpop.trf.xlu2 }
 0x880   : > { %9816 = vxpose.binary.xlu1.c.b16.start.end [1/2] (short) (narrow) %v3049_v11, %v3048_v22, 16  ;;  %v3516_v11 = vrot.slane %v10902_v28, 4  ;;  %v3522_v24 = vrot.slane %v9808_v0, 4 }
 0x882   : > { %v3517_v34 = vsel %vm1131_vm1, %v3516_v11, %v9805_v61 }
 0x887   : > { %v9809_v1 = vpop.trf.xlu2 }
 0x888   : > { %v3578_v21 = vrot.slane %v9809_v1, 4 }
 0x88f   : > { %v9814_v13 = vpop.trf.xlu2 }
 0x890   : > { %v3528_v8 = vrot.slane %v9814_v13, 4 }
 0x897   : > { %v9815_v20 = vpop.trf.xlu2 }
 0x898   : > { %v3584_v25 = vrot.slane %v9815_v20, 4 }
 0x8b9   : > { %v2682_v37 = vpop.xlane.xlu1 %2681 }
 0x8ba   : > { %v2690_v38 = vmul.f32 %v10910_v33, %v2682_v37  ;;  %v3577_v37 = vperm.slane %v3573_v30, %v10544_v23 }
 0x8bb   : > { %v2694_v39 = vpop.xlane.xlu0 %2693 }
 0x8bc   : > { %v2696_v42 = vmul.f32 %v2690_v38, %v2690_v38  ;;  %v2695_v43 = vmul.f32 %v2694_v39, %v10910_v33  ;;  %v2698_v55 = vsub.f32 %v2677_v12, %v2690_v38  ;;  %v3567_v38 = vsel %vm1131_vm1, %v3566_v5, %v10904_v29 }
 0x8be   : > { %v2697_v45 = vsub.f32 %v2695_v43, %v2696_v42  ;;  %v3521_v42 = vperm.slane %v3517_v34, %v10544_v23 }
 0x8c0   : > { %v2699_v47 = vadd.f32 1e-05, %v2697_v45 }
 0x8c2   : > { %10130 = vrsqrt.f32 %v2699_v47  ;;  %vm2706_vm8 = vweird.f32 %v2699_v47 }
 0x8c8   : > { %v10131_v27 = vpop.eup %10130 }
 0x8c9   : > { %v2701_v48 = vmul.f32 %v10131_v27, %v2699_v47  ;;  %vm2707_vm7 = vweird.f32 %v10131_v27  ;;  %v3511_v47 = vsel %vm1131_vm1, %v3510_v32, %v10900_v40 }
 0x8ca   : > { %vm2708_vm9 = vmor %vm2706_vm8, %vm2707_vm7  ;;  %v3515_v29 = vperm.slane %v3511_v47, %v10544_v23 }
 0x8cb   : > { %v2702_v49 = vmul.f32 %v10131_v27, %v2701_v48  ;;  %v3571_v48 = vperm.slane %v3567_v38, %v10544_v23 }
 0x8cc   : > { %v3536_v61 = vrot.slane %v3515_v29, 4 }
 0x8cd   : > { %v2703_v50 = vmul.f32 0.5, %v2702_v49 }
 0x8cf   : > { %v2704_v53 = vsub.f32 1.5, %v2703_v50 }
 0x8d1   : > { %v2705_v54 = vmul.f32 %v10131_v27, %v2704_v53  ;;  %v3534_v53 = vrot.slane %v3521_v42, 4 }
 0x8d3   : > { %v2709_v44 = vsel %vm2708_vm9, %v10131_v27, %v2705_v54  ;;  %v3590_v27 = vrot.slane %v3577_v37, 4 }
 0x8d4   : > { %v2710_v56 = vmul.f32 %v2709_v44, %v2698_v55 }
 0x8d6   : > { %v2714_v41 = vmul.f32 %v10084_v52, %v2710_v56  ;;  %v3591_v52 = vsel %vm1131_vm1, %v3590_v27, %v3571_v48 }
 0x8d7   : > { %v3597_v59 = vperm.slane %v3591_v52, %v10552_v35 }
 0x8d8   : > { %v10920_v58 = vadd.f32 %v10085_v57, %v2714_v41  ;;  %v3535_v57 = vsel %vm1131_vm1, %v3534_v53, %v3515_v29  ;;  %v3592_v41 = vrot.slane %v3571_v48, 4 }
 0x8d9   : > { %v3541_v0 = vperm.slane %v3535_v57, %v10552_v35 }
 0x8da   : > { %v2739_v46 = vpack.c.bf16 %v10920_v58, %v10920_v58  ;;  %v3593_v4 = vsel %vm1131_vm1, %v3577_v37, %v3592_v41 }
 0x8db   : > { %v3560_v15 = vrot.slane %v3541_v0, 4 }
 0x8dc   : > { %9336 = vmatmul.msk.bf16.vlgmr.msrb.gmra.mxu3 %vm1047_vm0, %v2739_v46 }
 0x91d   : > { %v9811_v16 = vpop.trf.xlu0 }
 0x91e   : > { %v3523_v36 = vsel %vm1131_vm1, %v3522_v24, %v9811_v16  ;;  %v3601_v16 = vperm.slane %v3593_v4, %v10552_v35 }
 0x91f   : > { %v3527_v43 = vperm.slane %v3523_v36, %v10544_v23 }
 0x921   : > { %v3548_v54 = vrot.slane %v3527_v43, 4 }
 0x925   : > { %v9812_v22 = vpop.trf.xlu0 }
 0x926   : > { %v3579_v31 = vsel %vm1131_vm1, %v3578_v21, %v9812_v22 }
 0x927   : > { %v3583_v28 = vperm.slane %v3579_v31, %v10544_v23 }
 0x929   : > { %v3604_v50 = vrot.slane %v3583_v28, 4 }
 0x92c   : > { %v9817_v7 = vpop.trf.xlu1 }
 0x92d   : > { %v3529_v39 = vsel %vm1131_vm1, %v3528_v8, %v9817_v7 }
 0x92e   : > { %v3533_v49 = vperm.slane %v3529_v39, %v10544_v23 }
 0x930   : > { %v3546_v44 = vrot.slane %v3533_v49, 4  ;;  %v3549_v40 = vsel %vm1131_vm1, %v3533_v49, %v3548_v54 }
 0x931   : > { %v3557_v1 = vperm.slane %v3549_v40, %v10552_v35 }
 0x932   : > { %v3547_v62 = vsel %vm1131_vm1, %v3546_v44, %v3527_v43 }
 0x933   : > { %v3562_v7 = vrot.slane %v3557_v1, 4 }
 0x934   : > { %v9818_v3 = vpop.trf.xlu1 }
 0x935   : > { %v3585_v10 = vsel %vm1131_vm1, %v3584_v25, %v9818_v3  ;;  %v3620_v3 = vrot.slane %v3601_v16, 4 }
 0x936   : > { %v3589_v45 = vperm.slane %v3585_v10, %v10544_v23 }
 0x938   : > { %v3602_v55 = vrot.slane %v3589_v45, 4  ;;  %v3605_v56 = vsel %vm1131_vm1, %v3589_v45, %v3604_v50 }
 0x939   : > { %v3613_v60 = vperm.slane %v3605_v56, %v10552_v35 }
 0x93a   : > { %v3603_v46 = vsel %vm1131_vm1, %v3602_v55, %v3583_v28 }
 0x93b   : > { %v3609_v2 = vperm.slane %v3603_v46, %v10552_v35  ;;  %v3618_v13 = vrot.slane %v3613_v60, 4  ;;  %v3621_v36 = vsel %vm1131_vm1, %v3613_v60, %v3620_v3 }
 0x93c   : > { %v3651_v37 = vshrl.u32 %v3621_v36, 16 }
 0x93d   : > { %v3619_v21 = vsel %vm1131_vm1, %v3618_v13, %v3601_v16  ;;  %v3614_v28 = vrot.slane %v3609_v2, 4 }
 0x93e   : > { %v3643_v25 = vshrl.u32 %v3619_v21, 16 }
 0x93f   : > { %v3615_v45 = vsel %vm1131_vm1, %v3614_v28, %v3597_v59 }
 0x940   : > { %v3627_v27 = vshrl.u32 %v3615_v45, 16 }
 0x95f   : > { %v2767_v12 = vpop.f32.mrf.mxu3 }
 0x960   : > { %v10929_v26 = vadd.f32 %v10087_v6, %v2767_v12  ;;  %v3616_v6 = vrot.slane %v3597_v59, 4  ;;  %v3553_v12 = vperm.slane %v3547_v62, %v10552_v35 }
 0x962   : > { %2839 = vrot.lane.b32.xlu1 %v10929_v26, %s12174_s18  ;;  %2836 = vrot.lane.b32.xlu2 %v10929_v26, %s12172_s16  ;;  %v9819_v14 = vpack.i.bf16 %v10927_v9, %v10929_v26  ;;  %v3561_v18 = vsel %vm1131_vm1, %v3553_v12, %v3560_v15  ;;  %v3558_v39 = vrot.slane %v3553_v12, 4  ;;  %v2844_v52 = vrot.slane %v10929_v26, 4 }
 0x963   : > { %v3634_v24 = vshrl.u32 %v3561_v18, 16 }
 0x964   : > { %9820 = vrot.lane.b32.xlu0 %v9819_v14, %s12173_s9  ;;  %v3537_v14 = vsel %vm1131_vm1, %v3521_v42, %v3536_v61  ;;  %v3559_v47 = vsel %vm1131_vm1, %v3558_v39, %v3541_v0 }
 0x965   : > { %v3545_v20 = vperm.slane %v3537_v14, %v10552_v35  ;;  %v3626_v48 = vshrl.u32 %v3559_v47, 16  ;;  %v3624_v49 = vpack.i.b16 %v3615_v45, %v3559_v47 }
 0x967   : > { %v2769_v63 = vpop.f32.mrf.mxu3  ;;  %v3563_v11 = vsel %vm1131_vm1, %v3562_v7, %v3545_v20  ;;  %v3564_v31 = vrot.slane %v3545_v20, 4  ;;  %v3628_v50 = vpack.i.b16 %v3627_v27, %v3626_v48 }
 0x968   : > { %v3617_v63 = vsel %vm1131_vm1, %v3609_v2, %v3616_v6  ;;  %v3642_v8 = vshrl.u32 %v3563_v11, 16  ;;  %v3640_v32 = vpack.i.b16 %v3619_v21, %v3563_v11 }
 0x969   : > { %v3635_v22 = vshrl.u32 %v3617_v63, 16  ;;  %v3632_v5 = vpack.i.b16 %v3617_v63, %v3561_v18  ;;  %v3565_v10 = vsel %vm1131_vm1, %v3557_v1, %v3564_v31 }
 0x96a   : > { %3058 = vrot.lane.b32.xlu2 %v10938_v51, %s12173_s9  ;;  %v3644_v34 = vpack.i.b16 %v3643_v25, %v3642_v8  ;;  %v3650_v38 = vshrl.u32 %v3565_v10, 16  ;;  %v3648_v42 = vpack.i.b16 %v3621_v36, %v3565_v10 }
 0x96b   : > { %v3636_v30 = vpack.i.b16 %v3635_v22, %v3634_v24 }
 0x96c   : > { %9836 = vrot.lane.b32.xlu0 %v10944_v19, %s12172_s16  ;;  %v3652_v43 = vpack.i.b16 %v3651_v37, %v3650_v38 }
 0x98e   : > { %9840 = vxpose.binary.xlu0.c.b16.start.end [1/2] (short) (narrow) %v3636_v30, %v3632_v5, 16 }
 0x990   : > { %9827 = vxpose.binary.xlu2.c.b16.start.end [1/2] (short) (narrow) %v3644_v34, %v3640_v32, 16 }
 0x997   : > { %9824 = vxpose.binary.xlu1.c.b16.start.end [1/2] (short) (narrow) %v3652_v43, %v3648_v42, 16 }
 0x99e   : > { %9843 = vxpose.binary.xlu0.c.b16.start.end [1/2] (short) (narrow) %v3628_v50, %v3624_v49, 16 }
 0x9bc   : > { %v2837_v54 = vpop.permute.xlu2 %2836 }
 0x9bd   : > { %v2845_v44 = vsel %vm1131_vm1, %v2837_v54, %v2844_v52  ;;  %v2842_v41 = vrot.slane %v2837_v54, 4 }
 0x9be   : > { %v2853_v40 = vperm.slane %v2845_v44, %v10544_v23 }
 0x9c0   : > { %v2880_v60 = vrot.slane %v2853_v40, 4 }
 0x9c4   : > { %v11016_v18 = vpop.permute.xlu2 %3058 }
 0x9d4   : > { %v2840_v56 = vpop.permute.xlu1 %2839 }
 0x9d5   : > { %v2854_v59 = vrot.slane %v2840_v56, 4 }
 0x9d6   : > { %v10994_v53 = vpop.permute.xlu0 %9820 }
 0x9d7   : > { %v9822_v29 = vunpack.i.l.bf16 %v10994_v53 }
 0x9d9   : > { %v2856_v55 = vrot.slane %v9822_v29, 4  ;;  %v2855_v61 = vsel %vm1131_vm1, %v2854_v59, %v9822_v29 }
 0x9da   : > { %v2861_v2 = vperm.slane %v2855_v61, %v10544_v23 }
 0x9db   : > { %v2857_v57 = vsel %vm1131_vm1, %v2840_v56, %v2856_v55 }
 0x9dc   : > { %v2865_v46 = vperm.slane %v2857_v57, %v10544_v23  ;;  %v2866_v14 = vrot.slane %v2861_v2, 4 }
 0x9de   : > { %v2878_v62 = vrot.slane %v2865_v46, 4  ;;  %v2881_v1 = vsel %vm1131_vm1, %v2865_v46, %v2880_v60  ;;  %v11010_v12 = vpop.permute.xlu0 %9836 }
 0x9df   : > { %v2889_v6 = vperm.slane %v2881_v1, %v10552_v35 }
 0x9e0   : > { %v2879_v4 = vsel %vm1131_vm1, %v2878_v62, %v2853_v40 }
 0x9e1   : > { %v2885_v15 = vperm.slane %v2879_v4, %v10552_v35  ;;  %v2896_v16 = vrot.slane %v2889_v6, 4  ;;  %v2904_v5 = vpack.c.bf16 %v2889_v6, %v2889_v6 }
 0x9e3   : > { %v2894_v20 = vrot.slane %v2885_v15, 4  ;;  %v2897_v21 = vsel %vm1131_vm1, 0.0, %v2896_v16  ;;  %v2902_v34 = vpack.c.bf16 %v2885_v15, %v2885_v15  ;;  %v3208_v36 = vrot.slane %v2904_v5, 4 }
 0x9e4   : > { %v2905_v3 = vpack.c.bf16 %v2897_v21, %v2897_v21 }
 0x9e5   : > { %v2895_v25 = vsel %vm1131_vm1, 0.0, %v2894_v20  ;;  %v3202_v48 = vrot.slane %v2902_v34, 4 }
 0x9e6   : > { %v2903_v31 = vpack.c.bf16 %v2895_v25, %v2895_v25  ;;  %v3228_v32 = vrot.slane %v2905_v3, 4 }
 0x9e8   : > { %v3222_v43 = vrot.slane %v2903_v31, 4 }
 0x9f1   : > { %9831 = vrot.lane.b32.xlu1 %v10944_v19, %s12174_s18  ;;  %v2843_v19 = vsel %vm1131_vm1, %v2842_v41, %v10929_v26 }
 0x9f2   : > { %v2849_v0 = vperm.slane %v2843_v19, %v10544_v23 }
 0x9f4   : > { %v2868_v13 = vrot.slane %v2849_v0, 4  ;;  %v2867_v7 = vsel %vm1131_vm1, %v2866_v14, %v2849_v0 }
 0x9f5   : > { %v2873_v11 = vperm.slane %v2867_v7, %v10552_v35 }
 0x9f6   : > { %v2869_v26 = vsel %vm1131_vm1, %v2861_v2, %v2868_v13 }
 0x9f7   : > { %v2877_v63 = vperm.slane %v2869_v26, %v10552_v35  ;;  %v2890_v30 = vrot.slane %v2873_v11, 4  ;;  %v2898_v54 = vpack.c.bf16 %v2873_v11, %v2873_v11 }
 0x9f9   : > { %v2892_v24 = vrot.slane %v2877_v63, 4  ;;  %v2891_v28 = vsel %vm1131_vm1, 0.0, %v2890_v30  ;;  %v2900_v42 = vpack.c.bf16 %v2877_v63, %v2877_v63  ;;  %v3203_v41 = vsel %vm1131_vm1, %v3202_v48, %v2898_v54 }
 0x9fa   : > { %v2899_v27 = vpack.c.bf16 %v2891_v28, %v2891_v28  ;;  %v3207_v1 = vperm.slane %v3203_v41, %v10544_v23 }
 0x9fb   : > { %v2893_v8 = vsel %vm1131_vm1, 0.0, %v2892_v24  ;;  %v3209_v49 = vsel %vm1131_vm1, %v3208_v36, %v2900_v42 }
 0x9fc   : > { %v2901_v38 = vpack.c.bf16 %v2893_v8, %v2893_v8  ;;  %v3223_v52 = vsel %vm1131_vm1, %v3222_v43, %v2899_v27  ;;  %v3213_v56 = vperm.slane %v3209_v49, %v10544_v23  ;;  %v9838_v43 = vunpack.i.l.bf16 %v11010_v12 }
 0x9fd   : > { %v3227_v59 = vperm.slane %v3223_v52, %v10544_v23 }
 0x9fe   : > { %v3229_v47 = vsel %vm1131_vm1, %v3228_v32, %v2901_v38  ;;  %v3214_v2 = vrot.slane %v3213_v56, 4  ;;  %v3076_v56 = vrot.slane %v10927_v9, 4 }
 0x9ff   : > { %v3233_v44 = vperm.slane %v3229_v47, %v10544_v23 }
 0xa00   : > { %v3215_v16 = vsel %vm1131_vm1, %v3214_v2, %v3207_v1 }
 0xa01   : > { %v3234_v0 = vrot.slane %v3233_v44, 4  ;;  %v3219_v11 = vperm.slane %v3215_v16, %v10552_v35  ;;  %v9823_v44 = vunpack.i.h.bf16 %v10994_v53 }
 0xa03   : > { %v3235_v26 = vsel %vm1131_vm1, %v3234_v0, %v3227_v59  ;;  %v3220_v8 = vrot.slane %v3219_v11, 4  ;;  %v3074_v0 = vrot.slane %v9838_v43, 4 }
 0xa04   : > { %v3239_v20 = vperm.slane %v3235_v26, %v10552_v35 }
 0xa06   : > { %v3240_v5 = vrot.slane %v3239_v20, 4  ;;  %v3244_v49 = vpack.i.b16 %v3239_v20, %v3219_v11 }
 0xa08   : > { %v3241_v42 = vsel %vm1131_vm1, 0, %v3240_v5 }
 0xa09   : > { %v3252_v52 = vshrl.u32 %v3241_v42, 16 }
 0xa31   : > { %v9828_v37 = vpop.trf.xlu2 }
 0xa32   : > { %v3782_v29 = vrot.slane %v9828_v37, 4  ;;  %v3246_v37 = vshrl.u32 %v3239_v20, 16 }
 0xa39   : > { %v9829_v62 = vpop.trf.xlu2 }
 0xa3a   : > { %v9841_v22 = vpop.trf.xlu0  ;;  %v3802_v13 = vrot.slane %v9829_v62, 4 }
 0xa42   : > { %v9842_v10 = vpop.trf.xlu0 }
 0xa43   : > { %v9825_v39 = vpop.trf.xlu1 }
 0xa44   : > { %v3788_v45 = vrot.slane %v9825_v39, 4 }
 0xa46   : > { %v3789_v50 = vsel %vm1131_vm1, %v3788_v45, %v9841_v22 }
 0xa47   : > { %v3793_v55 = vperm.slane %v3789_v50, %v10544_v23  ;;  %v3245_v50 = vshrl.u32 %v3219_v11, 16 }
 0xa49   : > { %v3794_v19 = vrot.slane %v3793_v55, 4  ;;  %v3247_v41 = vpack.i.b16 %v3246_v37, %v3245_v50 }
 0xa4a   : > { %v9844_v57 = vpop.trf.xlu0 }
 0xa4b   : > { %v3783_v40 = vsel %vm1131_vm1, %v3782_v29, %v9844_v57  ;;  %v9826_v46 = vpop.trf.xlu1  ;;  %v3221_v29 = vsel %vm1131_vm1, 0, %v3220_v8 }
 0xa4c   : > { %v3787_v60 = vperm.slane %v3783_v40, %v10544_v23  ;;  %v3808_v61 = vrot.slane %v9826_v46, 4  ;;  %v3250_v46 = vpack.i.b16 %v3241_v42, %v3221_v29  ;;  %v3251_v59 = vshrl.u32 %v3221_v29, 16 }
 0xa4e   : > { %v3795_v4 = vsel %vm1131_vm1, %v3794_v19, %v3787_v60  ;;  %v3809_v6 = vsel %vm1131_vm1, %v3808_v61, %v9842_v10  ;;  %v9839_v10 = vunpack.i.h.bf16 %v11010_v12  ;;  %v3077_v19 = vsel %vm1131_vm1, %v9838_v43, %v3076_v56 }
 0xa4f   : > { %v3813_v14 = vperm.slane %v3809_v6, %v10544_v23  ;;  %v3799_v15 = vperm.slane %v3795_v4, %v10552_v35  ;;  %v3253_v53 = vpack.i.b16 %v3252_v52, %v3251_v59  ;;  %v3088_v60 = vrot.slane %v9823_v44, 4 }
 0xa50   : > { %v3130_v57 = vrot.slane %v9839_v10, 4  ;;  %v3085_v1 = vperm.slane %v3077_v19, %v10544_v23 }
 0xa51   : > { %v3814_v21 = vrot.slane %v3813_v14, 4  ;;  %v3800_v24 = vrot.slane %v3799_v15, 4  ;;  %v3825_v30 = vshrl.u32 %v3799_v15, 16 }
 0xa52   : > { %v9845_v7 = vpop.trf.xlu0  ;;  %v3131_v61 = vsel %vm1131_vm1, %v3130_v57, %v10938_v51 }
 0xa53   : > { %v3803_v63 = vsel %vm1131_vm1, %v3802_v13, %v9845_v7  ;;  %v3801_v34 = vsel %vm1131_vm1, 0, %v3800_v24  ;;  %v3137_v6 = vperm.slane %v3131_v61, %v10544_v23  ;;  %v3075_v7 = vsel %vm1131_vm1, %v3074_v0, %v10927_v9 }
 0xa54   : > { %v3807_v22 = vperm.slane %v3803_v63, %v10544_v23  ;;  %v3831_v47 = vshrl.u32 %v3801_v34, 16  ;;  %v3112_v63 = vrot.slane %v3085_v1, 4 }
 0xa56   : > { %v3815_v25 = vsel %vm1131_vm1, %v3814_v21, %v3807_v22 }
 0xa57   : > { %v3819_v3 = vperm.slane %v3815_v25, %v10552_v35  ;;  %v3156_v25 = vrot.slane %v3137_v6, 4 }
 0xa59   : > { %v3824_v31 = vpack.i.b16 %v3819_v3, %v3799_v15  ;;  %v3826_v32 = vshrl.u32 %v3819_v3, 16  ;;  %v3820_v36 = vrot.slane %v3819_v3, 4  ;;  %v3144_v15 = vrot.slane %v11016_v18, 4 }
 0xa5b   : > { %v3838_v28 = vsel %vm1796_vm2, %v3824_v31, 0  ;;  %v3827_v38 = vpack.i.b16 %v3826_v32, %v3825_v30  ;;  %v3821_v39 = vsel %vm1131_vm1, 0, %v3820_v36  ;;  %v3081_v30 = vperm.slane %v3075_v7, %v10544_v23 }
 0xa5c   : > { %3847 = vmatpush.bf16.msrb.mxu2 %v3838_v28  ;;  %v3830_v45 = vpack.i.b16 %v3821_v39, %v3801_v34  ;;  %v3832_v27 = vshrl.u32 %v3821_v39, 16  ;;  %v3132_v34 = vrot.slane %v10938_v51, 4 }
 0xa5d   : > { %v3857_v48 = vsel %vm1796_vm2, %v3827_v38, 0 }
 0xa5e   : > { %3866 = vmatpush.bf16.msra.mxu3 %v3857_v48  ;;  %v3876_v54 = vsel %vm1796_vm2, %v3830_v45, 0  ;;  %v3833_v55 = vpack.i.b16 %v3832_v27, %v3831_v47  ;;  %v3133_v42 = vsel %vm1131_vm1, %v9839_v10, %v3132_v34  ;;  %v3100_v48 = vrot.slane %v3081_v30, 4 }
 0xa5f   : > { %9355 = vmatmul.msk.bf16.vlgmr.msrb.gmra.mxu2 %vm1792_vm3, %v3244_v49  ;;  %3885 = vmatpush.bf16.msra.mxu0 %v3876_v54  ;;  %v3141_v54 = vperm.slane %v3133_v42, %v10544_v23 }
 0xa60   : > { %v3895_v40 = vsel %vm1796_vm2, %v3833_v55, 0 }
 0xa61   : > { %9356 = vmatmul.msk.bf16.vlgmr.msra.gmra.mxu3 %vm1792_vm3, %v3247_v41  ;;  %3904 = vmatpush.bf16.msra.mxu1 %v3895_v40 }
 0xa62   : > { %9357 = vmatmul.msk.bf16.vlgmr.msra.gmra.mxu0 %vm1792_vm3, %v3250_v46 }
 0xa63   : > { %v9832_v62 = vpop.permute.xlu1 %9831 }
 0xa64   : > { %v9834_v2 = vunpack.i.h.bf16 %v9832_v62  ;;  %v9833_v4 = vunpack.i.l.bf16 %v9832_v62  ;;  %9358 = vmatmul.msk.bf16.vlgmr.msra.gmra.mxu1 %vm1792_vm3, %v3253_v53 }
 0xa66   : > { %v3142_v13 = vrot.slane %v9834_v2, 4  ;;  %v3086_v14 = vrot.slane %v9833_v4, 4  ;;  %v3089_v26 = vsel %vm1131_vm1, %v9833_v4, %v3088_v60  ;;  %v3145_v3 = vsel %vm1131_vm1, %v9834_v2, %v3144_v15 }
 0xa67   : > { %v3097_v16 = vperm.slane %v3089_v26, %v10544_v23  ;;  %v11089_v36 = vperm.slane %v3145_v3, %v10544_v23 }
 0xa68   : > { %v3087_v20 = vsel %vm1131_vm1, %v3086_v14, %v9823_v44  ;;  %v3143_v21 = vsel %vm1131_vm1, %v3142_v13, %v11016_v18 }
 0xa69   : > { %v3093_v22 = vperm.slane %v3087_v20, %v10544_v23  ;;  %v3110_v11 = vrot.slane %v3097_v16, 4  ;;  %v3149_v24 = vperm.slane %v3143_v21, %v10544_v23  ;;  %v3113_v5 = vsel %vm1131_vm1, %v3097_v16, %v3112_v63  ;;  %v1010_v63 = vld [vmem:[%s12181_s2] sm:$0xff]  ;;  %s12183_s2 = sld [smem:[#allocation14_spill]] }
 0xa6a   : > { %v3121_v9 = vperm.slane %v3113_v5, %v10552_v35  ;;  %v3166_v49 = vrot.slane %v11089_v36, 4 }
 0xa6b   : > { %v3111_v8 = vsel %vm1131_vm1, %v3110_v11, %v3085_v1  ;;  %v3098_v31 = vrot.slane %v3093_v22, 4  ;;  %v3157_v18 = vsel %vm1131_vm1, %v3149_v24, %v3156_v25  ;;  %v3154_v12 = vrot.slane %v3149_v24, 4 }
 0xa6c   : > { %v3117_v32 = vperm.slane %v3111_v8, %v10552_v35  ;;  %v3128_v37 = vrot.slane %v3121_v9, 4  ;;  %v3192_v45 = vpack.c.bf16 %v3121_v9, %v3121_v9  ;;  %v3101_v44 = vsel %vm1131_vm1, %v3093_v22, %v3100_v48 }
 0xa6d   : > { %v3099_v28 = vsel %vm1131_vm1, %v3098_v31, %v3081_v30  ;;  %v3155_v56 = vsel %vm1131_vm1, %v3154_v12, %v3137_v6  ;;  %v3167_v57 = vsel %vm1131_vm1, %v3166_v49, %v3141_v54  ;;  %v3109_v41 = vperm.slane %v3101_v44, %v10552_v35 }
 0xa6e   : > { %v3126_v38 = vrot.slane %v3117_v32, 4  ;;  %v3105_v39 = vperm.slane %v3099_v28, %v10552_v35  ;;  %v3129_v43 = vsel %vm1131_vm1, 0.0, %v3128_v37  ;;  %v3190_v50 = vpack.c.bf16 %v3117_v32, %v3117_v32 }
 0xa6f   : > { %v3193_v47 = vpack.c.bf16 %v3129_v43, %v3129_v43  ;;  %v3173_v40 = vperm.slane %v3167_v57, %v10552_v35  ;;  %v3124_v46 = vrot.slane %v3109_v41, 4  ;;  %v3188_v60 = vpack.c.bf16 %v3109_v41, %v3109_v41  ;;  %s12184_s22 = smov %s12183_s2 }
 0xa70   : > { %v3127_v27 = vsel %vm1131_vm1, 0.0, %v3126_v38  ;;  %v3122_v51 = vrot.slane %v3105_v39, 4  ;;  %v3186_v10 = vpack.c.bf16 %v3105_v39, %v3105_v39  ;;  %v3165_v1 = vperm.slane %v3157_v18, %v10552_v35 }
 0xa71   : > { %v3191_v29 = vpack.c.bf16 %v3127_v27, %v3127_v27  ;;  %9852 = vxpose.binary.xlu0.c.b16.start.end [1/2] (short) (narrow) %v3193_v47, %v3192_v45, 16  ;;  %v3182_v59 = vrot.slane %v3173_v40, 4  ;;  %v3125_v19 = vsel %vm1131_vm1, 0.0, %v3124_v46  ;;  %v3198_v62 = vpack.c.bf16 %v3173_v40, %v3173_v40 }
 0xa72   : > { %v3123_v55 = vsel %vm1131_vm1, 0.0, %v3122_v51  ;;  %v3189_v61 = vpack.c.bf16 %v3125_v19, %v3125_v19  ;;  %v3161_v2 = vperm.slane %v3155_v56, %v10552_v35  ;;  %v3180_v4 = vrot.slane %v3165_v1, 4 }
 0xa73   : > { %9846 = vxpose.binary.xlu1.c.b16.start.end [1/2] (short) (narrow) %v3191_v29, %v3190_v50, 16  ;;  %v3187_v52 = vpack.c.bf16 %v3123_v55, %v3123_v55  ;;  %v3183_v53 = vsel %vm1131_vm1, 0.0, %v3182_v59  ;;  %v3196_v26 = vpack.c.bf16 %v3165_v1, %v3165_v1  ;;  %v3168_v18 = vrot.slane %v3141_v54, 4 }
 0xa74   : > { %v3199_v0 = vpack.c.bf16 %v3183_v53, %v3183_v53  ;;  %v3178_v6 = vrot.slane %v3161_v2, 4  ;;  %v3181_v13 = vsel %vm1131_vm1, 0.0, %v3180_v4  ;;  %v3194_v16 = vpack.c.bf16 %v3161_v2, %v3161_v2 }
 0xa75   : > { %9849 = vxpose.binary.xlu2.c.b16.start.end [1/2] (short) (narrow) %v3187_v52, %v3186_v10, 16  ;;  %v3197_v15 = vpack.c.bf16 %v3181_v13, %v3181_v13  ;;  %v3169_v37 = vsel %vm1131_vm1, %v11089_v36, %v3168_v18 }
 0xa76   : > { %v3179_v14 = vsel %vm1131_vm1, 0.0, %v3178_v6  ;;  %v3177_v28 = vperm.slane %v3169_v37, %v10552_v35 }
 0xa77   : > { %v3195_v7 = vpack.c.bf16 %v3179_v14, %v3179_v14 }
 0xa78   : > { %v3184_v39 = vrot.slane %v3177_v28, 4  ;;  %v3200_v45 = vpack.c.bf16 %v3177_v28, %v3177_v28 }
 0xa7a   : > { %v3185_v43 = vsel %vm1131_vm1, 0.0, %v3184_v39 }
 0xa7b   : > { %v3201_v47 = vpack.c.bf16 %v3185_v43, %v3185_v43 }
 0xa83   : > { %9858 = vxpose.binary.xlu1.c.b16.start.end [1/2] (short) (narrow) %v3189_v61, %v3188_v60, 16 }
 0xa85   : > { %9855 = vxpose.binary.xlu2.c.b16.start.end [1/2] (short) (narrow) %v3199_v0, %v3198_v62, 16 }
 0xa93   : > { %9867 = vxpose.binary.xlu1.c.b16.start.end [1/2] (short) (narrow) %v3197_v15, %v3196_v26, 16 }
 0xa95   : > { %9861 = vxpose.binary.xlu2.c.b16.start.end [1/2] (short) (narrow) %v3195_v7, %v3194_v16, 16 }
 0xadf   : > { %v3887_v20 = vpop.f32.mrf.mxu0 }
 0xae0   : > { %v3888_v21 = vadd.f32 %v3887_v20, %v1010_v63 }
 0xae1   : > { %v3906_v22 = vpop.f32.mrf.mxu1 }
 0xae2   : > { %v3849_v11 = vpop.f32.mrf.mxu2  ;;  %v3916_v24 = vsel %vm2641_vm4, %v3888_v21, -inf  ;;  %v3907_v32 = vadd.f32 %v3906_v22, %v1010_v63 }
 0xae3   : > { %3917 = vmax.xlane.f32.xlu0 %v3916_v24  ;;  %v11114_v8 = vadd.f32 %v3849_v11, %v1010_v63 }
 0xae4   : > { %v3868_v25 = vpop.f32.mrf.mxu3  ;;  %v3919_v34 = vsel %vm2641_vm4, %v3907_v32, -inf }
 0xae5   : > { %v3910_v31 = vsel %vm2641_vm4, %v11114_v8, -inf  ;;  %v3869_v38 = vadd.f32 %v3868_v25, %v1010_v63 }
 0xae7   : > { %v3889_v3 = vpop.f32.mrf.mxu0  ;;  %v3913_v42 = vsel %vm2641_vm4, %v3869_v38, -inf }
 0xae9   : > { %v3908_v5 = vpop.f32.mrf.mxu1 }
 0xaea   : > { %v3851_v30 = vpop.f32.mrf.mxu2 }
 0xaec   : > { %v3870_v9 = vpop.f32.mrf.mxu3 }
 0xaf3   : > { %3911 = vmax.xlane.f32.xlu1 %v3910_v31 }
 0xafb   : > { %3920 = vmax.xlane.f32.xlu1 %v3919_v34 }
 0xb06   : > { %3914 = vmax.xlane.f32.xlu2 %v3913_v42 }
 0xb0c   : > { %9864 = vxpose.binary.xlu0.c.b16.start.end [1/2] (short) (narrow) %v3201_v47, %v3200_v45, 16 }
 0xb16   : > { %v9850_v48 = vpop.trf.xlu2 }
 0xb1d   : > { %v9853_v50 = vpop.trf.xlu0 }
 0xb1e   : > { %v9851_v29 = vpop.trf.xlu2  ;;  %v4220_v15 = vrot.slane %v9853_v50, 4 }
 0xb1f   : > { %v9847_v27 = vpop.trf.xlu1 }
 0xb20   : > { %v4214_v14 = vrot.slane %v9847_v27, 4 }
 0xb22   : > { %v4215_v26 = vsel %vm1131_vm1, %v4214_v14, %v9850_v48 }
 0xb23   : > { %v4219_v16 = vperm.slane %v4215_v26, %v10544_v23 }
 0xb25   : > { %v9854_v36 = vpop.trf.xlu0  ;;  %v4240_v22 = vrot.slane %v4219_v16, 4 }
 0xb26   : > { %v9856_v55 = vpop.trf.xlu2  ;;  %v4276_v20 = vrot.slane %v9854_v36, 4 }
 0xb27   : > { %v9848_v51 = vpop.trf.xlu1  ;;  %v4226_v63 = vrot.slane %v9856_v55, 4 }
 0xb28   : > { %v4270_v7 = vrot.slane %v9848_v51, 4 }
 0xb2a   : > { %v4271_v11 = vsel %vm1131_vm1, %v4270_v7, %v9851_v29 }
 0xb2b   : > { %v4275_v30 = vperm.slane %v4271_v11, %v10544_v23 }
 0xb2d   : > { %v4296_v39 = vrot.slane %v4275_v30, 4 }
 0xb2e   : > { %v9857_v56 = vpop.trf.xlu2 }
 0xb2f   : > { %v9859_v49 = vpop.trf.xlu1  ;;  %v4282_v18 = vrot.slane %v9857_v56, 4 }
 0xb36   : > { %v9862_v46 = vpop.trf.xlu2 }
 0xb37   : > { %v9860_v54 = vpop.trf.xlu1  ;;  %v4227_v24 = vsel %vm1131_vm1, %v4226_v63, %v9862_v46 }
 0xb38   : > { %v4277_v3 = vsel %vm1131_vm1, %v4276_v20, %v9860_v54  ;;  %v4231_v9 = vperm.slane %v4227_v24, %v10544_v23 }
 0xb3a   : > { %v4252_v42 = vrot.slane %v4231_v9, 4 }
 0xb3e   : > { %v9863_v60 = vpop.trf.xlu2 }
 0xb3f   : > { %v9868_v12 = vpop.trf.xlu1  ;;  %v4283_v47 = vsel %vm1131_vm1, %v4282_v18, %v9863_v60 }
 0xb40   : > { %v4287_v54 = vperm.slane %v4283_v47, %v10544_v23 }
 0xb47   : > { %v11124_v57 = vpop.trf.xlu1 }
 0xb56   : > { %v3918_v10 = vpop.xlane.xlu0 %3917 }
 0xb57   : > { %v3924_v52 = vsub.f32 %v3888_v21, %v3918_v10  ;;  %v4221_v21 = vsel %vm1131_vm1, %v4220_v15, %v9859_v49 }
 0xb58   : > { %v4225_v25 = vperm.slane %v4221_v21, %v10544_v23 }
 0xb59   : > { %v3930_v44 = vmul.f32 1.442695, %v3924_v52 }
 0xb5a   : > { %v4241_v5 = vsel %vm1131_vm1, %v4225_v25, %v4240_v22 }
 0xb5b   : > { %10132 = vpow2.f32 %v3930_v44  ;;  %v4249_v37 = vperm.slane %v4241_v5, %v10552_v35 }
 0xb5d   : > { %v4268_v48 = vrot.slane %v4249_v37, 4 }
 0xb61   : > { %v11126_v41 = vpop.eup %10132 }
 0xb62   : > { %v3940_v40 = vsel %vm2641_vm4, %v11126_v41, 0.0 }
 0xb63   : > { %3941 = vadd.xlane.f32.xlu1 %v3940_v40 }
 0xb66   : > { %v11130_v59 = vpop.xlane.xlu1 %3911 }
 0xb6e   : > { %v3921_v19 = vpop.xlane.xlu1 %3920 }
 0xb6f   : > { %v3925_v53 = vsub.f32 %v3907_v32, %v3921_v19  ;;  %v4281_v32 = vperm.slane %v4277_v3, %v10544_v23 }
 0xb71   : > { %v3932_v61 = vmul.f32 1.442695, %v3925_v53  ;;  %v4294_v45 = vrot.slane %v4281_v32, 4  ;;  %v4297_v29 = vsel %vm1131_vm1, %v4281_v32, %v4296_v39 }
 0xb72   : > { %v4305_v56 = vperm.slane %v4297_v29, %v10552_v35 }
 0xb73   : > { %10134 = vpow2.f32 %v3932_v61  ;;  %v4308_v61 = vrot.slane %v4287_v54, 4 }
 0xb79   : > { %v11132_v62 = vpop.eup %10134  ;;  %v3915_v0 = vpop.xlane.xlu2 %3914 }
 0xb7a   : > { %v3923_v1 = vsub.f32 %v3869_v38, %v3915_v0  ;;  %v3943_v2 = vsel %vm2641_vm4, %v11132_v62, 0.0  ;;  %v4238_v38 = vrot.slane %v4225_v25, 4 }
 0xb7b   : > { %3944 = vadd.xlane.f32.xlu1 %v3943_v2 }
 0xb7c   : > { %v3928_v4 = vmul.f32 1.442695, %v3923_v1  ;;  %v4239_v50 = vsel %vm1131_vm1, %v4238_v38, %v4219_v16 }
 0xb7d   : > { %v4245_v53 = vperm.slane %v4239_v50, %v10552_v35 }
 0xb7e   : > { %10136 = vpow2.f32 %v3928_v4  ;;  %v4324_v4 = vrot.slane %v4305_v56, 4 }
 0xb7f   : > { %v4264_v26 = vrot.slane %v4245_v53, 4 }
 0xb84   : > { %v11136_v6 = vpop.eup %10136 }
 0xb85   : > { %v3937_v13 = vsel %vm2641_vm4, %v11136_v6, 0.0 }
 0xb86   : > { %3938 = vadd.xlane.f32.xlu0 %v3937_v13 }
 0xbb8   : > { %v9865_v31 = vpop.trf.xlu0 }
 0xbb9   : > { %v4232_v34 = vrot.slane %v9865_v31, 4 }
 0xbbb   : > { %v4233_v28 = vsel %vm1131_vm1, %v4232_v34, %v9868_v12  ;;  %v4295_v12 = vsel %vm1131_vm1, %v4294_v45, %v4275_v30 }
 0xbbc   : > { %v4237_v43 = vperm.slane %v4233_v28, %v10544_v23  ;;  %v4301_v60 = vperm.slane %v4295_v12, %v10552_v35 }
 0xbbe   : > { %v4250_v27 = vrot.slane %v4237_v43, 4  ;;  %v4253_v51 = vsel %vm1131_vm1, %v4237_v43, %v4252_v42 }
 0xbbf   : > { %v4261_v49 = vperm.slane %v4253_v51, %v10552_v35 }
 0xbc0   : > { %v4251_v36 = vsel %vm1131_vm1, %v4250_v27, %v4231_v9  ;;  %v9866_v55 = vpop.trf.xlu0 }
 0xbc1   : > { %v4288_v10 = vrot.slane %v9866_v55, 4  ;;  %v4269_v52 = vsel %vm1131_vm1, %v4261_v49, %v4268_v48  ;;  %v4266_v44 = vrot.slane %v4261_v49, 4  ;;  %v4257_v19 = vperm.slane %v4251_v36, %v10552_v35 }
 0xbc2   : > { %v4354_v7 = vshrl.u32 %v4269_v52, 16 }
 0xbc3   : > { %v4289_v40 = vsel %vm1131_vm1, %v4288_v10, %v11124_v57  ;;  %v4267_v46 = vsel %vm1131_vm1, %v4266_v44, %v4249_v37  ;;  %v4262_v14 = vrot.slane %v4257_v19, 4  ;;  %v4320_v57 = vrot.slane %v4301_v60, 4 }
 0xbc4   : > { %v4293_v0 = vperm.slane %v4289_v40, %v10544_v23  ;;  %v4346_v11 = vshrl.u32 %v4267_v46, 16  ;;  %v4265_v24 = vsel %vm1131_vm1, %v4257_v19, %v4264_v26  ;;  %v3922_v40 = vsub.f32 %v11114_v8, %v11130_v59 }
 0xbc5   : > { %v4263_v5 = vsel %vm1131_vm1, %v4262_v14, %v4245_v53  ;;  %v4338_v34 = vshrl.u32 %v4265_v24, 16 }
 0xbc6   : > { %v4306_v1 = vrot.slane %v4293_v0, 4  ;;  %v4309_v2 = vsel %vm1131_vm1, %v4293_v0, %v4308_v61  ;;  %v4330_v42 = vshrl.u32 %v4263_v5, 16 }
 0xbc7   : > { %v4317_v13 = vperm.slane %v4309_v2, %v10552_v35 }
 0xbc8   : > { %v4307_v15 = vsel %vm1131_vm1, %v4306_v1, %v4287_v54 }
 0xbc9   : > { %v4325_v16 = vsel %vm1131_vm1, %v4317_v13, %v4324_v4  ;;  %v4322_v63 = vrot.slane %v4317_v13, 4  ;;  %v4313_v20 = vperm.slane %v4307_v15, %v10552_v35 }
 0xbca   : > { %v4352_v21 = vpack.i.b16 %v4325_v16, %v4269_v52  ;;  %v4355_v22 = vshrl.u32 %v4325_v16, 16 }
 0xbcb   : > { %v4323_v25 = vsel %vm1131_vm1, %v4322_v63, %v4305_v56  ;;  %v4321_v3 = vsel %vm1131_vm1, %v4313_v20, %v4320_v57  ;;  %v4318_v30 = vrot.slane %v4313_v20, 4 }
 0xbcc   : > { %v4356_v9 = vpack.i.b16 %v4355_v22, %v4354_v7  ;;  %v4344_v31 = vpack.i.b16 %v4323_v25, %v4267_v46  ;;  %v4347_v32 = vshrl.u32 %v4323_v25, 16  ;;  %v4336_v18 = vpack.i.b16 %v4321_v3, %v4265_v24 }
 0xbcd   : > { %v4339_v37 = vshrl.u32 %v4321_v3, 16  ;;  %v4319_v28 = vsel %vm1131_vm1, %v4318_v30, %v4301_v60  ;;  %v3926_v46 = vmul.f32 1.442695, %v3922_v40 }
 0xbce   : > { %9870 = vxpose.binary.xlu2.c.b16.start.end [1/2] (short) (narrow) %v4356_v9, %v4352_v21, 16  ;;  %v4348_v38 = vpack.i.b16 %v4347_v32, %v4346_v11  ;;  %v4328_v39 = vpack.i.b16 %v4319_v28, %v4263_v5  ;;  %v4331_v43 = vshrl.u32 %v4319_v28, 16 }
 0xbcf   : > { %v4340_v45 = vpack.i.b16 %v4339_v37, %v4338_v34 }
 0xbd0   : > { %9876 = vxpose.binary.xlu1.c.b16.start.end [1/2] (short) (narrow) %v4348_v38, %v4344_v31, 16  ;;  %v4332_v47 = vpack.i.b16 %v4331_v43, %v4330_v42 }
 0xbd1   : > { %9873 = vxpose.binary.xlu0.c.b16.start.end [1/2] (short) (narrow) %v4340_v45, %v4336_v18, 16 }
 0xbd6   : > { %v3942_v27 = vpop.xlane.xlu1 %3941 }
 0xbd7   : > { %10138 = vrcp.f32 %v3942_v27 }
 0xbdd   : > { %v10139_v51 = vpop.eup %10138 }
 0xbde   : > { %v3952_v48 = vmul.f32 %v10139_v51, %v11126_v41 }
 0xbe0   : > { %v3956_v49 = vpack.c.bf16 %v3952_v48, %v3952_v48 }
 0xbe2   : > { %v4580_v50 = vsel %vm2641_vm4, %v3956_v49, 0 }
 0xbe3   : > { %4589 = vmatpush.bf16.xpose.msrb.mxu0 %v4580_v50 }
 0xbee   : > { %v3945_v29 = vpop.xlane.xlu1 %3944 }
 0xbef   : > { %10140 = vrcp.f32 %v3945_v29 }
 0xbf5   : > { %v10141_v54 = vpop.eup %10140 }
 0xbf6   : > { %v3953_v36 = vmul.f32 %v10141_v54, %v11132_v62 }
 0xbf8   : > { %v3957_v55 = vpack.c.bf16 %v3953_v36, %v3953_v36 }
 0xbf9   : > { %v3939_v12 = vpop.xlane.xlu0 %3938 }
 0xbfa   : > { %10142 = vrcp.f32 %v3939_v12  ;;  %v4599_v10 = vsel %vm2641_vm4, %v3957_v55, 0 }
 0xbfb   : > { %4608 = vmatpush.bf16.xpose.msrb.mxu1 %v4599_v10  ;;  %10144 = vpow2.f32 %v3926_v46 }
 0xc00   : > { %v10143_v52 = vpop.eup %10142 }
 0xc01   : > { %v3951_v44 = vmul.f32 %v10143_v52, %v11136_v6  ;;  %v10145_v19 = vpop.eup %10144 }
 0xc02   : > { %v3934_v62 = vsel %vm2641_vm4, %v10145_v19, 0.0 }
 0xc03   : > { %v3955_v56 = vpack.c.bf16 %v3951_v44, %v3951_v44 }
 0xc05   : > { %v4561_v41 = vsel %vm2641_vm4, %v3955_v56, 0 }
 0xc06   : > { %4570 = vmatpush.bf16.xpose.msrb.mxu3 %v4561_v41 }
 0xc3f   : > { %3935 = vadd.xlane.f32.xlu2 %v3934_v62 }
 0xc68   : > { %9879 = vxpose.binary.xlu2.c.b16.start.end [1/2] (short) (narrow) %v4332_v47, %v4328_v39, 16 }
 0xc6f   : > { %v9871_v53 = vpop.trf.xlu2 }
 0xc70   : > { %v4492_v13 = vrot.slane %v9871_v53, 4 }
 0xc77   : > { %v9872_v60 = vpop.trf.xlu2 }
 0xc78   : > { %v4512_v57 = vrot.slane %v9872_v60, 4 }
 0xc7c   : > { %v9877_v8 = vpop.trf.xlu1 }
 0xc7d   : > { %v9874_v4 = vpop.trf.xlu0  ;;  %v4486_v14 = vrot.slane %v9877_v8, 4 }
 0xc7e   : > { %v4493_v59 = vsel %vm1131_vm1, %v4492_v13, %v9874_v4 }
 0xc7f   : > { %v4497_v26 = vperm.slane %v4493_v59, %v10544_v23 }
 0xc81   : > { %v4498_v63 = vrot.slane %v4497_v26, 4 }
 0xc84   : > { %v9878_v21 = vpop.trf.xlu1 }
 0xc85   : > { %v9875_v15 = vpop.trf.xlu0  ;;  %v4506_v24 = vrot.slane %v9878_v21, 4 }
 0xc86   : > { %v4513_v22 = vsel %vm1131_vm1, %v4512_v57, %v9875_v15 }
 0xc87   : > { %v4517_v25 = vperm.slane %v4513_v22, %v10544_v23 }
 0xc89   : > { %v4518_v9 = vrot.slane %v4517_v25, 4 }
 0xcb2   : > { %v3936_v61 = vpop.xlane.xlu2 %3935 }
 0xcb3   : > { %10146 = vrcp.f32 %v3936_v61 }
 0xcb9   : > { %v10147_v0 = vpop.eup %10146 }
 0xcba   : > { %v3950_v6 = vmul.f32 %v10147_v0, %v10145_v19 }
 0xcbc   : > { %v3954_v1 = vpack.c.bf16 %v3950_v6, %v3950_v6 }
 0xcbe   : > { %v4542_v2 = vsel %vm2641_vm4, %v3954_v1, 0 }
 0xcbf   : > { %4551 = vmatpush.bf16.xpose.msra.mxu2 %v4542_v2 }
 0xd09   : > { %v9880_v16 = vpop.trf.xlu2 }
 0xd0a   : > { %v4487_v7 = vsel %vm1131_vm1, %v4486_v14, %v9880_v16 }
 0xd0b   : > { %v4491_v20 = vperm.slane %v4487_v7, %v10544_v23 }
 0xd0d   : > { %v4499_v11 = vsel %vm1131_vm1, %v4498_v63, %v4491_v20 }
 0xd0e   : > { %v4503_v3 = vperm.slane %v4499_v11, %v10552_v35 }
 0xd10   : > { %v4504_v32 = vrot.slane %v4503_v3, 4  ;;  %v4529_v37 = vshrl.u32 %v4503_v3, 16 }
 0xd11   : > { %v9881_v5 = vpop.trf.xlu2 }
 0xd12   : > { %v4507_v30 = vsel %vm1131_vm1, %v4506_v24, %v9881_v5  ;;  %v4505_v42 = vsel %vm1131_vm1, 0, %v4504_v32 }
 0xd13   : > { %v4511_v31 = vperm.slane %v4507_v30, %v10544_v23  ;;  %v4535_v27 = vshrl.u32 %v4505_v42, 16 }
 0xd15   : > { %v4519_v18 = vsel %vm1131_vm1, %v4518_v9, %v4511_v31 }
 0xd16   : > { %v4523_v34 = vperm.slane %v4519_v18, %v10552_v35 }
 0xd18   : > { %v4524_v28 = vrot.slane %v4523_v34, 4  ;;  %v4530_v38 = vshrl.u32 %v4523_v34, 16  ;;  %v4528_v39 = vpack.i.b16 %v4523_v34, %v4503_v3 }
 0xd1a   : > { %9359 = vmatmul.msk.bf16.vlgmr.msra.gmra.mxu2 %vm2641_vm4, %v4528_v39  ;;  %v4531_v43 = vpack.i.b16 %v4530_v38, %v4529_v37  ;;  %v4525_v45 = vsel %vm1131_vm1, 0, %v4524_v28 }
 0xd1b   : > { %v4534_v47 = vpack.i.b16 %v4525_v45, %v4505_v42  ;;  %v4536_v51 = vshrl.u32 %v4525_v45, 16 }
 0xd1c   : > { %9360 = vmatmul.msk.bf16.vlgmr.msrb.gmra.mxu3 %vm2641_vm4, %v4531_v43 }
 0xd1d   : > { %9361 = vmatmul.msk.bf16.vlgmr.msrb.gmra.mxu0 %vm2641_vm4, %v4534_v47  ;;  %v4537_v48 = vpack.i.b16 %v4536_v51, %v4535_v27 }
 0xd1f   : > { %9362 = vmatmul.msk.bf16.vlgmr.msrb.gmra.mxu1 %vm2641_vm4, %v4537_v48 }
 0xd9a   : > { %v4591_v49 = vpop.f32.mrf.mxu0 }
 0xd9c   : > { %v4610_v50 = vpop.f32.mrf.mxu1 }
 0xd9d   : > { %v4553_v29 = vpop.f32.mrf.mxu2 }
 0xd9e   : > { %v9882_v54 = vpack.i.bf16 %v4553_v29, %v4591_v49 }
 0xd9f   : > { %v4572_v36 = vpop.f32.mrf.mxu3 }
 0xda0   : > { %v9889_v55 = vpack.i.bf16 %v4572_v36, %v4610_v50  ;;  %9883 = vxpose.xlu0.b32.start.end [1/1] (short) (narrow) %v9882_v54, 8 }
 0xda2   : > { %9890 = vxpose.xlu2.b32.start.end [1/1] (short) (narrow) %v9889_v55, 8  ;;  %v4593_v12 = vpop.f32.mrf.mxu0 }
 0xda4   : > { %v4612_v10 = vpop.f32.mrf.mxu1 }
 0xda5   : > { %v4555_v52 = vpop.f32.mrf.mxu2 }
 0xda7   : > { %v4574_v44 = vpop.f32.mrf.mxu3 }
 0xe3b   : > { %v9891_v56 = vpop.trf.xlu2 }
 0xe3c   : > { %v9895_v41 = vunpack.i.h.bf16 %v9891_v56  ;;  %v9892_v40 = vunpack.i.l.bf16 %v9891_v56 }
 0xe3e   : > { %v4756_v46 = vrot.slane %v9895_v41, 4  ;;  %v4754_v19 = vrot.slane %v9892_v40, 4 }
 0xe40   : > { %v4755_v62 = vsel %vm1131_vm1, %v4754_v19, %v9895_v41  ;;  %v4757_v53 = vsel %vm1131_vm1, %v9892_v40, %v4756_v46 }
 0xe41   : > { %v4761_v60 = vperm.slane %v4755_v62, %v10544_v23  ;;  %v4765_v61 = vperm.slane %v4757_v53, %v10544_v23 }
 0xe43   : > { %v4766_v13 = vrot.slane %v4761_v60, 4  ;;  %v4778_v8 = vrot.slane %v4765_v61, 4 }
 0xe44   : > { %v9884_v0 = vpop.trf.xlu0 }
 0xe45   : > { %v9888_v6 = vunpack.i.h.bf16 %v9884_v0  ;;  %v9885_v1 = vunpack.i.l.bf16 %v9884_v0  ;;  %v9600_v0 = vld [vmem:[%s12183_s2 + $0x8] sm:$0xff]  ;;  %s12190_s2 = sld [smem:[#allocation24_spill]] }
 0xe46   : > { %4892 = vmatpush.bf16.msrb.mxu2 %v9600_v0  ;;  %v9612_v0 = vld [vmem:[%s12157_s8 + $0x18] sm:$0xff] }
 0xe47   : > { %v4744_v2 = vrot.slane %v9888_v6, 4  ;;  %v4742_v4 = vrot.slane %v9885_v1, 4 }
 0xe49   : > { %v4743_v59 = vsel %vm1131_vm1, %v4742_v4, %v9888_v6  ;;  %v4745_v14 = vsel %vm1131_vm1, %v9885_v1, %v4744_v2  ;;  %v9599_v6 = vld [vmem:[%s12184_s22] sm:$0xff]  ;;  %s12194_s22 = sld [smem:[#allocation19_spill]] }
 0xe4a   : > { %v4749_v26 = vperm.slane %v4743_v59, %v10544_v23  ;;  %v4753_v57 = vperm.slane %v4745_v14, %v10544_v23  ;;  %4893 = vmatpush.bf16.msrb.mxu2 %v9599_v6  ;;  %v9607_v6 = vld [vmem:[%s10326_s21 + $0x10] sm:$0xff] }
 0xe4b   : > { %s12191_s17 = smov %s12190_s2 }
 0xe4c   : > { %v4767_v15 = vsel %vm1131_vm1, %v4766_v13, %v4749_v26  ;;  %v4768_v16 = vrot.slane %v4749_v26, 4  ;;  %v4779_v7 = vsel %vm1131_vm1, %v4778_v8, %v4753_v57  ;;  %v4780_v63 = vrot.slane %v4753_v57, 4  ;;  %v10088_v26 = vld [vmem:[%s12187_s6] ss:$0 sm:$0xff]  ;;  %s12193_s6 = smov %s12192_s1 }
 0xe4d   : > { %v4773_v20 = vperm.slane %v4767_v15, %v10552_v35  ;;  %v4785_v21 = vperm.slane %v4779_v7, %v10552_v35 }
 0xe4e   : > { %v4769_v22 = vsel %vm1131_vm1, %v4761_v60, %v4768_v16  ;;  %v4781_v11 = vsel %vm1131_vm1, %v4765_v61, %v4780_v63 }
 0xe4f   : > { %v4777_v24 = vperm.slane %v4769_v22, %v10552_v35  ;;  %v4789_v25 = vperm.slane %v4781_v11, %v10552_v35  ;;  %v4790_v3 = vrot.slane %v4773_v20, 4  ;;  %v4794_v30 = vrot.slane %v4785_v21, 4  ;;  %v9602_v22 = vld [vmem:[%s12189_s0 + $0x8] sm:$0xff]  ;;  %v9601_v11 = vld [vmem:[%s12189_s0] sm:$0xff]  ;;  %s12195_s0 = sld [smem:[#allocation23_spill]] }
 0xe50   : > { %4964 = vmatpush.bf16.msra.mxu3 %v9602_v22 }
 0xe51   : > { %v4792_v5 = vrot.slane %v4777_v24, 4  ;;  %v4796_v9 = vrot.slane %v4789_v25, 4  ;;  %v4791_v42 = vsel %vm1131_vm1, 0.0, %v4790_v3  ;;  %v4795_v43 = vsel %vm1131_vm1, 0.0, %v4794_v30  ;;  %v9606_v30 = vld [vmem:[%s12190_s2 + $0x18] sm:$0xff]  ;;  %s12199_s2 = sld [smem:[#allocation21_spill]] }
 0xe52   : > { %5017 = vmatpush.bf16.msra.mxu0 %v9606_v30 }
 0xe53   : > { %v4793_v31 = vsel %vm1131_vm1, 0.0, %v4792_v5  ;;  %v4797_v32 = vsel %vm1131_vm1, 0.0, %v4796_v9  ;;  %v4798_v18 = vsel %vm1131_vm1, %v4792_v5, %v4773_v20  ;;  %v4809_v34 = vsel %vm1131_vm1, %v4796_v9, %v4785_v21 }
 0xe54   : > { %v4802_v37 = vperm.slane %v4798_v18, %v10544_v23  ;;  %v4803_v28 = vrot.slane %v4793_v31, 4  ;;  %v4813_v38 = vperm.slane %v4809_v34, %v10544_v23  ;;  %v4814_v39 = vrot.slane %v4797_v32, 4  ;;  %4965 = vmatpush.bf16.msra.mxu3 %v9601_v11  ;;  %v9605_v31 = vld [vmem:[%s12191_s17 + $0x10] sm:$0xff] }
 0xe56   : > { %v4804_v45 = vsel %vm1131_vm1, %v4803_v28, %v4791_v42  ;;  %v4815_v47 = vsel %vm1131_vm1, %v4814_v39, %v4795_v43  ;;  %v4822_v27 = vrot.slane %v4802_v37, 4  ;;  %v4834_v51 = vrot.slane %v4813_v38, 4  ;;  %5018 = vmatpush.bf16.msra.mxu0 %v9605_v31  ;;  %v10089_v43 = vld [vmem:[%s12192_s1] ss:$0 sm:$0xff]  ;;  %s12197_s1 = sld [smem:[#allocation20_spill]] }
 0xe57   : > { %v4808_v48 = vperm.slane %v4804_v45, %v10544_v23  ;;  %v4819_v49 = vperm.slane %v4815_v47, %v10544_v23 }
 0xe58   : > { %5170 = vmatpush.bf16.msrb.mxu3 %v9612_v0 }
 0xe59   : > { %v4823_v50 = vsel %vm1131_vm1, %v4808_v48, %v4822_v27  ;;  %v4835_v29 = vsel %vm1131_vm1, %v4819_v49, %v4834_v51  ;;  %v4820_v54 = vrot.slane %v4808_v48, 4  ;;  %v4832_v36 = vrot.slane %v4819_v49, 4  ;;  %v10090_v27 = vld [vmem:[%s12194_s22] ss:$0 sm:$0xff] }
 0xe5a   : > { %v4831_v55 = vperm.slane %v4823_v50, %v10552_v35  ;;  %v4843_v12 = vperm.slane %v4835_v29, %v10552_v35  ;;  %v9604_v50 = vld [vmem:[%s12191_s17 + $0x8] sm:$0xff]  ;;  %v9603_v29 = vld [vmem:[%s12191_s17] sm:$0xff] }
 0xe5b   : > { %v4821_v10 = vsel %vm1131_vm1, %v4820_v54, %v4802_v37  ;;  %v4833_v52 = vsel %vm1131_vm1, %v4832_v36, %v4813_v38  ;;  %5019 = vmatpush.bf16.msra.mxu0 %v9604_v50  ;;  %v10091_v54 = vld [vmem:[%s12195_s0] ss:$0 sm:$0xff]  ;;  %s12200_s0 = smov %s12199_s2 }
 0xe5c   : > { %v4850_v44 = vrot.slane %v4831_v55, 4  ;;  %v4848_v56 = vrot.slane %v4843_v12, 4  ;;  %v4827_v41 = vperm.slane %v4821_v10, %v10552_v35  ;;  %v4839_v40 = vperm.slane %v4833_v52, %v10552_v35  ;;  %v10093_v11 = vld [vmem:[%s12197_s1] ss:$0 sm:$0xff] }
 0xe5e   : > { %v4851_v46 = vsel %vm1131_vm1, %v4843_v12, %v4850_v44  ;;  %v4849_v19 = vsel %vm1131_vm1, %v4848_v56, %v4831_v55  ;;  %v4844_v62 = vrot.slane %v4839_v40, 4  ;;  %v4846_v53 = vrot.slane %v4827_v41, 4  ;;  %v10092_v44 = vld [vmem:[%s12196_s4] ss:$0 sm:$0xff]  ;;  %s12198_s4 = smov %s12197_s1  ;;  %s12207_s1 = sld [smem:[#allocation26_spill]] }
 0xe5f   : > { %4861 = vrot.lane.b32.xlu2 %v4851_v46, %s12185_s28  ;;  %4857 = vrot.lane.b32.xlu1 %v4849_v19, %s12186_s7 }
 0xe60   : > { %v4847_v60 = vsel %vm1131_vm1, %v4839_v40, %v4846_v53  ;;  %v4845_v61 = vsel %vm1131_vm1, %v4844_v62, %v4827_v41  ;;  %5020 = vmatpush.bf16.msra.mxu0 %v9603_v29 }
 0xe61   : > { %4853 = vrot.lane.b32.xlu0 %v4847_v60, %s12188_s30  ;;  %v9608_v60 = vld [vmem:[%s10326_s21 + $0x18] sm:$0xff] }
 0xe62   : > { %5114 = vmatpush.bf16.msra.mxu1 %v9608_v60 }
 0xe66   : > { %5115 = vmatpush.bf16.msra.mxu1 %v9607_v6 }
 0xeb9   : > { %v4862_v13 = vpop.permute.xlu2 %4861 }
 0xed1   : > { %v4858_v2 = vpop.permute.xlu1 %4857 }
 0xed3   : > { %v4854_v1 = vpop.permute.xlu0 %4853 }
 0xed4   : > { %v4864_v4 = vsel %vm1792_vm3, %v4845_v61, %v4854_v1  ;;  %v9610_v61 = vld [vmem:[%s10336_s29 + $0x18] sm:$0xff]  ;;  %v9609_v1 = vld [vmem:[%s10336_s29 + $0x10] sm:$0xff] }
 0xed5   : > { %v4865_v8 = vsel %vm2641_vm4, %v4864_v4, %v4858_v2  ;;  %5142 = vmatpush.bf16.msra.mxu2 %v9610_v61  ;;  %v9611_v4 = vld [vmem:[%s12157_s8 + $0x10] sm:$0xff] }
 0xed6   : > { %v4866_v59 = vsel %vm2643_vm5, %v4865_v8, %v4862_v13  ;;  %5171 = vmatpush.bf16.msrb.mxu3 %v9611_v4 }
 0xed7   : > { %v4867_v14 = vpack.c.bf16 %v4866_v59, %v4866_v59 }
 0xed9   : > { %9371 = vmatmul.msk.bf16.vlgmr.msrb.gmra.mxu2 %vm1047_vm0, %v4867_v14 }
 0xeda   : > { %5143 = vmatpush.bf16.msra.mxu2 %v9609_v1 }
 0xf5c   : > { %v4895_v57 = vpop.f32.mrf.mxu2 }
 0xf5d   : > { %v4896_v15 = vadd.f32 %v10088_v26, %v4895_v57 }
 0xf5f   : > { %v4899_v16 = vadd.f32 %v4896_v15, %v10920_v58 }
 0xf61   : > { %v4902_v7 = vsel %vm1047_vm0, %v4899_v16, 0.0  ;;  %v4906_v63 = vmul.f32 %v4899_v16, %v4899_v16 }
 0xf62   : > { %4903 = vadd.xlane.f32.xlu1 %v4902_v7 }
 0xf63   : > { %v4907_v20 = vsel %vm1047_vm0, %v4906_v63, 0.0 }
 0xf64   : > { %v4897_v21 = vpop.f32.mrf.mxu2  ;;  %4908 = vadd.xlane.f32.xlu0 %v4907_v20 }
 0xfd5   : > { %v4904_v24 = vpop.xlane.xlu1 %4903 }
 0xfd6   : > { %v4905_v25 = vmul.f32 %v4904_v24, %v10910_v33 }
 0xfd7   : > { %v4909_v3 = vpop.xlane.xlu0 %4908 }
 0xfd8   : > { %v4911_v5 = vmul.f32 %v4905_v25, %v4905_v25  ;;  %v4910_v58 = vmul.f32 %v4909_v3, %v10910_v33  ;;  %v4913_v42 = vsub.f32 %v4899_v16, %v4905_v25  ;;  %v10094_v3 = vld [vmem:[%s12199_s2] ss:$0 sm:$0xff]  ;;  %s12209_s2 = sld [smem:[#allocation30_spill]] }
 0xfda   : > { %v4912_v9 = vsub.f32 %v4910_v58, %v4911_v5 }
 0xfdc   : > { %v4914_v32 = vadd.f32 1e-05, %v4912_v9  ;;  %v10095_v9 = vld [vmem:[%s10331_s25 + $0x1] ss:$0 sm:$0xff] }
 0xfde   : > { %10148 = vrsqrt.f32 %v4914_v32  ;;  %vm4921_vm11 = vweird.f32 %v4914_v32 }
 0xfe4   : > { %v10149_v18 = vpop.eup %10148 }
 0xfe5   : > { %v4916_v34 = vmul.f32 %v10149_v18, %v4914_v32  ;;  %vm4922_vm10 = vweird.f32 %v10149_v18 }
 0xfe6   : > { %vm4923_vm12 = vmor %vm4921_vm11, %vm4922_vm10 }
 0xfe7   : > { %v4917_v37 = vmul.f32 %v10149_v18, %v4916_v34 }
 0xfe9   : > { %v4918_v28 = vmul.f32 0.5, %v4917_v37 }
 0xfeb   : > { %v4919_v38 = vsub.f32 1.5, %v4918_v28 }
 0xfed   : > { %v4920_v39 = vmul.f32 %v10149_v18, %v4919_v38 }
 0xfef   : > { %v4924_v45 = vsel %vm4923_vm12, %v10149_v18, %v4920_v39  ;;  %v10096_v18 = vld [vmem:[%s12158_s3 + $0x1] ss:$0 sm:$0xff] }
 0xff0   : > { %v4925_v47 = vmul.f32 %v4924_v45, %v4913_v42  ;;  %v10097_v42 = vld [vmem:[%s10351_s14 + $0x1] ss:$0 sm:$0xff] }
 0xff2   : > { %v4929_v51 = vmul.f32 %v10089_v43, %v4925_v47 }
 0xff4   : > { %v4933_v48 = vadd.f32 %v10090_v27, %v4929_v51 }
 0xff6   : > { %v4934_v49 = vpack.c.bf16 %v4933_v48, %v4933_v48 }
 0xff8   : > { %9380 = vmatmul.msk.bf16.vlgmr.msra.gmra.mxu3 %vm1047_vm0, %v4934_v49 }
0x107b   : > { %v4967_v36 = vpop.f32.mrf.mxu3 }
0x107c   : > { %v4968_v55 = vadd.f32 %v10091_v54, %v4967_v36 }
0x107e   : > { %v4971_v12 = vmax.f32 %v4968_v55, 0.0 }
0x1080   : > { %v4972_v10 = vpack.c.bf16 %v4971_v12, %v4971_v12 }
0x1082   : > { %9397 = vmatmul.msk.bf16.vlgmr.msra.gmra.mxu0 %vm5009_vm13, %v4972_v10 }
0x1083   : > { %v4969_v52 = vpop.f32.mrf.mxu3 }
0x10ff   : > { %v5022_v56 = vpop.f32.mrf.mxu0 }
0x1100   : > { %v5023_v41 = vadd.f32 %v10092_v44, %v5022_v56 }
0x1102   : > { %v5026_v40 = vadd.f32 %v5023_v41, %v4933_v48 }
0x1104   : > { %v5029_v46 = vsel %vm1047_vm0, %v5026_v40, 0.0  ;;  %v5033_v19 = vmul.f32 %v5026_v40, %v5026_v40 }
0x1105   : > { %5030 = vadd.xlane.f32.xlu2 %v5029_v46 }
0x1106   : > { %v5034_v62 = vsel %vm1047_vm0, %v5033_v19, 0.0 }
0x1107   : > { %v5024_v53 = vpop.f32.mrf.mxu0  ;;  %5035 = vadd.xlane.f32.xlu1 %v5034_v62 }
0x1178   : > { %v5031_v2 = vpop.xlane.xlu2 %5030 }
0x1179   : > { %v5032_v13 = vmul.f32 %v5031_v2, %v10910_v33 }
0x117a   : > { %v5036_v8 = vpop.xlane.xlu1 %5035 }
0x117b   : > { %v5038_v59 = vmul.f32 %v5032_v13, %v5032_v13  ;;  %v5037_v14 = vmul.f32 %v5036_v8, %v10910_v33  ;;  %v5040_v22 = vsub.f32 %v5026_v40, %v5032_v13 }
0x117d   : > { %v5039_v26 = vsub.f32 %v5037_v14, %v5038_v59 }
0x117f   : > { %v5041_v57 = vadd.f32 1e-05, %v5039_v26 }
0x1181   : > { %10150 = vrsqrt.f32 %v5041_v57  ;;  %vm5048_vm15 = vweird.f32 %v5041_v57 }
0x1187   : > { %v10151_v15 = vpop.eup %10150 }
0x1188   : > { %v5043_v16 = vmul.f32 %v10151_v15, %v5041_v57  ;;  %vm5049_vm14 = vweird.f32 %v10151_v15 }
0x1189   : > { %vm5050_vm6 = vmor %vm5048_vm15, %vm5049_vm14 }
0x118a   : > { %v5044_v7 = vmul.f32 %v10151_v15, %v5043_v16 }
0x118c   : > { %v5045_v63 = vmul.f32 0.5, %v5044_v7 }
0x118e   : > { %v5046_v20 = vsub.f32 1.5, %v5045_v63 }
0x1190   : > { %v5047_v21 = vmul.f32 %v10151_v15, %v5046_v20 }
0x1192   : > { %v5051_v24 = vsel %vm5050_vm6, %v10151_v15, %v5047_v21 }
0x1193   : > { %v5052_v25 = vmul.f32 %v5051_v24, %v5040_v22 }
0x1195   : > { %v5056_v5 = vmul.f32 %v10093_v11, %v5052_v25 }
0x1197   : > { %v11288_v58 = vadd.f32 %v10094_v3, %v5056_v5 }
0x1199   : > { %v5061_v30 = vpack.c.bf16 %v11288_v58, %v11288_v58 }
0x119b   : > { %9426 = vmatmul.msk.bf16.vlgmr.msra.gmra.mxu1 %vm1047_vm0, %v5061_v30  ;;  %9435 = vmatmul.msk.bf16.vlgmr.msra.gmra.mxu2 %vm1047_vm0, %v5061_v30 }
0x119c   : > { %9444 = vmatmul.msk.bf16.vlgmr.msrb.gmra.mxu3 %vm1047_vm0, %v5061_v30 }
0x1218   : > { %v5117_v31 = vpop.f32.mrf.mxu1 }
0x1219   : > { %v5118_v32 = vadd.f32 %v10095_v9, %v5117_v31 }
0x121b   : > { %5184 = vrot.lane.b32.xlu2 %v5118_v32, %s12174_s18  ;;  %5181 = vrot.lane.b32.xlu0 %v5118_v32, %s12172_s16  ;;  %v5189_v50 = vrot.slane %v5118_v32, 4 }
0x121e   : > { %v5145_v34 = vpop.f32.mrf.mxu2 }
0x121f   : > { %v5146_v37 = vadd.f32 %v10096_v18, %v5145_v34  ;;  %v5173_v28 = vpop.f32.mrf.mxu3 }
0x1220   : > { %v5119_v38 = vpop.f32.mrf.mxu1  ;;  %v11303_v47 = vadd.f32 %v10097_v42, %v5173_v28 }
0x1221   : > { %v9896_v39 = vpack.i.bf16 %v5118_v32, %v5146_v37  ;;  %v5263_v36 = vrot.slane %v5146_v37, 4 }
0x1222   : > { %v5337_v5 = vrot.slane %v11303_v47, 4 }
0x1223   : > { %9897 = vrot.lane.b32.xlu1 %v9896_v39, %s12173_s9  ;;  %5255 = vrot.lane.b32.xlu2 %v5146_v37, %s12172_s16 }
0x1224   : > { %5258 = vrot.lane.b32.xlu0 %v5146_v37, %s12174_s18 }
0x1226   : > { %v5147_v43 = vpop.f32.mrf.mxu2 }
0x1227   : > { %v5175_v45 = vpop.f32.mrf.mxu3 }
0x122b   : > { %5326 = vrot.lane.b32.xlu1 %v11303_v47, %s12173_s9  ;;  %5332 = vrot.lane.b32.xlu2 %v11303_v47, %s12174_s18 }
0x122c   : > { %5329 = vrot.lane.b32.xlu0 %v11303_v47, %s12172_s16 }
0x1275   : > { %v5185_v27 = vpop.permute.xlu2 %5184 }
0x1276   : > { %v5199_v55 = vrot.slane %v5185_v27, 4 }
0x127d   : > { %v5256_v49 = vpop.permute.xlu2 %5255 }
0x127e   : > { %v5264_v52 = vsel %vm1131_vm1, %v5256_v49, %v5263_v36  ;;  %v5261_v19 = vrot.slane %v5256_v49, 4 }
0x127f   : > { %v5272_v61 = vperm.slane %v5264_v52, %v10544_v23 }
0x1280   : > { %v5262_v15 = vsel %vm1131_vm1, %v5261_v19, %v5146_v37 }
0x1281   : > { %v5299_v63 = vrot.slane %v5272_v61, 4  ;;  %v11338_v18 = vperm.slane %v5262_v15, %v10544_v23 }
0x1285   : > { %v5333_v8 = vpop.permute.xlu2 %5332 }
0x1286   : > { %v5347_v11 = vrot.slane %v5333_v8, 4 }
0x128d   : > { %v5182_v51 = vpop.permute.xlu0 %5181 }
0x128e   : > { %v5187_v48 = vrot.slane %v5182_v51, 4  ;;  %v5190_v54 = vsel %vm1131_vm1, %v5182_v51, %v5189_v50 }
0x128f   : > { %v5198_v44 = vperm.slane %v5190_v54, %v10544_v23 }
0x1290   : > { %v5188_v29 = vsel %vm1131_vm1, %v5187_v48, %v5118_v32 }
0x1291   : > { %v5194_v12 = vperm.slane %v5188_v29, %v10544_v23  ;;  %v5225_v2 = vrot.slane %v5198_v44, 4 }
0x1293   : > { %v5213_v0 = vrot.slane %v5194_v12, 4 }
0x1295   : > { %v9898_v10 = vpop.permute.xlu1 %9897 }
0x1296   : > { %v9900_v56 = vunpack.i.h.bf16 %v9898_v10  ;;  %v9899_v41 = vunpack.i.l.bf16 %v9898_v10  ;;  %v5259_v40 = vpop.permute.xlu0 %5258 }
0x1297   : > { %v5273_v46 = vrot.slane %v5259_v40, 4 }
0x1298   : > { %v5201_v62 = vrot.slane %v9900_v56, 4  ;;  %v5200_v53 = vsel %vm1131_vm1, %v5199_v55, %v9900_v56  ;;  %v5275_v60 = vrot.slane %v9899_v41, 4 }
0x1299   : > { %v5206_v6 = vperm.slane %v5200_v53, %v10544_v23  ;;  %v5274_v1 = vsel %vm1131_vm1, %v5273_v46, %v9899_v41 }
0x129a   : > { %v5202_v4 = vsel %vm1131_vm1, %v5185_v27, %v5201_v62  ;;  %v5276_v13 = vsel %vm1131_vm1, %v5259_v40, %v5275_v60  ;;  %v11328_v7 = vperm.slane %v5274_v1, %v10544_v23 }
0x129b   : > { %v5210_v59 = vperm.slane %v5202_v4, %v10544_v23  ;;  %v5211_v14 = vrot.slane %v5206_v6, 4  ;;  %v5214_v26 = vsel %vm1131_vm1, %v5206_v6, %v5213_v0  ;;  %v5284_v57 = vperm.slane %v5276_v13, %v10544_v23 }
0x129c   : > { %v5222_v16 = vperm.slane %v5214_v26, %v10552_v35  ;;  %v5285_v28 = vrot.slane %v11328_v7, 4 }
0x129d   : > { %v5212_v20 = vsel %vm1131_vm1, %v5211_v14, %v5194_v12  ;;  %v5223_v21 = vrot.slane %v5210_v59, 4  ;;  %v5226_v22 = vsel %vm1131_vm1, %v5210_v59, %v5225_v2  ;;  %v5327_v3 = vpop.permute.xlu1 %5326  ;;  %v5297_v31 = vrot.slane %v5284_v57, 4 }
0x129e   : > { %v5234_v24 = vperm.slane %v5226_v22, %v10552_v35  ;;  %v5237_v25 = vrot.slane %v5222_v16, 4  ;;  %v5218_v30 = vperm.slane %v5212_v20, %v10552_v35  ;;  %v5300_v32 = vsel %vm1131_vm1, %v5284_v57, %v5299_v63  ;;  %v5330_v36 = vpop.permute.xlu0 %5329 }
0x129f   : > { %v5224_v9 = vsel %vm1131_vm1, %v5223_v21, %v5198_v44  ;;  %v5245_v38 = vpack.c.bf16 %v5222_v16, %v5222_v16  ;;  %v5308_v42 = vperm.slane %v5300_v32, %v10552_v35  ;;  %v5348_v43 = vsel %vm1131_vm1, %v5347_v11, %v5327_v3 }
0x12a0   : > { %v5230_v34 = vperm.slane %v5224_v9, %v10552_v35  ;;  %v5241_v37 = vrot.slane %v5234_v24, 4  ;;  %v5249_v39 = vpack.c.bf16 %v5234_v24, %v5234_v24  ;;  %v5238_v45 = vsel %vm1131_vm1, 0.0, %v5237_v25 }
0x12a1   : > { %v5243_v49 = vpack.c.bf16 %v5218_v30, %v5218_v30  ;;  %v5298_v54 = vsel %vm1131_vm1, %v5297_v31, %v5272_v61  ;;  %v5315_v10 = vrot.slane %v5308_v42, 4  ;;  %v5349_v52 = vrot.slane %v5327_v3, 4 }
0x12a2   : > { %v5239_v27 = vrot.slane %v5230_v34, 4  ;;  %v5242_v51 = vsel %vm1131_vm1, 0.0, %v5241_v37  ;;  %v5247_v48 = vpack.c.bf16 %v5230_v34, %v5230_v34  ;;  %v5405_v29 = vrot.slane %v5249_v39, 4 }
0x12a3   : > { %v5250_v50 = vpack.c.bf16 %v5242_v51, %v5242_v51  ;;  %v5246_v44 = vpack.c.bf16 %v5238_v45, %v5238_v45  ;;  %v5354_v40 = vperm.slane %v5348_v43, %v10544_v23  ;;  %v5235_v46 = vrot.slane %v5218_v30, 4 }
0x12a4   : > { %v5240_v55 = vsel %vm1131_vm1, 0.0, %v5239_v27  ;;  %v5399_v12 = vrot.slane %v5247_v48, 4  ;;  %v5406_v56 = vsel %vm1131_vm1, %v5405_v29, %v5245_v38  ;;  %v5350_v62 = vsel %vm1131_vm1, %v5333_v8, %v5349_v52 }
0x12a5   : > { %v5425_v41 = vrot.slane %v5250_v50, 4  ;;  %v5335_v53 = vrot.slane %v5330_v36, 4  ;;  %v5248_v60 = vpack.c.bf16 %v5240_v55, %v5240_v55  ;;  %v5323_v0 = vpack.c.bf16 %v5308_v42, %v5308_v42 }
0x12a6   : > { %v5400_v19 = vsel %vm1131_vm1, %v5399_v12, %v5243_v49  ;;  %v5359_v6 = vrot.slane %v5354_v40, 4  ;;  %v5410_v1 = vperm.slane %v5406_v56, %v10544_v23  ;;  %v5338_v4 = vsel %vm1131_vm1, %v5330_v36, %v5337_v5 }
0x12a7   : > { %v5426_v61 = vsel %vm1131_vm1, %v5425_v41, %v5246_v44  ;;  %v5336_v2 = vsel %vm1131_vm1, %v5335_v53, %v11303_v47  ;;  %v5316_v13 = vsel %vm1131_vm1, 0.0, %v5315_v10  ;;  %v11359_v59 = vperm.slane %v5350_v62, %v10544_v23 }
0x12a8   : > { %v5342_v8 = vperm.slane %v5336_v2, %v10544_v23  ;;  %v5346_v14 = vperm.slane %v5338_v4, %v10544_v23  ;;  %v5324_v26 = vpack.c.bf16 %v5316_v13, %v5316_v13  ;;  %v5286_v57 = vsel %vm1131_vm1, %v5285_v28, %v11338_v18 }
0x12a9   : > { %v5304_v15 = vperm.slane %v5298_v54, %v10552_v35  ;;  %v5236_v16 = vsel %vm1131_vm1, 0.0, %v5235_v46  ;;  %v5292_v63 = vperm.slane %v5286_v57, %v10552_v35  ;;  %v5419_v21 = vrot.slane %v5248_v60, 4 }
0x12aa   : > { %v5373_v47 = vrot.slane %v5346_v14, 4  ;;  %9901 = vxpose.binary.xlu2.c.b16.start.end [1/2] (short) (narrow) %v5324_v26, %v5323_v0, 16  ;;  %v5360_v20 = vsel %vm1131_vm1, %v5359_v6, %v5342_v8  ;;  %v5411_v11 = vrot.slane %v5410_v1, 4  ;;  %v5404_v3 = vperm.slane %v5400_v19, %v10544_v23 }
0x12ab   : > { %v5313_v22 = vrot.slane %v5304_v15, 4  ;;  %v5309_v25 = vrot.slane %v5292_v63, 4  ;;  %v5244_v5 = vpack.c.bf16 %v5236_v16, %v5236_v16  ;;  %v5366_v9 = vperm.slane %v5360_v20, %v10552_v35 }
0x12ac   : > { %v11371_v24 = vsel %vm1131_vm1, %v11359_v59, %v5373_v47  ;;  %v5361_v31 = vrot.slane %v5342_v8, 4  ;;  %v5321_v34 = vpack.c.bf16 %v5304_v15, %v5304_v15  ;;  %v5287_v28 = vrot.slane %v11338_v18, 4 }
0x12ad   : > { %v5314_v30 = vsel %vm1131_vm1, 0.0, %v5313_v22  ;;  %v5310_v32 = vsel %vm1131_vm1, 0.0, %v5309_v25  ;;  %v5317_v38 = vpack.c.bf16 %v5292_v63, %v5292_v63  ;;  %v5412_v42 = vsel %vm1131_vm1, %v5411_v11, %v5404_v3 }
0x12ae   : > { %v5322_v37 = vpack.c.bf16 %v5314_v30, %v5314_v30  ;;  %v5318_v39 = vpack.c.bf16 %v5310_v32, %v5310_v32  ;;  %v5420_v43 = vsel %vm1131_vm1, %v5419_v21, %v5244_v5  ;;  %v5430_v45 = vperm.slane %v5426_v61, %v10544_v23 }
0x12af   : > { %v5288_v27 = vsel %vm1131_vm1, %v11328_v7, %v5287_v28  ;;  %v5383_v51 = vrot.slane %v5366_v9, 4  ;;  %v11384_v48 = vperm.slane %v5412_v42, %v10552_v35  ;;  %v5424_v49 = vperm.slane %v5420_v43, %v10544_v23 }
0x12b0   : > { %9904 = vxpose.binary.xlu1.c.b16.start.end [1/2] (short) (narrow) %v5322_v37, %v5321_v34, 16  ;;  %v5431_v18 = vrot.slane %v5430_v45, 4  ;;  %v11388_v50 = vsel %vm1131_vm1, %v5354_v40, %v5361_v31  ;;  %v5296_v54 = vperm.slane %v5288_v27, %v10552_v35  ;;  %v5391_v40 = vpack.c.bf16 %v5366_v9, %v5366_v9 }
0x12b1   : > { %9907 = vxpose.binary.xlu0.c.b16.start.end [1/2] (short) (narrow) %v5318_v39, %v5317_v38, 16  ;;  %v5417_v29 = vrot.slane %v11384_v48, 4  ;;  %v5384_v55 = vsel %vm1131_vm1, 0.0, %v5383_v51  ;;  %v5442_v12 = vshrl.u32 %v11384_v48, 16  ;;  %v5371_v1 = vrot.slane %v11359_v59, 4 }
0x12b2   : > { %v5432_v36 = vsel %vm1131_vm1, %v5431_v18, %v5424_v49  ;;  %v5311_v41 = vrot.slane %v5296_v54, 4  ;;  %v5392_v46 = vpack.c.bf16 %v5384_v55, %v5384_v55  ;;  %v5319_v2 = vpack.c.bf16 %v5296_v54, %v5296_v54 }
0x12b3   : > { %v11395_v7 = vperm.slane %v5432_v36, %v10552_v35  ;;  %v11402_v44 = vsel %vm1131_vm1, 0, %v5417_v29  ;;  %v5372_v13 = vsel %vm1131_vm1, %v5371_v1, %v5346_v14 }
0x12b4   : > { %v5448_v60 = vshrl.u32 %v11402_v44, 16  ;;  %v5312_v0 = vsel %vm1131_vm1, 0.0, %v5311_v41  ;;  %v5378_v8 = vperm.slane %v5372_v13, %v10552_v35 }
0x12b5   : > { %v5441_v10 = vpack.i.b16 %v11395_v7, %v11384_v48  ;;  %v5443_v52 = vshrl.u32 %v11395_v7, 16  ;;  %v5437_v56 = vrot.slane %v11395_v7, 4  ;;  %v5320_v4 = vpack.c.bf16 %v5312_v0, %v5312_v0 }
0x12b6   : > { %v5387_v26 = vrot.slane %v5378_v8, 4  ;;  %v5395_v15 = vpack.c.bf16 %v5378_v8, %v5378_v8 }
0x12b7   : > { %v11405_v19 = vpack.i.b16 %v5443_v52, %v5442_v12  ;;  %v11408_v62 = vsel %vm1131_vm1, 0, %v5437_v56 }
0x12b8   : > { %v5447_v53 = vpack.i.b16 %v11408_v62, %v11402_v44  ;;  %v5449_v61 = vshrl.u32 %v11408_v62, 16  ;;  %v5388_v57 = vsel %vm1131_vm1, 0.0, %v5387_v26 }
0x12b9   : > { %v5396_v16 = vpack.c.bf16 %v5388_v57, %v5388_v57 }
0x12ba   : > { %9916 = vxpose.binary.xlu2.c.b16.start.end [1/2] (short) (narrow) %v5392_v46, %v5391_v40, 16  ;;  %v11415_v6 = vpack.i.b16 %v5449_v61, %v5448_v60 }
0x12c1   : > { %9910 = vxpose.binary.xlu0.c.b16.start.end [1/2] (short) (narrow) %v5320_v4, %v5319_v2, 16 }
0x12d1   : > { %9913 = vxpose.binary.xlu0.c.b16.start.end [1/2] (short) (narrow) %v5396_v16, %v5395_v15, 16 }
0x134b   : > { %v9902_v63 = vpop.trf.xlu2 }
0x134c   : > { %v5585_v22 = vrot.slane %v9902_v63, 4 }
0x1353   : > { %v9903_v5 = vpop.trf.xlu2 }
0x1354   : > { %v5613_v31 = vrot.slane %v9903_v5, 4 }
0x135c   : > { %v9905_v20 = vpop.trf.xlu1 }
0x135d   : > { %v9908_v47 = vpop.trf.xlu0  ;;  %v5579_v59 = vrot.slane %v9905_v20, 4 }
0x135f   : > { %v5580_v30 = vsel %vm1131_vm1, %v5579_v59, %v9908_v47 }
0x1360   : > { %v5584_v34 = vperm.slane %v5580_v30, %v10544_v23 }
0x1362   : > { %v5593_v12 = vrot.slane %v5584_v34, 4 }
0x1364   : > { %v9906_v3 = vpop.trf.xlu1 }
0x1365   : > { %v9909_v21 = vpop.trf.xlu0  ;;  %v5607_v9 = vrot.slane %v9906_v3, 4 }
0x1367   : > { %v5608_v28 = vsel %vm1131_vm1, %v5607_v9, %v9909_v21 }
0x1368   : > { %v5612_v43 = vperm.slane %v5608_v28, %v10544_v23 }
0x136a   : > { %v5621_v55 = vrot.slane %v5612_v43, 4 }
0x136d   : > { %v9911_v11 = vpop.trf.xlu0 }
0x136e   : > { %v5586_v25 = vsel %vm1131_vm1, %v5585_v22, %v9911_v11 }
0x136f   : > { %v5590_v14 = vperm.slane %v5586_v25, %v10544_v23 }
0x1371   : > { %v5591_v32 = vrot.slane %v5590_v14, 4  ;;  %v5594_v56 = vsel %vm1131_vm1, %v5590_v14, %v5593_v12 }
0x1372   : > { %v5602_v40 = vperm.slane %v5594_v56, %v10552_v35 }
0x1373   : > { %v5592_v39 = vsel %vm1131_vm1, %v5591_v32, %v5584_v34 }
0x1374   : > { %v5598_v27 = vperm.slane %v5592_v39, %v10552_v35  ;;  %v5655_v60 = vshrl.u32 %v5602_v40, 16  ;;  %v5605_v47 = vrot.slane %v5602_v40, 4 }
0x1375   : > { %v9912_v37 = vpop.trf.xlu0 }
0x1376   : > { %v5614_v38 = vsel %vm1131_vm1, %v5613_v31, %v9912_v37  ;;  %v5639_v18 = vshrl.u32 %v5598_v27, 16  ;;  %v5603_v2 = vrot.slane %v5598_v27, 4  ;;  %v5606_v20 = vsel %vm1131_vm1, 0, %v5605_v47 }
0x1377   : > { %v5618_v42 = vperm.slane %v5614_v38, %v10544_v23  ;;  %v5663_v22 = vshrl.u32 %v5606_v20, 16 }
0x1378   : > { %v5604_v13 = vsel %vm1131_vm1, 0, %v5603_v2 }
0x1379   : > { %v5619_v45 = vrot.slane %v5618_v42, 4  ;;  %v5622_v52 = vsel %vm1131_vm1, %v5618_v42, %v5621_v55  ;;  %v5647_v26 = vshrl.u32 %v5604_v13, 16 }
0x137a   : > { %v5630_v41 = vperm.slane %v5622_v52, %v10552_v35 }
0x137b   : > { %v5620_v51 = vsel %vm1131_vm1, %v5619_v45, %v5612_v43 }
0x137c   : > { %v5626_v49 = vperm.slane %v5620_v51, %v10552_v35  ;;  %v5656_v46 = vshrl.u32 %v5630_v41, 16  ;;  %v5653_v61 = vpack.i.b16 %v5630_v41, %v5602_v40  ;;  %v5633_v16 = vrot.slane %v5630_v41, 4 }
0x137e   : > { %v5640_v29 = vshrl.u32 %v5626_v49, 16  ;;  %v5637_v54 = vpack.i.b16 %v5626_v49, %v5598_v27  ;;  %v5657_v0 = vpack.i.b16 %v5656_v46, %v5655_v60  ;;  %v5631_v1 = vrot.slane %v5626_v49, 4 }
0x137f   : > { %v5634_v63 = vsel %vm1131_vm1, 0, %v5633_v16 }
0x1380   : > { %v5641_v36 = vpack.i.b16 %v5640_v29, %v5639_v18  ;;  %v5632_v4 = vsel %vm1131_vm1, 0, %v5631_v1  ;;  %v5664_v21 = vshrl.u32 %v5634_v63, 16  ;;  %v5661_v11 = vpack.i.b16 %v5634_v63, %v5606_v20  ;;  %v10191_v63 = vld [vmem:[%s10316_s13] sm:$0xff] }
0x1381   : > { %v5648_v8 = vshrl.u32 %v5632_v4, 16  ;;  %v5645_v57 = vpack.i.b16 %v5632_v4, %v5604_v13 }
0x1382   : > { %9919 = vxpose.binary.xlu1.c.b16.start.end [1/2] (short) (narrow) %v5641_v36, %v5637_v54, 16  ;;  %v5665_v59 = vpack.i.b16 %v5664_v21, %v5663_v22 }
0x1383   : > { %v5649_v15 = vpack.i.b16 %v5648_v8, %v5647_v26 }
0x1392   : > { %9922 = vxpose.binary.xlu1.c.b16.start.end [1/2] (short) (narrow) %v5657_v0, %v5653_v61, 16 }
0x13a2   : > { %9925 = vxpose.binary.xlu1.c.b16.start.end [1/2] (short) (narrow) %v5649_v15, %v5645_v57, 16 }
0x13b2   : > { %9928 = vxpose.binary.xlu1.c.b16.start.end [1/2] (short) (narrow) %v5665_v59, %v5661_v11, 16 }
0x142e   : > { %v9920_v25 = vpop.trf.xlu1 }
0x1436   : > { %v9921_v3 = vpop.trf.xlu1 }
0x143e   : > { %v9923_v14 = vpop.trf.xlu1 }
0x143f   : > { %v5795_v31 = vrot.slane %v9923_v14, 4  ;;  %v9914_v14 = vpop.trf.xlu0 }
0x1441   : > { %v5796_v37 = vsel %vm1131_vm1, %v5795_v31, %v9920_v25  ;;  %v5370_v31 = vperm.slane %v11388_v50, %v10552_v35 }
0x1442   : > { %v5800_v39 = vperm.slane %v5796_v37, %v10544_v23 }
0x1446   : > { %v9924_v5 = vpop.trf.xlu1 }
0x1447   : > { %v5815_v43 = vrot.slane %v9924_v5, 4  ;;  %v6099_v5 = vrot.slane %v9914_v14, 4 }
0x1449   : > { %v5816_v49 = vsel %vm1131_vm1, %v5815_v43, %v9921_v3 }
0x144a   : > { %v5820_v36 = vperm.slane %v5816_v49, %v10544_v23 }
0x144e   : > { %v9926_v30 = vpop.trf.xlu1 }
0x1456   : > { %v9927_v9 = vpop.trf.xlu1 }
0x145e   : > { %v9929_v32 = vpop.trf.xlu1 }
0x145f   : > { %v5801_v34 = vrot.slane %v9929_v32, 4  ;;  %v5385_v32 = vrot.slane %v5370_v31, 4 }
0x1461   : > { %v5802_v28 = vsel %vm1131_vm1, %v5801_v34, %v9926_v30  ;;  %v9917_v30 = vpop.trf.xlu2  ;;  %v5382_v34 = vperm.slane %v11371_v24, %v10552_v35  ;;  %v5386_v37 = vsel %vm1131_vm1, 0.0, %v5385_v32 }
0x1462   : > { %v5806_v38 = vperm.slane %v5802_v28, %v10544_v23  ;;  %v5393_v28 = vpack.c.bf16 %v5370_v31, %v5370_v31 }
0x1463   : > { %v5397_v43 = vpack.c.bf16 %v5382_v34, %v5382_v34 }
0x1464   : > { %v5807_v42 = vrot.slane %v5806_v38, 4  ;;  %v5394_v38 = vpack.c.bf16 %v5386_v37, %v5386_v37 }
0x1466   : > { %v9930_v45 = vpop.trf.xlu1  ;;  %v5808_v27 = vsel %vm1131_vm1, %v5807_v42, %v5800_v39  ;;  %v5389_v39 = vrot.slane %v5382_v34, 4 }
0x1467   : > { %v5821_v51 = vrot.slane %v9930_v45, 4  ;;  %v5812_v29 = vperm.slane %v5808_v27, %v10552_v35  ;;  %v9915_v27 = vpop.trf.xlu0 }
0x1468   : > { %v5390_v42 = vsel %vm1131_vm1, 0.0, %v5389_v39 }
0x1469   : > { %v5822_v18 = vsel %vm1131_vm1, %v5821_v51, %v9927_v9  ;;  %v5813_v12 = vrot.slane %v5812_v29, 4  ;;  %v5838_v41 = vshrl.u32 %v5812_v29, 16  ;;  %v6100_v9 = vsel %vm1131_vm1, %v6099_v5, %v9917_v30  ;;  %v9918_v49 = vpop.trf.xlu2 }
0x146a   : > { %v5826_v54 = vperm.slane %v5822_v18, %v10544_v23  ;;  %v5398_v45 = vpack.c.bf16 %v5390_v42, %v5390_v42  ;;  %v6127_v51 = vrot.slane %v9915_v27, 4 }
0x146b   : > { %v5814_v60 = vsel %vm1131_vm1, 0, %v5813_v12 }
0x146c   : > { %v5827_v55 = vrot.slane %v5826_v54, 4  ;;  %v5844_v13 = vshrl.u32 %v5814_v60, 16  ;;  %v6128_v50 = vsel %vm1131_vm1, %v6127_v51, %v9918_v49 }
0x146e   : > { %v5828_v52 = vsel %vm1131_vm1, %v5827_v55, %v5820_v36 }
0x146f   : > { %v5832_v56 = vperm.slane %v5828_v52, %v10552_v35 }
0x1471   : > { %v5837_v40 = vpack.i.b16 %v5832_v56, %v5812_v29  ;;  %v5839_v46 = vshrl.u32 %v5832_v56, 16  ;;  %v5833_v61 = vrot.slane %v5832_v56, 4 }
0x1473   : > { %v5851_v0 = vsel %vm1796_vm2, %v5837_v40, 0  ;;  %v5840_v1 = vpack.i.b16 %v5839_v46, %v5838_v41  ;;  %v5834_v2 = vsel %vm1131_vm1, 0, %v5833_v61 }
0x1474   : > { %5860 = vmatpush.bf16.msrb.mxu0 %v5851_v0  ;;  %v5843_v4 = vpack.i.b16 %v5834_v2, %v5814_v60  ;;  %v5845_v8 = vshrl.u32 %v5834_v2, 16  ;;  %v6104_v60 = vperm.slane %v6100_v9, %v10544_v23 }
0x1475   : > { %v5870_v26 = vsel %vm1796_vm2, %v5840_v1, 0 }
0x1476   : > { %5879 = vmatpush.bf16.msrb.mxu1 %v5870_v26  ;;  %v5889_v57 = vsel %vm1796_vm2, %v5843_v4, 0  ;;  %v5846_v15 = vpack.i.b16 %v5845_v8, %v5844_v13  ;;  %v6113_v2 = vrot.slane %v6104_v60, 4  ;;  %v6132_v26 = vperm.slane %v6128_v50, %v10544_v23 }
0x1477   : > { %9445 = vmatmul.msk.bf16.vlgmr.msrb.gmra.mxu0 %vm1792_vm3, %v5441_v10  ;;  %5898 = vmatpush.bf16.msrb.mxu2 %v5889_v57 }
0x1478   : > { %v5908_v16 = vsel %vm1796_vm2, %v5846_v15, 0 }
0x1479   : > { %9446 = vmatmul.msk.bf16.vlgmr.msrb.gmra.mxu1 %vm1792_vm3, %v11405_v19  ;;  %5917 = vmatpush.bf16.msra.mxu3 %v5908_v16 }
0x147a   : > { %9447 = vmatmul.msk.bf16.vlgmr.msrb.gmra.mxu2 %vm1792_vm3, %v5447_v53 }
0x147c   : > { %9448 = vmatmul.msk.bf16.vlgmr.msra.gmra.mxu3 %vm1792_vm3, %v11415_v6 }
0x14f4   : > { %v5862_v47 = vpop.f32.mrf.mxu0 }
0x14f5   : > { %v5863_v48 = vadd.f32 %v10191_v63, %v5862_v47 }
0x14f6   : > { %v5881_v7 = vpop.f32.mrf.mxu1 }
0x14f7   : > { %v11472_v10 = vadd.f32 %v10191_v63, %v5881_v7  ;;  %v5923_v20 = vsel %vm1792_vm3, %v5863_v48, -inf }
0x14f8   : > { %5924 = vmax.xlane.f32.xlu2 %v5923_v20  ;;  %v6141_v20 = vrot.slane %v6132_v26, 4 }
0x14f9   : > { %v5926_v19 = vsel %vm1792_vm3, %v11472_v10, -inf }
0x14fa   : > { %5927 = vmax.xlane.f32.xlu1 %v5926_v19 }
0x14fc   : > { %v5864_v21 = vpop.f32.mrf.mxu0 }
0x14fd   : > { %v5900_v44 = vpop.f32.mrf.mxu2 }
0x14fe   : > { %v11477_v62 = vadd.f32 %v10191_v63, %v5900_v44  ;;  %v5883_v53 = vpop.f32.mrf.mxu1 }
0x14ff   : > { %v5919_v22 = vpop.f32.mrf.mxu3 }
0x1500   : > { %v5920_v6 = vadd.f32 %v10191_v63, %v5919_v22  ;;  %v5929_v11 = vsel %vm1792_vm3, %v11477_v62, -inf }
0x1501   : > { %5930 = vmax.xlane.f32.xlu2 %v5929_v11 }
0x1502   : > { %v5932_v59 = vsel %vm1792_vm3, %v5920_v6, -inf }
0x1503   : > { %5933 = vmax.xlane.f32.xlu0 %v5932_v59 }
0x1505   : > { %v5902_v25 = vpop.f32.mrf.mxu2 }
0x1507   : > { %v5921_v3 = vpop.f32.mrf.mxu3 }
0x152c   : > { %9934 = vxpose.binary.xlu0.c.b16.start.end [1/2] (short) (narrow) %v5394_v38, %v5393_v28, 16 }
0x1534   : > { %9931 = vxpose.binary.xlu1.c.b16.start.end [1/2] (short) (narrow) %v5398_v45, %v5397_v43, 16 }
0x156b   : > { %v5925_v18 = vpop.xlane.xlu2 %5924 }
0x156c   : > { %v5935_v29 = vsub.f32 %v5863_v48, %v5925_v18 }
0x156d   : > { %v11495_v40 = vpop.xlane.xlu1 %5927 }
0x156e   : > { %v5939_v54 = vmul.f32 1.442695, %v5935_v29 }
0x1570   : > { %10152 = vpow2.f32 %v5939_v54 }
0x1576   : > { %v5934_v24 = vpop.xlane.xlu0 %5933  ;;  %v10153_v12 = vpop.eup %10152 }
0x1577   : > { %v5938_v36 = vsub.f32 %v5920_v6, %v5934_v24  ;;  %v5947_v52 = vsel %vm1792_vm3, %v10153_v12, 0.0 }
0x1579   : > { %v5945_v55 = vmul.f32 1.442695, %v5938_v36 }
0x157b   : > { %10154 = vpow2.f32 %v5945_v55 }
0x1581   : > { %v11491_v56 = vpop.eup %10154 }
0x1582   : > { %v5956_v41 = vsel %vm1792_vm3, %v11491_v56, 0.0 }
0x1594   : > { %5948 = vadd.xlane.f32.xlu1 %v5947_v52 }
0x159d   : > { %5957 = vadd.xlane.f32.xlu0 %v5956_v41 }
0x15d8   : > { %v9935_v46 = vpop.trf.xlu0 }
0x15e0   : > { %v9932_v61 = vpop.trf.xlu1  ;;  %v9936_v47 = vpop.trf.xlu0 }
0x15e1   : > { %v6105_v0 = vrot.slane %v9932_v61, 4 }
0x15e3   : > { %v6106_v1 = vsel %vm1131_vm1, %v6105_v0, %v9935_v46 }
0x15e4   : > { %v6110_v4 = vperm.slane %v6106_v1, %v10544_v23  ;;  %v5936_v1 = vsub.f32 %v11472_v10, %v11495_v40 }
0x15e6   : > { %v6111_v13 = vrot.slane %v6110_v4, 4  ;;  %v6114_v8 = vsel %vm1131_vm1, %v6110_v4, %v6113_v2  ;;  %v5941_v2 = vmul.f32 1.442695, %v5936_v1  ;;  %v5931_v4 = vpop.xlane.xlu2 %5930 }
0x15e7   : > { %v6122_v15 = vperm.slane %v6114_v8, %v10552_v35 }
0x15e8   : > { %v6112_v57 = vsel %vm1131_vm1, %v6111_v13, %v6104_v60  ;;  %v9933_v16 = vpop.trf.xlu1 }
0x15e9   : > { %v6133_v63 = vrot.slane %v9933_v16, 4  ;;  %v11505_v48 = vperm.slane %v6112_v57, %v10552_v35  ;;  %v6125_v19 = vrot.slane %v6122_v15, 4  ;;  %v6175_v11 = vshrl.u32 %v6122_v15, 16 }
0x15eb   : > { %v6134_v7 = vsel %vm1131_vm1, %v6133_v63, %v9936_v47  ;;  %v6123_v44 = vrot.slane %v11505_v48, 4  ;;  %v6126_v25 = vsel %vm1131_vm1, 0, %v6125_v19  ;;  %v6159_v31 = vshrl.u32 %v11505_v48, 16 }
0x15ec   : > { %v6138_v21 = vperm.slane %v6134_v7, %v10544_v23  ;;  %v6183_v39 = vshrl.u32 %v6126_v25, 16 }
0x15ed   : > { %v6124_v9 = vsel %vm1131_vm1, 0, %v6123_v44 }
0x15ee   : > { %v6139_v53 = vrot.slane %v6138_v21, 4  ;;  %v6142_v22 = vsel %vm1131_vm1, %v6138_v21, %v6141_v20  ;;  %v6167_v27 = vshrl.u32 %v6124_v9, 16 }
0x15ef   : > { %v6150_v6 = vperm.slane %v6142_v22, %v10552_v35 }
0x15f0   : > { %v6140_v59 = vsel %vm1131_vm1, %v6139_v53, %v6132_v26  ;;  %v9618_v53 = vld [vmem:[%s12156_s12 + $0x18] sm:$0xff] }
0x15f1   : > { %v6146_v3 = vperm.slane %v6140_v59, %v10552_v35  ;;  %v6153_v14 = vrot.slane %v6150_v6, 4  ;;  %v6176_v5 = vshrl.u32 %v6150_v6, 16  ;;  %v6173_v30 = vpack.i.b16 %v6150_v6, %v6122_v15 }
0x15f3   : > { %v6151_v32 = vrot.slane %v6146_v3, 4  ;;  %v6177_v34 = vpack.i.b16 %v6176_v5, %v6175_v11  ;;  %v6154_v37 = vsel %vm1131_vm1, 0, %v6153_v14  ;;  %v6157_v28 = vpack.i.b16 %v6146_v3, %v11505_v48  ;;  %v9617_v11 = vld [vmem:[%s12156_s12 + $0x10] sm:$0xff] }
0x15f4   : > { %v6181_v38 = vpack.i.b16 %v6154_v37, %v6126_v25  ;;  %v6184_v42 = vshrl.u32 %v6154_v37, 16  ;;  %v6160_v43 = vshrl.u32 %v6146_v3, 16 }
0x15f5   : > { %9943 = vxpose.binary.xlu1.c.b16.start.end [1/2] (short) (narrow) %v6177_v34, %v6173_v30, 16  ;;  %v6152_v45 = vsel %vm1131_vm1, 0, %v6151_v32 }
0x15f6   : > { %v6185_v51 = vpack.i.b16 %v6184_v42, %v6183_v39  ;;  %v6165_v49 = vpack.i.b16 %v6152_v45, %v6124_v9  ;;  %v6168_v50 = vshrl.u32 %v6152_v45, 16  ;;  %v6161_v18 = vpack.i.b16 %v6160_v43, %v6159_v31 }
0x15f8   : > { %9937 = vxpose.binary.xlu2.c.b16.start.end [1/2] (short) (narrow) %v6185_v51, %v6181_v38, 16  ;;  %v6169_v29 = vpack.i.b16 %v6168_v50, %v6167_v27 }
0x15fa   : > { %9940 = vxpose.binary.xlu0.c.b16.start.end [1/2] (short) (narrow) %v6169_v29, %v6165_v49, 16 }
0x1607   : > { %v5949_v54 = vpop.xlane.xlu1 %5948 }
0x1608   : > { %10156 = vrcp.f32 %v5949_v54 }
0x160e   : > { %v10157_v24 = vpop.eup %10156 }
0x160f   : > { %v5963_v36 = vmul.f32 %v10157_v24, %v10153_v12  ;;  %v5937_v12 = vsub.f32 %v11477_v62, %v5931_v4 }
0x1610   : > { %v5958_v55 = vpop.xlane.xlu0 %5957 }
0x1611   : > { %10158 = vrcp.f32 %v5958_v55  ;;  %v5967_v52 = vpack.c.bf16 %v5963_v36, %v5963_v36  ;;  %v5943_v13 = vmul.f32 1.442695, %v5937_v12 }
0x1612   : > { %10160 = vpow2.f32 %v5941_v2 }
0x1613   : > { %v6371_v41 = vsel %vm1792_vm3, %v5967_v52, 0  ;;  %10162 = vpow2.f32 %v5943_v13 }
0x1614   : > { %6380 = vmatpush.bf16.xpose.msra.mxu0 %v6371_v41 }
0x1617   : > { %v10159_v46 = vpop.eup %10158 }
0x1618   : > { %v5966_v60 = vmul.f32 %v10159_v46, %v11491_v56  ;;  %v10161_v8 = vpop.eup %10160 }
0x1619   : > { %v5950_v26 = vsel %vm1792_vm3, %v10161_v8, 0.0  ;;  %v10163_v57 = vpop.eup %10162 }
0x161a   : > { %v5970_v61 = vpack.c.bf16 %v5966_v60, %v5966_v60  ;;  %v5953_v56 = vsel %vm1792_vm3, %v10163_v57, 0.0 }
0x161c   : > { %v6428_v0 = vsel %vm1792_vm3, %v5970_v61, 0 }
0x161d   : > { %6437 = vmatpush.bf16.xpose.msrb.mxu3 %v6428_v0 }
0x1669   : > { %5951 = vadd.xlane.f32.xlu2 %v5950_v26 }
0x1671   : > { %5954 = vadd.xlane.f32.xlu2 %v5953_v56 }
0x1699   : > { %v9938_v15 = vpop.trf.xlu2 }
0x169a   : > { %9946 = vxpose.binary.xlu2.c.b16.start.end [1/2] (short) (narrow) %v6161_v18, %v6157_v28, 16  ;;  %v6321_v22 = vrot.slane %v9938_v15, 4 }
0x16a1   : > { %v9939_v16 = vpop.trf.xlu2  ;;  %v9944_v6 = vpop.trf.xlu1 }
0x16a2   : > { %v6315_v25 = vrot.slane %v9944_v6, 4  ;;  %v6341_v14 = vrot.slane %v9939_v16, 4 }
0x16a6   : > { %v9941_v44 = vpop.trf.xlu0 }
0x16a7   : > { %v6322_v59 = vsel %vm1131_vm1, %v6321_v22, %v9941_v44 }
0x16a8   : > { %v6326_v3 = vperm.slane %v6322_v59, %v10544_v23 }
0x16a9   : > { %v9945_v34 = vpop.trf.xlu1 }
0x16aa   : > { %v6327_v31 = vrot.slane %v6326_v3, 4  ;;  %v6335_v38 = vrot.slane %v9945_v34, 4 }
0x16ae   : > { %v9942_v5 = vpop.trf.xlu0 }
0x16af   : > { %v6342_v37 = vsel %vm1131_vm1, %v6341_v14, %v9942_v5 }
0x16b0   : > { %v6346_v39 = vperm.slane %v6342_v37, %v10544_v23 }
0x16b2   : > { %v6347_v27 = vrot.slane %v6346_v39, 4 }
0x16dc   : > { %v5952_v10 = vpop.xlane.xlu2 %5951 }
0x16dd   : > { %10164 = vrcp.f32 %v5952_v10  ;;  %v10098_v10 = vld [vmem:[%s10381_s20 + $0x1] ss:$0 sm:$0xff] }
0x16e3   : > { %v10165_v40 = vpop.eup %10164 }
0x16e4   : > { %v5955_v47 = vpop.xlane.xlu2 %5954  ;;  %v5964_v62 = vmul.f32 %v10165_v40, %v10161_v8 }
0x16e5   : > { %10166 = vrcp.f32 %v5955_v47 }
0x16e6   : > { %v5968_v63 = vpack.c.bf16 %v5964_v62, %v5964_v62 }
0x16e8   : > { %v6390_v48 = vsel %vm1792_vm3, %v5968_v63, 0 }
0x16e9   : > { %6399 = vmatpush.bf16.xpose.msra.mxu1 %v6390_v48 }
0x16eb   : > { %v10167_v7 = vpop.eup %10166 }
0x16ec   : > { %v5965_v20 = vmul.f32 %v10167_v7, %v10163_v57 }
0x16ee   : > { %v5969_v19 = vpack.c.bf16 %v5965_v20, %v5965_v20 }
0x16f0   : > { %v6409_v21 = vsel %vm1792_vm3, %v5969_v19, 0 }
0x16f1   : > { %6418 = vmatpush.bf16.xpose.msra.mxu2 %v6409_v21 }
0x16f9   : > { %6846 = vmatpush.bf16.msrb.mxu2 %v9618_v53 }
0x16fd   : > { %6847 = vmatpush.bf16.msrb.mxu2 %v9617_v11 }
0x173b   : > { %v9947_v30 = vpop.trf.xlu2 }
0x173c   : > { %v6316_v9 = vsel %vm1131_vm1, %v6315_v25, %v9947_v30 }
0x173d   : > { %v6320_v32 = vperm.slane %v6316_v9, %v10544_v23 }
0x173f   : > { %v6328_v28 = vsel %vm1131_vm1, %v6327_v31, %v6320_v32 }
0x1740   : > { %v6332_v42 = vperm.slane %v6328_v28, %v10552_v35 }
0x1742   : > { %v6333_v49 = vrot.slane %v6332_v42, 4  ;;  %v6358_v29 = vshrl.u32 %v6332_v42, 16 }
0x1743   : > { %v9948_v43 = vpop.trf.xlu2 }
0x1744   : > { %v6336_v45 = vsel %vm1131_vm1, %v6335_v38, %v9948_v43  ;;  %v6334_v55 = vsel %vm1131_vm1, 0, %v6333_v49 }
0x1745   : > { %v6340_v51 = vperm.slane %v6336_v45, %v10544_v23  ;;  %v6364_v60 = vshrl.u32 %v6334_v55, 16 }
0x1747   : > { %v6348_v50 = vsel %vm1131_vm1, %v6347_v27, %v6340_v51 }
0x1748   : > { %v6352_v18 = vperm.slane %v6348_v50, %v10552_v35 }
0x174a   : > { %v6353_v54 = vrot.slane %v6352_v18, 4  ;;  %v6359_v24 = vshrl.u32 %v6352_v18, 16  ;;  %v6357_v36 = vpack.i.b16 %v6352_v18, %v6332_v42 }
0x174c   : > { %9449 = vmatmul.msk.bf16.vlgmr.msra.gmra.mxu0 %vm1792_vm3, %v6357_v36  ;;  %v6360_v52 = vpack.i.b16 %v6359_v24, %v6358_v29  ;;  %v6354_v41 = vsel %vm1131_vm1, 0, %v6353_v54 }
0x174d   : > { %v6363_v46 = vpack.i.b16 %v6354_v41, %v6334_v55  ;;  %v6365_v61 = vshrl.u32 %v6354_v41, 16 }
0x174e   : > { %9450 = vmatmul.msk.bf16.vlgmr.msra.gmra.mxu1 %vm1792_vm3, %v6360_v52 }
0x174f   : > { %9451 = vmatmul.msk.bf16.vlgmr.msra.gmra.mxu2 %vm1792_vm3, %v6363_v46  ;;  %v6366_v0 = vpack.i.b16 %v6365_v61, %v6364_v60 }
0x1751   : > { %9452 = vmatmul.msk.bf16.vlgmr.msrb.gmra.mxu3 %vm1792_vm3, %v6366_v0 }
0x175f   : > { %9501 = vmatmul.msk.bf16.vlgmr.msrb.gmra.mxu2 %vm1047_vm0, %v10772_v17 }
0x17c9   : > { %v6382_v1 = vpop.f32.mrf.mxu0 }
0x17cb   : > { %v6401_v2 = vpop.f32.mrf.mxu1 }
0x17d1   : > { %v6384_v4 = vpop.f32.mrf.mxu0 }
0x17d2   : > { %v6420_v12 = vpop.f32.mrf.mxu2 }
0x17d3   : > { %v9949_v13 = vpack.i.bf16 %v6382_v1, %v6420_v12  ;;  %v6403_v8 = vpop.f32.mrf.mxu1 }
0x17d4   : > { %v6439_v26 = vpop.f32.mrf.mxu3 }
0x17d5   : > { %v9956_v57 = vpack.i.bf16 %v6401_v2, %v6439_v26  ;;  %9950 = vxpose.xlu0.b32.start.end [1/1] (short) (narrow) %v9949_v13, 8 }
0x17d7   : > { %9957 = vxpose.xlu2.b32.start.end [1/1] (short) (narrow) %v9956_v57, 8 }
0x17da   : > { %v6422_v56 = vpop.f32.mrf.mxu2 }
0x17dc   : > { %v6441_v15 = vpop.f32.mrf.mxu3 }
0x17e2   : > { %v6849_v16 = vpop.f32.mrf.mxu2 }
0x17e3   : > { %v11553_v47 = vadd.f32 %v10098_v10, %v6849_v16 }
0x17ea   : > { %v6851_v40 = vpop.f32.mrf.mxu2 }
0x17eb   : > { %v11555_v62 = vadd.f32 %v10098_v10, %v6851_v40 }
0x17ed   : > { %v9963_v63 = vpack.i.bf16 %v11555_v62, %v11553_v47 }
0x1840   : > { %9964 = vrot.lane.b32.xlu2 %v9963_v63, %s12173_s9 }
0x1848   : > { %9969 = vrot.lane.b32.xlu2 %v9963_v63, %s12174_s18 }
0x1850   : > { %9974 = vrot.lane.b32.xlu2 %v9963_v63, %s12172_s16 }
0x1870   : > { %v9958_v48 = vpop.trf.xlu2 }
0x1871   : > { %v9962_v7 = vunpack.i.h.bf16 %v9958_v48  ;;  %v9959_v20 = vunpack.i.l.bf16 %v9958_v48 }
0x1873   : > { %v6585_v19 = vrot.slane %v9962_v7, 4  ;;  %v6583_v21 = vrot.slane %v9959_v20, 4 }
0x1875   : > { %v6584_v44 = vsel %vm1131_vm1, %v6583_v21, %v9962_v7  ;;  %v6586_v53 = vsel %vm1131_vm1, %v9959_v20, %v6585_v19 }
0x1876   : > { %v6590_v6 = vperm.slane %v6584_v44, %v10544_v23  ;;  %v6594_v11 = vperm.slane %v6586_v53, %v10544_v23 }
0x1878   : > { %v6595_v5 = vrot.slane %v6590_v6, 4  ;;  %v6607_v30 = vrot.slane %v6594_v11, 4 }
0x1879   : > { %v9951_v22 = vpop.trf.xlu0 }
0x187a   : > { %v9955_v59 = vunpack.i.h.bf16 %v9951_v22  ;;  %v9952_v25 = vunpack.i.l.bf16 %v9951_v22 }
0x187c   : > { %v6573_v3 = vrot.slane %v9955_v59, 4  ;;  %v6571_v14 = vrot.slane %v9952_v25, 4 }
0x187e   : > { %v6572_v9 = vsel %vm1131_vm1, %v6571_v14, %v9955_v59  ;;  %v6574_v31 = vsel %vm1131_vm1, %v9952_v25, %v6573_v3 }
0x187f   : > { %v6578_v32 = vperm.slane %v6572_v9, %v10544_v23  ;;  %v6582_v34 = vperm.slane %v6574_v31, %v10544_v23 }
0x1881   : > { %v6597_v37 = vrot.slane %v6578_v32, 4  ;;  %v6609_v28 = vrot.slane %v6582_v34, 4  ;;  %v6596_v38 = vsel %vm1131_vm1, %v6595_v5, %v6578_v32  ;;  %v6608_v39 = vsel %vm1131_vm1, %v6607_v30, %v6582_v34 }
0x1882   : > { %v6602_v42 = vperm.slane %v6596_v38, %v10552_v35  ;;  %v6614_v43 = vperm.slane %v6608_v39, %v10552_v35 }
0x1883   : > { %v6598_v45 = vsel %vm1131_vm1, %v6590_v6, %v6597_v37  ;;  %v6610_v27 = vsel %vm1131_vm1, %v6594_v11, %v6609_v28 }
0x1884   : > { %v6606_v51 = vperm.slane %v6598_v45, %v10552_v35  ;;  %v6618_v49 = vperm.slane %v6610_v27, %v10552_v35  ;;  %v6619_v29 = vrot.slane %v6602_v42, 4  ;;  %v6623_v54 = vrot.slane %v6614_v43, 4 }
0x1886   : > { %v6621_v50 = vrot.slane %v6606_v51, 4  ;;  %v6625_v18 = vrot.slane %v6618_v49, 4  ;;  %v6620_v0 = vsel %vm1131_vm1, 0.0, %v6619_v29  ;;  %v6624_v1 = vsel %vm1131_vm1, 0.0, %v6623_v54 }
0x1888   : > { %v6622_v24 = vsel %vm1131_vm1, 0.0, %v6621_v50  ;;  %v6626_v36 = vsel %vm1131_vm1, 0.0, %v6625_v18  ;;  %v6627_v55 = vsel %vm1131_vm1, %v6621_v50, %v6602_v42  ;;  %v6638_v52 = vsel %vm1131_vm1, %v6625_v18, %v6614_v43 }
0x1889   : > { %v6632_v41 = vrot.slane %v6622_v24, 4  ;;  %v6631_v46 = vperm.slane %v6627_v55, %v10544_v23  ;;  %v6642_v60 = vperm.slane %v6638_v52, %v10544_v23  ;;  %v6643_v61 = vrot.slane %v6626_v36, 4 }
0x188a   : > { %v6979_v42 = vrot.slane %v11553_v47, 4 }
0x188b   : > { %v6633_v2 = vsel %vm1131_vm1, %v6632_v41, %v6620_v0  ;;  %v6644_v4 = vsel %vm1131_vm1, %v6643_v61, %v6624_v1  ;;  %v6651_v12 = vrot.slane %v6631_v46, 4  ;;  %v6663_v13 = vrot.slane %v6642_v60, 4 }
0x188c   : > { %v6637_v8 = vperm.slane %v6633_v2, %v10544_v23  ;;  %v6648_v26 = vperm.slane %v6644_v4, %v10544_v23  ;;  %v7035_v41 = vrot.slane %v11555_v62, 4 }
0x188e   : > { %v6652_v57 = vsel %vm1131_vm1, %v6637_v8, %v6651_v12  ;;  %v6664_v56 = vsel %vm1131_vm1, %v6648_v26, %v6663_v13  ;;  %v6649_v15 = vrot.slane %v6637_v8, 4  ;;  %v6661_v16 = vrot.slane %v6648_v26, 4 }
0x188f   : > { %v6660_v10 = vperm.slane %v6652_v57, %v10552_v35  ;;  %v6672_v40 = vperm.slane %v6664_v56, %v10552_v35 }
0x1890   : > { %v6650_v63 = vsel %vm1131_vm1, %v6649_v15, %v6631_v46  ;;  %v6662_v48 = vsel %vm1131_vm1, %v6661_v16, %v6642_v60 }
0x1891   : > { %v6679_v7 = vrot.slane %v6660_v10, 4  ;;  %v6677_v20 = vrot.slane %v6672_v40, 4  ;;  %v6656_v19 = vperm.slane %v6650_v63, %v10552_v35  ;;  %v6668_v21 = vperm.slane %v6662_v48, %v10552_v35 }
0x1893   : > { %v6680_v44 = vsel %vm1131_vm1, %v6672_v40, %v6679_v7  ;;  %v6678_v53 = vsel %vm1131_vm1, %v6677_v20, %v6660_v10  ;;  %v6675_v22 = vrot.slane %v6656_v19, 4  ;;  %v6673_v6 = vrot.slane %v6668_v21, 4 }
0x1894   : > { %6690 = vrot.lane.b32.xlu1 %v6680_v44, %s12185_s28  ;;  %6686 = vrot.lane.b32.xlu2 %v6678_v53, %s12186_s7 }
0x1895   : > { %v6676_v11 = vsel %vm1131_vm1, %v6668_v21, %v6675_v22  ;;  %v11604_v59 = vsel %vm1131_vm1, %v6673_v6, %v6656_v19 }
0x1896   : > { %6682 = vrot.lane.b32.xlu0 %v6676_v11, %s12188_s30 }
0x189a   : > { %v9965_v25 = vpop.permute.xlu2 %9964 }
0x189b   : > { %v9966_v3 = vunpack.i.l.bf16 %v9965_v25  ;;  %v9967_v34 = vunpack.i.h.bf16 %v9965_v25 }
0x189d   : > { %v6991_v14 = vrot.slane %v9966_v3, 4  ;;  %v7047_v43 = vrot.slane %v9967_v34, 4 }
0x18a2   : > { %v9970_v5 = vpop.permute.xlu2 %9969 }
0x18a3   : > { %v9971_v30 = vunpack.i.l.bf16 %v9970_v5  ;;  %v9972_v45 = vunpack.i.h.bf16 %v9970_v5 }
0x18a5   : > { %v6989_v9 = vrot.slane %v9971_v30, 4  ;;  %v6992_v31 = vsel %vm1131_vm1, %v9971_v30, %v6991_v14  ;;  %v7048_v54 = vsel %vm1131_vm1, %v9972_v45, %v7047_v43  ;;  %v7045_v48 = vrot.slane %v9972_v45, 4 }
0x18a6   : > { %v7000_v37 = vperm.slane %v6992_v31, %v10544_v23  ;;  %v7056_v60 = vperm.slane %v7048_v54, %v10544_v23 }
0x18a7   : > { %v6990_v32 = vsel %vm1131_vm1, %v6989_v9, %v9966_v3  ;;  %v7046_v21 = vsel %vm1131_vm1, %v7045_v48, %v9967_v34 }
0x18a8   : > { %v6996_v28 = vperm.slane %v6990_v32, %v10544_v23  ;;  %v7013_v27 = vrot.slane %v7000_v37, 4  ;;  %v7069_v13 = vrot.slane %v7056_v60, 4  ;;  %v7052_v11 = vperm.slane %v7046_v21, %v10544_v23 }
0x18aa   : > { %v9975_v38 = vpop.permute.xlu2 %9974  ;;  %v7001_v50 = vrot.slane %v6996_v28, 4  ;;  %v7057_v9 = vrot.slane %v7052_v11, 4 }
0x18ab   : > { %v9976_v39 = vunpack.i.l.bf16 %v9975_v38  ;;  %v9977_v24 = vunpack.i.h.bf16 %v9975_v38 }
0x18ad   : > { %v6977_v51 = vrot.slane %v9976_v39, 4  ;;  %v6980_v49 = vsel %vm1131_vm1, %v9976_v39, %v6979_v42  ;;  %v7033_v44 = vrot.slane %v9977_v24, 4 }
0x18ae   : > { %v6988_v18 = vperm.slane %v6980_v49, %v10544_v23 }
0x18af   : > { %v6978_v29 = vsel %vm1131_vm1, %v6977_v51, %v11553_v47  ;;  %v7036_v47 = vsel %vm1131_vm1, %v9977_v24, %v7035_v41  ;;  %v7034_v25 = vsel %vm1131_vm1, %v7033_v44, %v11555_v62  ;;  %v10099_v44 = vld [vmem:[%s10361_s24 + $0x1] ss:$0 sm:$0xff] }
0x18b0   : > { %v6984_v36 = vperm.slane %v6978_v29, %v10544_v23  ;;  %v7014_v55 = vsel %vm1131_vm1, %v7013_v27, %v6988_v18  ;;  %v7015_v1 = vrot.slane %v6988_v18, 4  ;;  %v7044_v8 = vperm.slane %v7036_v47, %v10544_v23  ;;  %v9614_v27 = vld [vmem:[%s10356_s19 + $0x18] sm:$0xff]  ;;  %v9613_v47 = vld [vmem:[%s10356_s19 + $0x10] sm:$0xff] }
0x18b1   : > { %v7020_v52 = vperm.slane %v7014_v55, %v10552_v35  ;;  %v7040_v31 = vperm.slane %v7034_v25, %v10544_v23  ;;  %6721 = vmatpush.bf16.msrb.mxu0 %v9614_v27 }
0x18b2   : > { %v7002_v46 = vsel %vm1131_vm1, %v7001_v50, %v6984_v36  ;;  %v7003_v4 = vrot.slane %v6984_v36, 4  ;;  %v7016_v15 = vsel %vm1131_vm1, %v7000_v37, %v7015_v1  ;;  %v7070_v63 = vsel %vm1131_vm1, %v7069_v13, %v7044_v8  ;;  %v9620_v1 = vld [vmem:[%s10386_s27 + $0x18] sm:$0xff] }
0x18b3   : > { %v7008_v61 = vperm.slane %v7002_v46, %v10552_v35  ;;  %v7029_v0 = vrot.slane %v7020_v52, 4  ;;  %v7093_v16 = vpack.c.bf16 %v7020_v52, %v7020_v52  ;;  %v7024_v7 = vperm.slane %v7016_v15, %v10552_v35  ;;  %6875 = vmatpush.bf16.msra.mxu3 %v9620_v1 }
0x18b4   : > { %v7004_v40 = vsel %vm1131_vm1, %v6996_v28, %v7003_v4  ;;  %v7076_v19 = vperm.slane %v7070_v63, %v10552_v35  ;;  %v7071_v5 = vrot.slane %v7044_v8, 4  ;;  %v7058_v42 = vsel %vm1131_vm1, %v7057_v9, %v7040_v31  ;;  %v10100_v63 = vld [vmem:[%s12178_s26 + $0x1] ss:$0 sm:$0xff] }
0x18b5   : > { %v7025_v2 = vrot.slane %v7008_v61, 4  ;;  %v7030_v12 = vsel %vm1131_vm1, 0.0, %v7029_v0  ;;  %v7089_v57 = vpack.c.bf16 %v7008_v61, %v7008_v61  ;;  %v7012_v20 = vperm.slane %v7004_v40, %v10552_v35  ;;  %6722 = vmatpush.bf16.msrb.mxu0 %v9613_v47 }
0x18b6   : > { %v7094_v10 = vpack.c.bf16 %v7030_v12, %v7030_v12  ;;  %v7031_v53 = vrot.slane %v7024_v7, 4  ;;  %v7085_v6 = vrot.slane %v7076_v19, 4  ;;  %v7095_v32 = vpack.c.bf16 %v7024_v7, %v7024_v7 }
0x18b7   : > { %v7026_v26 = vsel %vm1131_vm1, 0.0, %v7025_v2  ;;  %v7027_v22 = vrot.slane %v7012_v20, 4  ;;  %v7091_v37 = vpack.c.bf16 %v7012_v20, %v7012_v20  ;;  %v7101_v38 = vpack.c.bf16 %v7076_v19, %v7076_v19  ;;  %v9619_v2 = vld [vmem:[%s10386_s27 + $0x10] sm:$0xff] }
0x18b8   : > { %v7090_v56 = vpack.c.bf16 %v7026_v26, %v7026_v26  ;;  %v7032_v3 = vsel %vm1131_vm1, 0.0, %v7031_v53  ;;  %v7086_v30 = vsel %vm1131_vm1, 0.0, %v7085_v6  ;;  %v7072_v62 = vsel %vm1131_vm1, %v7056_v60, %v7071_v5  ;;  %6876 = vmatpush.bf16.msra.mxu3 %v9619_v2 }
0x18b9   : > { %v7028_v14 = vsel %vm1131_vm1, 0.0, %v7027_v22  ;;  %v7096_v34 = vpack.c.bf16 %v7032_v3, %v7032_v3  ;;  %v7102_v39 = vpack.c.bf16 %v7086_v30, %v7086_v30  ;;  %v7080_v43 = vperm.slane %v7072_v62, %v10552_v35 }
0x18ba   : > { %9984 = vxpose.binary.xlu0.c.b16.start.end [1/2] (short) (narrow) %v7090_v56, %v7089_v57, 16  ;;  %v7092_v28 = vpack.c.bf16 %v7028_v14, %v7028_v14  ;;  %v7064_v45 = vperm.slane %v7058_v42, %v10552_v35  ;;  %v7059_v29 = vrot.slane %v7040_v31, 4 }
0x18bb   : > { %9981 = vxpose.binary.xlu2.c.b16.start.end [1/2] (short) (narrow) %v7094_v10, %v7093_v16, 16  ;;  %v7087_v51 = vrot.slane %v7080_v43, 4  ;;  %v7103_v54 = vpack.c.bf16 %v7080_v43, %v7080_v43 }
0x18bc   : > { %v7081_v49 = vrot.slane %v7064_v45, 4  ;;  %v7097_v36 = vpack.c.bf16 %v7064_v45, %v7064_v45  ;;  %v7060_v52 = vsel %vm1131_vm1, %v7052_v11, %v7059_v29  ;;  %9510 = vmatmul.msk.bf16.vlgmr.msra.gmra.mxu3 %vm1047_vm0, %v10772_v17 }
0x18bd   : > { %v7088_v50 = vsel %vm1131_vm1, 0.0, %v7087_v51  ;;  %v7068_v41 = vperm.slane %v7060_v52, %v10552_v35 }
0x18be   : > { %v7082_v18 = vsel %vm1131_vm1, 0.0, %v7081_v49  ;;  %v7104_v24 = vpack.c.bf16 %v7088_v50, %v7088_v50 }
0x18bf   : > { %v7098_v55 = vpack.c.bf16 %v7082_v18, %v7082_v18  ;;  %v7083_v46 = vrot.slane %v7068_v41, 4  ;;  %v7099_v61 = vpack.c.bf16 %v7068_v41, %v7068_v41 }
0x18c1   : > { %v7084_v60 = vsel %vm1131_vm1, 0.0, %v7083_v46 }
0x18c2   : > { %v7100_v0 = vpack.c.bf16 %v7084_v60, %v7084_v60 }
0x18c9   : > { %9978 = vxpose.binary.xlu1.c.b16.start.end [1/2] (short) (narrow) %v7096_v34, %v7095_v32, 16 }
0x18ca   : > { %9987 = vxpose.binary.xlu0.c.b16.start.end [1/2] (short) (narrow) %v7092_v28, %v7091_v37, 16 }
0x18cb   : > { %9993 = vxpose.binary.xlu2.c.b16.start.end [1/2] (short) (narrow) %v7102_v39, %v7101_v38, 16 }
0x18da   : > { %9990 = vxpose.binary.xlu0.c.b16.start.end [1/2] (short) (narrow) %v7104_v24, %v7103_v54, 16 }
0x18db   : > { %9996 = vxpose.binary.xlu2.c.b16.start.end [1/2] (short) (narrow) %v7098_v55, %v7097_v36, 16 }
0x18eb   : > { %9999 = vxpose.binary.xlu2.c.b16.start.end [1/2] (short) (narrow) %v7100_v0, %v7099_v61, 16 }
0x18ee   : > { %v6687_v12 = vpop.permute.xlu2 %6686 }
0x1906   : > { %v6691_v8 = vpop.permute.xlu1 %6690 }
0x1908   : > { %v6683_v4 = vpop.permute.xlu0 %6682 }
0x1909   : > { %v6693_v13 = vsel %vm1792_vm3, %v11604_v59, %v6683_v4 }
0x190a   : > { %v6694_v26 = vsel %vm2641_vm4, %v6693_v13, %v6687_v12 }
0x190b   : > { %v6695_v57 = vsel %vm2643_vm5, %v6694_v26, %v6691_v8 }
0x190c   : > { %v6696_v56 = vpack.c.bf16 %v6695_v57, %v6695_v57 }
0x190e   : > { %9461 = vmatmul.msk.bf16.vlgmr.msrb.gmra.mxu0 %vm1047_vm0, %v6696_v56 }
0x193f   : > { %v6878_v10 = vpop.f32.mrf.mxu3 }
0x1940   : > { %v11663_v48 = vadd.f32 %v10100_v63, %v6878_v10 }
0x1947   : > { %v6880_v7 = vpop.f32.mrf.mxu3 }
0x1948   : > { %v11665_v59 = vadd.f32 %v10100_v63, %v6880_v7 }
0x194a   : > { %v11669_v19 = vpack.i.bf16 %v11665_v59, %v11663_v48 }
0x1954   : > { %10017 = vrot.lane.b32.xlu2 %v11669_v19, %s12174_s18 }
0x195c   : > { %v9982_v15 = vpop.trf.xlu2 }
0x195d   : > { %v7561_v37 = vrot.slane %v9982_v15, 4 }
0x1964   : > { %v9983_v40 = vpop.trf.xlu2 }
0x1965   : > { %v7617_v27 = vrot.slane %v9983_v40, 4 }
0x1966   : > { %v9985_v16 = vpop.trf.xlu0 }
0x1967   : > { %v7562_v42 = vsel %vm1131_vm1, %v7561_v37, %v9985_v16 }
0x1968   : > { %v7566_v49 = vperm.slane %v7562_v42, %v10544_v23 }
0x196a   : > { %v7587_v55 = vrot.slane %v7566_v49, 4 }
0x196c   : > { %v9994_v20 = vpop.trf.xlu2 }
0x196d   : > { %v7573_v28 = vrot.slane %v9994_v20, 4 }
0x196e   : > { %v9986_v17 = vpop.trf.xlu0 }
0x196f   : > { %v7618_v24 = vsel %vm1131_vm1, %v7617_v27, %v9986_v17 }
0x1970   : > { %v7622_v46 = vperm.slane %v7618_v24, %v10544_v23 }
0x1972   : > { %v7643_v26 = vrot.slane %v7622_v46, 4 }
0x1974   : > { %v9995_v22 = vpop.trf.xlu2 }
0x1975   : > { %v9979_v11 = vpop.trf.xlu1  ;;  %v7629_v18 = vrot.slane %v9995_v22, 4 }
0x1976   : > { %v9988_v21 = vpop.trf.xlu0  ;;  %v7567_v32 = vrot.slane %v9979_v11, 4 }
0x197c   : > { %v9997_v31 = vpop.trf.xlu2 }
0x197d   : > { %v9980_v34 = vpop.trf.xlu1  ;;  %v7574_v43 = vsel %vm1131_vm1, %v7573_v28, %v9997_v31 }
0x197e   : > { %v9989_v5 = vpop.trf.xlu0  ;;  %v7623_v38 = vrot.slane %v9980_v34, 4  ;;  %v7578_v50 = vperm.slane %v7574_v43, %v10544_v23 }
0x1980   : > { %v7624_v51 = vsel %vm1131_vm1, %v7623_v38, %v9989_v5  ;;  %v7599_v52 = vrot.slane %v7578_v50, 4 }
0x1981   : > { %v7628_v36 = vperm.slane %v7624_v51, %v10544_v23 }
0x1983   : > { %v7641_v2 = vrot.slane %v7628_v36, 4 }
0x1984   : > { %v9998_v39 = vpop.trf.xlu2 }
0x1985   : > { %v7630_v60 = vsel %vm1131_vm1, %v7629_v18, %v9998_v39  ;;  %v7642_v16 = vsel %vm1131_vm1, %v7641_v2, %v7622_v46  ;;  %v9616_v2 = vld [vmem:[%s12175_s15 + $0x18] sm:$0xff] }
0x1986   : > { %v9991_v62 = vpop.trf.xlu0  ;;  %v7634_v4 = vperm.slane %v7630_v60, %v10544_v23  ;;  %6818 = vmatpush.bf16.msrb.mxu1 %v9616_v2 }
0x1987   : > { %v7579_v29 = vrot.slane %v9991_v62, 4 }
0x1988   : > { %v7655_v10 = vrot.slane %v7634_v4, 4 }
0x198b   : > { %v6724_v53 = vpop.f32.mrf.mxu0 }
0x198c   : > { %v6725_v6 = vadd.f32 %v10099_v44, %v6724_v53  ;;  %v10000_v41 = vpop.trf.xlu2  ;;  %v7648_v44 = vperm.slane %v7642_v16, %v10552_v35 }
0x198d   : > { %v7580_v0 = vsel %vm1131_vm1, %v7579_v29, %v10000_v41 }
0x198e   : > { %v11675_v25 = vadd.f32 %v6725_v6, %v11288_v58  ;;  %v7568_v58 = vsel %vm1131_vm1, %v7567_v32, %v9988_v21  ;;  %v7584_v47 = vperm.slane %v7580_v0, %v10544_v23  ;;  %v9992_v1 = vpop.trf.xlu0  ;;  %v7644_v21 = vsel %vm1131_vm1, %v7628_v36, %v7643_v26 }
0x198f   : > { %v7572_v45 = vperm.slane %v7568_v58, %v10544_v23  ;;  %v7635_v15 = vrot.slane %v9992_v1, 4  ;;  %v7652_v11 = vperm.slane %v7644_v21, %v10552_v35  ;;  %v7667_v5 = vrot.slane %v7648_v44, 4  ;;  %v10101_v21 = vld [vmem:[%s12176_s5 + $0x1] ss:$0 sm:$0xff] }
0x1990   : > { %v6733_v3 = vsel %vm1047_vm0, %v11675_v25, 0.0  ;;  %v6737_v14 = vmul.f32 %v11675_v25, %v11675_v25  ;;  %v7597_v13 = vrot.slane %v7584_v47, 4  ;;  %v7600_v8 = vsel %vm1131_vm1, %v7584_v47, %v7599_v52 }
0x1991   : > { %6734 = vadd.xlane.f32.xlu0 %v6733_v3  ;;  %v7585_v54 = vrot.slane %v7572_v45, 4  ;;  %v7588_v57 = vsel %vm1131_vm1, %v7572_v45, %v7587_v55  ;;  %v7608_v56 = vperm.slane %v7600_v8, %v10552_v35  ;;  %v7671_v18 = vrot.slane %v7652_v11, 4 }
0x1992   : > { %v6738_v30 = vsel %vm1047_vm0, %v6737_v14, 0.0  ;;  %v7596_v40 = vperm.slane %v7588_v57, %v10552_v35  ;;  %v7598_v17 = vsel %vm1131_vm1, %v7597_v13, %v7578_v50 }
0x1993   : > { %v6726_v9 = vpop.f32.mrf.mxu0  ;;  %6739 = vadd.xlane.f32.xlu1 %v6738_v30  ;;  %v7586_v61 = vsel %vm1131_vm1, %v7585_v54, %v7566_v49  ;;  %v7613_v20 = vrot.slane %v7608_v56, 4  ;;  %v7604_v6 = vperm.slane %v7598_v17, %v10552_v35 }
0x1994   : > { %v7592_v12 = vperm.slane %v7586_v61, %v10552_v35  ;;  %v10001_v7 = vpop.trf.xlu2  ;;  %v7615_v49 = vrot.slane %v7596_v40, 4 }
0x1995   : > { %v7636_v53 = vsel %vm1131_vm1, %v7635_v15, %v10001_v7  ;;  %v7614_v9 = vsel %vm1131_vm1, %v7613_v20, %v7596_v40  ;;  %v7609_v50 = vrot.slane %v7604_v6, 4 }
0x1996   : > { %v7611_v63 = vrot.slane %v7592_v12, 4  ;;  %v7640_v22 = vperm.slane %v7636_v53, %v10544_v23  ;;  %v7693_v28 = vshrl.u32 %v7614_v9, 16  ;;  %v7616_v54 = vsel %vm1131_vm1, %v7608_v56, %v7615_v49 }
0x1997   : > { %v7610_v36 = vsel %vm1131_vm1, %v7609_v50, %v7592_v12  ;;  %v7701_v60 = vshrl.u32 %v7616_v54, 16 }
0x1998   : > { %v7653_v3 = vrot.slane %v7640_v22, 4  ;;  %v7656_v14 = vsel %vm1131_vm1, %v7640_v22, %v7655_v10  ;;  %v7612_v31 = vsel %vm1131_vm1, %v7604_v6, %v7611_v63  ;;  %v7677_v41 = vshrl.u32 %v7610_v36, 16  ;;  %v10102_v22 = vld [vmem:[%s12177_s10 + $0x1] ss:$0 sm:$0xff] }
0x1999   : > { %v7664_v30 = vperm.slane %v7656_v14, %v10552_v35  ;;  %v7685_v58 = vshrl.u32 %v7612_v31, 16  ;;  %v10103_v14 = vld [vmem:[%s12180_s11 + $0x1] ss:$0 sm:$0xff] }
0x199a   : > { %v7654_v32 = vsel %vm1131_vm1, %v7653_v3, %v7634_v4  ;;  %v9615_v4 = vld [vmem:[%s12175_s15 + $0x10] sm:$0xff] }
0x199b   : > { %v7660_v34 = vperm.slane %v7654_v32, %v10552_v35  ;;  %v7669_v37 = vrot.slane %v7664_v30, 4  ;;  %v7672_v24 = vsel %vm1131_vm1, %v7664_v30, %v7671_v18  ;;  %6819 = vmatpush.bf16.msrb.mxu1 %v9615_v4 }
0x199c   : > { %v7702_v61 = vshrl.u32 %v7672_v24, 16  ;;  %v7699_v47 = vpack.i.b16 %v7672_v24, %v7616_v54 }
0x199d   : > { %v7670_v38 = vsel %vm1131_vm1, %v7669_v37, %v7652_v11  ;;  %v7668_v39 = vsel %vm1131_vm1, %v7660_v34, %v7667_v5  ;;  %v7665_v29 = vrot.slane %v7660_v34, 4 }
0x199e   : > { %v7694_v62 = vshrl.u32 %v7670_v38, 16  ;;  %v7683_v42 = vpack.i.b16 %v7668_v39, %v7612_v31  ;;  %v7686_v43 = vshrl.u32 %v7668_v39, 16  ;;  %v7691_v45 = vpack.i.b16 %v7670_v38, %v7614_v9 }
0x199f   : > { %v7666_v55 = vsel %vm1131_vm1, %v7665_v29, %v7648_v44  ;;  %v7703_v1 = vpack.i.b16 %v7702_v61, %v7701_v60 }
0x19a0   : > { %v7695_v27 = vpack.i.b16 %v7694_v62, %v7693_v28  ;;  %v7687_v51 = vpack.i.b16 %v7686_v43, %v7685_v58  ;;  %v7675_v52 = vpack.i.b16 %v7666_v55, %v7610_v36  ;;  %v7678_v46 = vshrl.u32 %v7666_v55, 16 }
0x19a2   : > { %10021 = vxpose.binary.xlu2.c.b16.start.end [1/2] (short) (narrow) %v7687_v51, %v7683_v42, 16  ;;  %v7679_v0 = vpack.i.b16 %v7678_v46, %v7677_v41 }
0x19ae   : > { %v11742_v32 = vpop.permute.xlu2 %10017 }
0x19ba   : > { %10005 = vxpose.binary.xlu0.c.b16.start.end [1/2] (short) (narrow) %v7695_v27, %v7691_v45, 16 }
0x19cd   : > { %10002 = vxpose.binary.xlu1.c.b16.start.end [1/2] (short) (narrow) %v7703_v1, %v7699_v47, 16 }
0x1a04   : > { %v6735_v13 = vpop.xlane.xlu0 %6734 }
0x1a05   : > { %v6736_v8 = vmul.f32 %v6735_v13, %v10910_v33 }
0x1a06   : > { %v6740_v26 = vpop.xlane.xlu1 %6739 }
0x1a07   : > { %v6742_v12 = vmul.f32 %v6736_v8, %v6736_v8  ;;  %v6741_v57 = vmul.f32 %v6740_v26, %v10910_v33  ;;  %v6744_v20 = vsub.f32 %v11675_v25, %v6736_v8 }
0x1a09   : > { %v6743_v56 = vsub.f32 %v6741_v57, %v6742_v12 }
0x1a0b   : > { %v6745_v15 = vadd.f32 1e-05, %v6743_v56 }
0x1a0d   : > { %10168 = vrsqrt.f32 %v6745_v15  ;;  %vm6752_vm8 = vweird.f32 %v6745_v15 }
0x1a13   : > { %v10169_v16 = vpop.eup %10168 }
0x1a14   : > { %v6747_v10 = vmul.f32 %v10169_v16, %v6745_v15  ;;  %vm6753_vm7 = vweird.f32 %v10169_v16 }
0x1a15   : > { %vm6754_vm9 = vmor %vm6752_vm8, %vm6753_vm7 }
0x1a16   : > { %v6748_v40 = vmul.f32 %v10169_v16, %v6747_v10 }
0x1a18   : > { %v6749_v63 = vmul.f32 0.5, %v6748_v40 }
0x1a1a   : > { %v6750_v17 = vsub.f32 1.5, %v6749_v63 }
0x1a1c   : > { %v6751_v7 = vmul.f32 %v10169_v16, %v6750_v17 }
0x1a1e   : > { %v6755_v44 = vsel %vm6754_vm9, %v10169_v16, %v6751_v7  ;;  %v10019_v7 = vunpack.i.l.bf16 %v11742_v32 }
0x1a1f   : > { %v6756_v53 = vmul.f32 %v6755_v44, %v6744_v20 }
0x1a21   : > { %v6760_v6 = vmul.f32 %v10101_v21, %v6756_v53  ;;  %v7137_v21 = vrot.slane %v10019_v7, 4 }
0x1a23   : > { %v11729_v11 = vadd.f32 %v10102_v22, %v6760_v6 }
0x1a25   : > { %v6793_v3 = vpack.c.bf16 %v11729_v11, %v11729_v11 }
0x1a27   : > { %9492 = vmatmul.msk.bf16.vlgmr.msrb.gmra.mxu1 %vm1047_vm0, %v6793_v3  ;;  %v7127_v3 = vrot.slane %v11663_v48, 4 }
0x1a43   : > { %v10022_v37 = vpop.trf.xlu2 }
0x1a4b   : > { %v10023_v27 = vpop.trf.xlu2 }
0x1a66   : > { %v10006_v38 = vpop.trf.xlu0 }
0x1a67   : > { %v7833_v62 = vrot.slane %v10006_v38, 4 }
0x1a6e   : > { %v10007_v50 = vpop.trf.xlu0 }
0x1a6f   : > { %v7853_v54 = vrot.slane %v10007_v50, 4 }
0x1a79   : > { %v10003_v31 = vpop.trf.xlu1 }
0x1a7a   : > { %v7839_v28 = vrot.slane %v10003_v31, 4 }
0x1a7c   : > { %v7840_v39 = vsel %vm1131_vm1, %v7839_v28, %v10022_v37 }
0x1a7d   : > { %v7844_v42 = vperm.slane %v7840_v39, %v10544_v23 }
0x1a81   : > { %v10004_v34 = vpop.trf.xlu1 }
0x1a82   : > { %v7859_v43 = vrot.slane %v10004_v34, 4 }
0x1a84   : > { %v7860_v18 = vsel %vm1131_vm1, %v7859_v43, %v10023_v27 }
0x1a85   : > { %v7864_v24 = vperm.slane %v7860_v18, %v10544_v23 }
0x1a87   : > { %v7865_v41 = vrot.slane %v7864_v24, 4 }
0x1aa4   : > { %v6821_v5 = vpop.f32.mrf.mxu1 }
0x1aa5   : > { %v11735_v30 = vadd.f32 %v10103_v14, %v6821_v5 }
0x1aa7   : > { %v10008_v25 = vpack.i.bf16 %v11663_v48, %v11735_v30 }
0x1aa9   : > { %10009 = vrot.lane.b32.xlu1 %v10008_v25, %s12173_s9 }
0x1aac   : > { %v6823_v9 = vpop.f32.mrf.mxu1 }
0x1ade   : > { %10013 = vxpose.binary.xlu1.c.b16.start.end [1/2] (short) (narrow) %v7679_v0, %v7675_v52, 16 }
0x1b1b   : > { %v11744_v58 = vpop.permute.xlu1 %10009 }
0x1b1c   : > { %v10012_v63 = vunpack.i.h.bf16 %v11744_v58 }
0x1b1e   : > { %v7139_v20 = vrot.slane %v10012_v63, 4  ;;  %v7138_v53 = vsel %vm1131_vm1, %v7137_v21, %v10012_v63 }
0x1b1f   : > { %v7144_v5 = vperm.slane %v7138_v53, %v10544_v23 }
0x1b20   : > { %v7140_v44 = vsel %vm1131_vm1, %v10019_v7, %v7139_v20 }
0x1b21   : > { %v7148_v22 = vperm.slane %v7140_v44, %v10544_v23  ;;  %v7149_v28 = vrot.slane %v7144_v5, 4 }
0x1b23   : > { %v7161_v31 = vrot.slane %v7148_v22, 4 }
0x1b38   : > { %10025 = vrot.lane.b32.xlu1 %v11669_v19, %s12172_s16  ;;  %v7845_v19 = vrot.slane %v7844_v42, 4 }
0x1b8a   : > { %v10014_v45 = vpop.trf.xlu1 }
0x1b8b   : > { %v7834_v51 = vsel %vm1131_vm1, %v7833_v62, %v10014_v45 }
0x1b8c   : > { %v7838_v49 = vperm.slane %v7834_v51, %v10544_v23 }
0x1b8e   : > { %v7846_v29 = vsel %vm1131_vm1, %v7845_v19, %v7838_v49 }
0x1b8f   : > { %v7850_v36 = vperm.slane %v7846_v29, %v10552_v35 }
0x1b91   : > { %v7851_v60 = vrot.slane %v7850_v36, 4  ;;  %v7876_v47 = vshrl.u32 %v7850_v36, 16 }
0x1b92   : > { %v10015_v55 = vpop.trf.xlu1 }
0x1b93   : > { %v7854_v52 = vsel %vm1131_vm1, %v7853_v54, %v10015_v55  ;;  %v7852_v4 = vsel %vm1131_vm1, 0, %v7851_v60 }
0x1b94   : > { %v7858_v46 = vperm.slane %v7854_v52, %v10544_v23  ;;  %v7882_v56 = vshrl.u32 %v7852_v4, 16 }
0x1b96   : > { %v7866_v61 = vsel %vm1131_vm1, %v7865_v41, %v7858_v46 }
0x1b97   : > { %v7870_v0 = vperm.slane %v7866_v61, %v10552_v35 }
0x1b99   : > { %v7875_v1 = vpack.i.b16 %v7870_v0, %v7850_v36  ;;  %v7877_v2 = vshrl.u32 %v7870_v0, 16  ;;  %v7871_v13 = vrot.slane %v7870_v0, 4 }
0x1b9b   : > { %v7889_v8 = vsel %vm1796_vm2, %v7875_v1, 0  ;;  %v7878_v26 = vpack.i.b16 %v7877_v2, %v7876_v47  ;;  %v7872_v12 = vsel %vm1131_vm1, 0, %v7871_v13 }
0x1b9c   : > { %7898 = vmatpush.bf16.msra.mxu0 %v7889_v8  ;;  %v7881_v57 = vpack.i.b16 %v7872_v12, %v7852_v4  ;;  %v7883_v15 = vshrl.u32 %v7872_v12, 16 }
0x1b9d   : > { %v7908_v16 = vsel %vm1796_vm2, %v7878_v26, 0  ;;  %v10020_v26 = vunpack.i.h.bf16 %v11742_v32 }
0x1b9e   : > { %7917 = vmatpush.bf16.msra.mxu1 %v7908_v16  ;;  %v7927_v10 = vsel %vm1796_vm2, %v7881_v57, 0  ;;  %v7884_v40 = vpack.i.b16 %v7883_v15, %v7882_v56  ;;  %v7183_v15 = vrot.slane %v11665_v59, 4 }
0x1b9f   : > { %7936 = vmatpush.bf16.msra.mxu2 %v7927_v10  ;;  %v7193_v57 = vrot.slane %v10020_v26, 4 }
0x1ba0   : > { %v7946_v17 = vsel %vm1796_vm2, %v7884_v40, 0 }
0x1ba1   : > { %7955 = vmatpush.bf16.msrb.mxu3 %v7946_v17 }
0x1baa   : > { %v10026_v6 = vpop.permute.xlu1 %10025 }
0x1bab   : > { %v10027_v14 = vunpack.i.l.bf16 %v10026_v6  ;;  %v10028_v8 = vunpack.i.h.bf16 %v10026_v6 }
0x1bad   : > { %v7125_v25 = vrot.slane %v10027_v14, 4  ;;  %v7128_v9 = vsel %vm1131_vm1, %v10027_v14, %v7127_v3  ;;  %v7181_v12 = vrot.slane %v10028_v8, 4  ;;  %v7184_v17 = vsel %vm1131_vm1, %v10028_v8, %v7183_v15 }
0x1bae   : > { %v7136_v34 = vperm.slane %v7128_v9, %v10544_v23  ;;  %v7192_v44 = vperm.slane %v7184_v17, %v10544_v23 }
0x1baf   : > { %v7126_v37 = vsel %vm1131_vm1, %v7125_v25, %v11663_v48  ;;  %v7182_v16 = vsel %vm1131_vm1, %v7181_v12, %v11665_v59 }
0x1bb0   : > { %v7132_v38 = vperm.slane %v7126_v37, %v10544_v23  ;;  %v7162_v39 = vsel %vm1131_vm1, %v7161_v31, %v7136_v34  ;;  %v7163_v62 = vrot.slane %v7136_v34, 4  ;;  %v11805_v32 = vperm.slane %v7182_v16, %v10544_v23 }
0x1bb1   : > { %v7168_v42 = vperm.slane %v7162_v39, %v10552_v35 }
0x1bb2   : > { %v7150_v43 = vsel %vm1131_vm1, %v7149_v28, %v7132_v38  ;;  %v7164_v27 = vsel %vm1131_vm1, %v7148_v22, %v7163_v62  ;;  %v7151_v46 = vrot.slane %v7132_v38, 4 }
0x1bb3   : > { %v7177_v45 = vrot.slane %v7168_v42, 4  ;;  %v7156_v51 = vperm.slane %v7150_v43, %v10552_v35  ;;  %v7172_v19 = vperm.slane %v7164_v27, %v10552_v35  ;;  %v7241_v50 = vpack.c.bf16 %v7168_v42, %v7168_v42 }
0x1bb4   : > { %v7152_v60 = vsel %vm1131_vm1, %v7144_v5, %v7151_v46  ;;  %v7219_v43 = vrot.slane %v7192_v44, 4  ;;  %v6895_v46 = vrot.slane %v11735_v30, 4 }
0x1bb5   : > { %v7178_v49 = vsel %vm1131_vm1, 0.0, %v7177_v45  ;;  %v7173_v48 = vrot.slane %v7156_v51, 4  ;;  %v7179_v29 = vrot.slane %v7172_v19, 4  ;;  %v7237_v36 = vpack.c.bf16 %v7156_v51, %v7156_v51 }
0x1bb6   : > { %v7242_v18 = vpack.c.bf16 %v7178_v49, %v7178_v49  ;;  %v7243_v52 = vpack.c.bf16 %v7172_v19, %v7172_v19  ;;  %v7160_v61 = vperm.slane %v7152_v60, %v10552_v35 }
0x1bb7   : > { %v7174_v54 = vsel %vm1131_vm1, 0.0, %v7173_v48  ;;  %v7180_v24 = vsel %vm1131_vm1, 0.0, %v7179_v29 }
0x1bb8   : > { %10029 = vxpose.binary.xlu1.c.b16.start.end [1/2] (short) (narrow) %v7242_v18, %v7241_v50, 16  ;;  %v7238_v55 = vpack.c.bf16 %v7174_v54, %v7174_v54  ;;  %v7244_v41 = vpack.c.bf16 %v7180_v24, %v7180_v24  ;;  %v7175_v0 = vrot.slane %v7160_v61, 4  ;;  %v7239_v1 = vpack.c.bf16 %v7160_v61, %v7160_v61 }
0x1bb9   : > { %v10011_v61 = vunpack.i.l.bf16 %v11744_v58 }
0x1bba   : > { %10032 = vxpose.binary.xlu2.c.b16.start.end [1/2] (short) (narrow) %v7238_v55, %v7237_v36, 16  ;;  %v7176_v47 = vsel %vm1131_vm1, 0.0, %v7175_v0 }
0x1bbb   : > { %10035 = vxpose.binary.xlu0.c.b16.start.end [1/2] (short) (narrow) %v7244_v41, %v7243_v52, 16  ;;  %v7240_v2 = vpack.c.bf16 %v7176_v47, %v7176_v47 }
0x1c29   : > { %7109 = vrot.lane.b32.xlu0 %v11665_v59, %s12173_s9  ;;  %s12201_s9 = sld [smem:[#allocation14_spill]] }
0x1c31   : > { %6887 = vrot.lane.b32.xlu0 %v11735_v30, %s12172_s16 }
0x1c53   : > { %10041 = vxpose.binary.xlu0.c.b16.start.end [1/2] (short) (narrow) %v7240_v2, %v7239_v1, 16  ;;  %v6907_v2 = vrot.slane %v10011_v61, 4 }
0x1c5b   : > { %v11825_v50 = vpop.trf.xlu2 }
0x1c63   : > { %v11829_v29 = vpop.trf.xlu2 }
0x1c64   : > { %v11827_v18 = vpop.trf.xlu1 }
0x1c67   : > { %v10036_v4 = vpop.trf.xlu0 }
0x1c68   : > { %v8271_v39 = vrot.slane %v10036_v4, 4 }
0x1c6c   : > { %v11831_v54 = vpop.trf.xlu1 }
0x1c6f   : > { %v11792_v13 = vpop.trf.xlu0 }
0x1c9b   : > { %v7110_v56 = vpop.permute.xlu0 %7109 }
0x1c9c   : > { %v7194_v10 = vsel %vm1131_vm1, %v7193_v57, %v7110_v56  ;;  %v7195_v40 = vrot.slane %v7110_v56, 4 }
0x1c9d   : > { %v11800_v63 = vperm.slane %v7194_v10, %v10544_v23 }
0x1c9e   : > { %v7196_v7 = vsel %vm1131_vm1, %v10020_v26, %v7195_v40 }
0x1c9f   : > { %v7204_v20 = vperm.slane %v7196_v7, %v10544_v23  ;;  %v7205_v21 = vrot.slane %v11800_v63, 4 }
0x1ca1   : > { %v7206_v59 = vsel %vm1131_vm1, %v7205_v21, %v11805_v32  ;;  %v7217_v53 = vrot.slane %v7204_v20, 4  ;;  %v7220_v45 = vsel %vm1131_vm1, %v7204_v20, %v7219_v43 }
0x1ca2   : > { %v7212_v22 = vperm.slane %v7206_v59, %v10552_v35  ;;  %v7228_v27 = vperm.slane %v7220_v45, %v10552_v35 }
0x1ca3   : > { %v7218_v6 = vsel %vm1131_vm1, %v7217_v53, %v7192_v44  ;;  %v6888_v38 = vpop.permute.xlu0 %6887 }
0x1ca4   : > { %v7229_v3 = vrot.slane %v7212_v22, 4  ;;  %v7224_v14 = vperm.slane %v7218_v6, %v10552_v35  ;;  %v7245_v25 = vpack.c.bf16 %v7212_v22, %v7212_v22  ;;  %v7235_v51 = vrot.slane %v7228_v27, 4 }
0x1ca5   : > { %v7251_v49 = vpack.c.bf16 %v7228_v27, %v7228_v27  ;;  %v6893_v60 = vrot.slane %v6888_v38, 4  ;;  %v6896_v0 = vsel %vm1131_vm1, %v6888_v38, %v6895_v46 }
0x1ca6   : > { %v7230_v5 = vsel %vm1131_vm1, 0.0, %v7229_v3  ;;  %v7233_v31 = vrot.slane %v7224_v14, 4  ;;  %v7249_v37 = vpack.c.bf16 %v7224_v14, %v7224_v14  ;;  %v7236_v19 = vsel %vm1131_vm1, 0.0, %v7235_v51 }
0x1ca7   : > { %v7246_v9 = vpack.c.bf16 %v7230_v5, %v7230_v5  ;;  %v7252_v48 = vpack.c.bf16 %v7236_v19, %v7236_v19  ;;  %v6894_v47 = vsel %vm1131_vm1, %v6893_v60, %v11735_v30  ;;  %v6904_v1 = vperm.slane %v6896_v0, %v10544_v23 }
0x1ca8   : > { %v7234_v34 = vsel %vm1131_vm1, 0.0, %v7233_v31  ;;  %v6900_v4 = vperm.slane %v6894_v47, %v10544_v23 }
0x1ca9   : > { %10044 = vxpose.binary.xlu1.c.b16.start.end [1/2] (short) (narrow) %v7246_v9, %v7245_v25, 16  ;;  %v7250_v28 = vpack.c.bf16 %v7234_v34, %v7234_v34  ;;  %v6931_v57 = vrot.slane %v6904_v1, 4 }
0x1caa   : > { %v6919_v58 = vrot.slane %v6900_v4, 4 }
0x1cab   : > { %10038 = vxpose.binary.xlu2.c.b16.start.end [1/2] (short) (narrow) %v7250_v28, %v7249_v37, 16 }
0x1cff   : > { %v10042_v62 = vpop.trf.xlu0 }
0x1d00   : > { %v11818_v42 = vsel %vm1131_vm1, %v8271_v39, %v10042_v62 }
0x1d14   : > { %6890 = vrot.lane.b32.xlu2 %v11735_v30, %s12174_s18  ;;  %s12202_s18 = sld [smem:[#allocation15_spill]] }
0x1d3a   : > { %10047 = vxpose.binary.xlu2.c.b16.start.end [1/2] (short) (narrow) %v7252_v48, %v7251_v49, 16 }
0x1d4c   : > { %v10039_v24 = vpop.trf.xlu2 }
0x1d4d   : > { %v8277_v36 = vrot.slane %v10039_v24, 4 }
0x1d54   : > { %v11836_v41 = vpop.trf.xlu2 }
0x1d55   : > { %v10045_v55 = vpop.trf.xlu1 }
0x1d56   : > { %v11834_v52 = vsel %vm1131_vm1, %v8277_v36, %v10045_v55 }
0x1d6e   : > { %v6891_v8 = vpop.permute.xlu2 %6890 }
0x1d6f   : > { %v6905_v26 = vrot.slane %v6891_v8, 4  ;;  %v6908_v12 = vsel %vm1131_vm1, %v6891_v8, %v6907_v2 }
0x1d70   : > { %v6916_v56 = vperm.slane %v6908_v12, %v10544_v23 }
0x1d71   : > { %v6906_v15 = vsel %vm1131_vm1, %v6905_v26, %v10011_v61 }
0x1d72   : > { %v6912_v16 = vperm.slane %v6906_v15, %v10544_v23  ;;  %v6929_v10 = vrot.slane %v6916_v56, 4  ;;  %v6932_v30 = vsel %vm1131_vm1, %v6916_v56, %v6931_v57 }
0x1d73   : > { %v6940_v40 = vperm.slane %v6932_v30, %v10552_v35 }
0x1d74   : > { %v6917_v17 = vrot.slane %v6912_v16, 4  ;;  %v6920_v7 = vsel %vm1131_vm1, %v6912_v16, %v6919_v58  ;;  %v6930_v20 = vsel %vm1131_vm1, %v6929_v10, %v6904_v1 }
0x1d75   : > { %v6928_v21 = vperm.slane %v6920_v7, %v10552_v35  ;;  %v6936_v44 = vperm.slane %v6930_v20, %v10552_v35  ;;  %v6947_v59 = vrot.slane %v6940_v40, 4  ;;  %v6955_v53 = vpack.c.bf16 %v6940_v40, %v6940_v40 }
0x1d76   : > { %v6918_v22 = vsel %vm1131_vm1, %v6917_v17, %v6900_v4 }
0x1d77   : > { %v6924_v6 = vperm.slane %v6918_v22, %v10552_v35  ;;  %v6943_v3 = vrot.slane %v6928_v21, 4  ;;  %v6945_v14 = vrot.slane %v6936_v44, 4  ;;  %v6948_v5 = vsel %vm1131_vm1, 0.0, %v6947_v59 }
0x1d78   : > { %v6951_v25 = vpack.c.bf16 %v6928_v21, %v6928_v21  ;;  %v6953_v9 = vpack.c.bf16 %v6936_v44, %v6936_v44  ;;  %v6956_v31 = vpack.c.bf16 %v6948_v5, %v6948_v5  ;;  %v7259_v34 = vrot.slane %v6955_v53, 4  ;;  %v10192_v44 = vld [vmem:[%s12182_s23] sm:$0xff] }
0x1d79   : > { %v6941_v37 = vrot.slane %v6924_v6, 4  ;;  %v6944_v28 = vsel %vm1131_vm1, 0.0, %v6943_v3  ;;  %v6946_v38 = vsel %vm1131_vm1, 0.0, %v6945_v14  ;;  %v6949_v39 = vpack.c.bf16 %v6924_v6, %v6924_v6 }
0x1d7a   : > { %v6952_v62 = vpack.c.bf16 %v6944_v28, %v6944_v28  ;;  %v6954_v43 = vpack.c.bf16 %v6946_v38, %v6946_v38  ;;  %v7253_v45 = vrot.slane %v6953_v9, 4  ;;  %v7260_v27 = vsel %vm1131_vm1, %v7259_v34, %v6951_v25 }
0x1d7b   : > { %v6942_v51 = vsel %vm1131_vm1, 0.0, %v6941_v37  ;;  %v7264_v19 = vperm.slane %v7260_v27, %v10544_v23  ;;  %v7279_v49 = vrot.slane %v6956_v31, 4 }
0x1d7c   : > { %v6950_v48 = vpack.c.bf16 %v6942_v51, %v6942_v51  ;;  %v7254_v24 = vsel %vm1131_vm1, %v7253_v45, %v6949_v39  ;;  %v7273_v36 = vrot.slane %v6954_v43, 4 }
0x1d7d   : > { %v7258_v55 = vperm.slane %v7254_v24, %v10544_v23  ;;  %v7265_v46 = vrot.slane %v7264_v19, 4  ;;  %v7280_v60 = vsel %vm1131_vm1, %v7279_v49, %v6952_v62  ;;  %v7207_v62 = vrot.slane %v11805_v32, 4 }
0x1d7e   : > { %v7274_v61 = vsel %vm1131_vm1, %v7273_v36, %v6950_v48  ;;  %v7284_v0 = vperm.slane %v7280_v60, %v10544_v23  ;;  %v10046_v48 = vpop.trf.xlu1  ;;  %v10043_v36 = vpop.trf.xlu0 }
0x1d7f   : > { %v7278_v47 = vperm.slane %v7274_v61, %v10544_v23  ;;  %v7266_v1 = vsel %vm1131_vm1, %v7265_v46, %v7258_v55  ;;  %v7208_v43 = vsel %vm1131_vm1, %v11800_v63, %v7207_v62 }
0x1d80   : > { %v7285_v2 = vrot.slane %v7284_v0, 4  ;;  %v7270_v4 = vperm.slane %v7266_v1, %v10552_v35  ;;  %v7216_v45 = vperm.slane %v7208_v43, %v10552_v35 }
0x1d82   : > { %v7286_v8 = vsel %vm1131_vm1, %v7285_v2, %v7278_v47  ;;  %v7271_v26 = vrot.slane %v7270_v4, 4  ;;  %v7296_v57 = vshrl.u32 %v7270_v4, 16  ;;  %v7231_v27 = vrot.slane %v7216_v45, 4 }
0x1d83   : > { %v7290_v12 = vperm.slane %v7286_v8, %v10552_v35  ;;  %v7247_v19 = vpack.c.bf16 %v7216_v45, %v7216_v45 }
0x1d84   : > { %v7272_v58 = vsel %vm1131_vm1, 0, %v7271_v26  ;;  %v7232_v51 = vsel %vm1131_vm1, 0.0, %v7231_v27 }
0x1d85   : > { %v7295_v56 = vpack.i.b16 %v7290_v12, %v7270_v4  ;;  %v7297_v15 = vshrl.u32 %v7290_v12, 16  ;;  %v7291_v16 = vrot.slane %v7290_v12, 4  ;;  %v7302_v17 = vshrl.u32 %v7272_v58, 16 }
0x1d86   : > { %v7248_v49 = vpack.c.bf16 %v7232_v51, %v7232_v51 }
0x1d87   : > { %9511 = vmatmul.msk.bf16.vlgmr.msra.gmra.mxu0 %vm1792_vm3, %v7295_v56  ;;  %v7298_v10 = vpack.i.b16 %v7297_v15, %v7296_v57  ;;  %v7292_v30 = vsel %vm1131_vm1, 0, %v7291_v16  ;;  %v8265_v57 = vrot.slane %v11827_v18, 4  ;;  %v8327_v16 = vrot.slane %v11792_v13, 4 }
0x1d88   : > { %v7301_v40 = vpack.i.b16 %v7292_v30, %v7272_v58  ;;  %v7303_v7 = vshrl.u32 %v7292_v30, 16  ;;  %v8321_v58 = vrot.slane %v11831_v54, 4  ;;  %v8276_v30 = vperm.slane %v11818_v42, %v10544_v23 }
0x1d89   : > { %9512 = vmatmul.msk.bf16.vlgmr.msra.gmra.mxu1 %vm1792_vm3, %v7298_v10  ;;  %v8266_v56 = vsel %vm1131_vm1, %v8265_v57, %v11825_v50  ;;  %v8282_v54 = vperm.slane %v11834_v52, %v10544_v23 }
0x1d8a   : > { %9513 = vmatmul.msk.bf16.vlgmr.msra.gmra.mxu2 %vm1792_vm3, %v7301_v40  ;;  %v7304_v20 = vpack.i.b16 %v7303_v7, %v7302_v17  ;;  %v8270_v15 = vperm.slane %v8266_v56, %v10544_v23  ;;  %v8322_v17 = vsel %vm1131_vm1, %v8321_v58, %v11829_v29  ;;  %v8328_v7 = vsel %vm1131_vm1, %v8327_v16, %v10043_v36 }
0x1d8b   : > { %v8326_v50 = vperm.slane %v8322_v17, %v10544_v23  ;;  %v8332_v13 = vperm.slane %v8328_v7, %v10544_v23 }
0x1d8c   : > { %9514 = vmatmul.msk.bf16.vlgmr.msrb.gmra.mxu3 %vm1792_vm3, %v7304_v20  ;;  %v8291_v10 = vrot.slane %v8270_v15, 4 }
0x1d8d   : > { %v8347_v29 = vrot.slane %v8326_v50, 4 }
0x1d8e   : > { %v8292_v20 = vsel %vm1131_vm1, %v8276_v30, %v8291_v10 }
0x1d8f   : > { %v8300_v42 = vperm.slane %v8292_v20, %v10552_v35 }
0x1ddb   : > { %v10048_v40 = vpop.trf.xlu2 }
0x1ddc   : > { %v8283_v18 = vrot.slane %v10048_v40, 4 }
0x1e04   : > { %v7900_v21 = vpop.f32.mrf.mxu0 }
0x1e05   : > { %v7901_v59 = vadd.f32 %v10192_v44, %v7900_v21  ;;  %v8333_v21 = vrot.slane %v11836_v41, 4 }
0x1e06   : > { %v7919_v53 = vpop.f32.mrf.mxu1 }
0x1e07   : > { %v7961_v22 = vsel %vm2641_vm4, %v7901_v59, -inf  ;;  %v7920_v37 = vadd.f32 %v10192_v44, %v7919_v53  ;;  %v8303_v53 = vrot.slane %v8282_v54, 4 }
0x1e08   : > { %7962 = vmax.xlane.f32.xlu0 %v7961_v22 }
0x1e09   : > { %v7964_v39 = vsel %vm2641_vm4, %v7920_v37, -inf }
0x1e0c   : > { %v7902_v6 = vpop.f32.mrf.mxu0 }
0x1e0d   : > { %v7938_v3 = vpop.f32.mrf.mxu2  ;;  %v8289_v6 = vrot.slane %v8276_v30, 4 }
0x1e0e   : > { %v7939_v14 = vadd.f32 %v10192_v44, %v7938_v3  ;;  %v7921_v5 = vpop.f32.mrf.mxu1  ;;  %v8345_v3 = vrot.slane %v8332_v13, 4 }
0x1e0f   : > { %v7957_v25 = vpop.f32.mrf.mxu3  ;;  %v10049_v5 = vpop.trf.xlu2 }
0x1e10   : > { %v11881_v9 = vadd.f32 %v10192_v44, %v7957_v25  ;;  %v7967_v31 = vsel %vm2641_vm4, %v7939_v14, -inf  ;;  %v8346_v62 = vsel %vm1131_vm1, %v8345_v3, %v8326_v50 }
0x1e11   : > { %7968 = vmax.xlane.f32.xlu1 %v7967_v31  ;;  %v8319_v31 = vrot.slane %v8300_v42, 4  ;;  %v8352_v36 = vperm.slane %v8346_v62, %v10552_v35 }
0x1e12   : > { %v7970_v34 = vsel %vm2641_vm4, %v11881_v9, -inf }
0x1e13   : > { %7971 = vmax.xlane.f32.xlu2 %v7970_v34  ;;  %v8339_v34 = vrot.slane %v10049_v5, 4 }
0x1e15   : > { %v7940_v28 = vpop.f32.mrf.mxu2 }
0x1e17   : > { %v7959_v38 = vpop.f32.mrf.mxu3 }
0x1e19   : > { %7965 = vmax.xlane.f32.xlu1 %v7964_v39  ;;  %v8290_v39 = vsel %vm1131_vm1, %v8289_v6, %v8270_v15 }
0x1e31   : > { %10050 = vxpose.binary.xlu0.c.b16.start.end [1/2] (short) (narrow) %v7248_v49, %v7247_v19, 16 }
0x1e7b   : > { %v7963_v46 = vpop.xlane.xlu0 %7962 }
0x1e7c   : > { %v7973_v32 = vsub.f32 %v7901_v59, %v7963_v46 }
0x1e7e   : > { %v7977_v63 = vmul.f32 1.442695, %v7973_v32 }
0x1e84   : > { %v7969_v24 = vpop.xlane.xlu1 %7968 }
0x1e85   : > { %v7975_v61 = vsub.f32 %v7939_v14, %v7969_v24  ;;  %v8334_v14 = vsel %vm1131_vm1, %v8333_v21, %v10046_v48  ;;  %v8296_v24 = vperm.slane %v8290_v39, %v10552_v35 }
0x1e86   : > { %v8338_v28 = vperm.slane %v8334_v14, %v10544_v23 }
0x1e87   : > { %v7981_v47 = vmul.f32 1.442695, %v7975_v61 }
0x1e8c   : > { %v7966_v55 = vpop.xlane.xlu1 %7965 }
0x1e8d   : > { %v7974_v60 = vsub.f32 %v7920_v37, %v7966_v55  ;;  %v8348_v37 = vsel %vm1131_vm1, %v8332_v13, %v8347_v29  ;;  %v8359_v55 = vrot.slane %v8338_v28, 4 }
0x1e8e   : > { %v8356_v51 = vperm.slane %v8348_v37, %v10552_v35 }
0x1e8f   : > { %v7979_v0 = vmul.f32 1.442695, %v7974_v60 }
0x1e91   : > { %10170 = vpow2.f32 %v7979_v0  ;;  %v8375_v0 = vrot.slane %v8356_v51, 4 }
0x1e92   : > { %10172 = vpow2.f32 %v7981_v47 }
0x1e93   : > { %10174 = vpow2.f32 %v7977_v63  ;;  %v8315_v63 = vrot.slane %v8296_v24, 4 }
0x1e97   : > { %v11892_v1 = vpop.eup %10170 }
0x1e98   : > { %v7988_v2 = vsel %vm2641_vm4, %v11892_v1, 0.0  ;;  %v11896_v4 = vpop.eup %10172 }
0x1e99   : > { %7989 = vadd.xlane.f32.xlu1 %v7988_v2  ;;  %v11898_v8 = vpop.eup %10174  ;;  %v7991_v26 = vsel %vm2641_vm4, %v11896_v4, 0.0  ;;  %v8371_v2 = vrot.slane %v8352_v36, 4 }
0x1e9a   : > { %v7985_v12 = vsel %vm2641_vm4, %v11898_v8, 0.0 }
0x1ea1   : > { %7992 = vadd.xlane.f32.xlu1 %v7991_v26 }
0x1ea2   : > { %7986 = vadd.xlane.f32.xlu0 %v7985_v12 }
0x1edd   : > { %v10051_v44 = vpop.trf.xlu0 }
0x1ede   : > { %v8284_v59 = vsel %vm1131_vm1, %v8283_v18, %v10051_v44 }
0x1edf   : > { %v8288_v22 = vperm.slane %v8284_v59, %v10544_v23 }
0x1ee1   : > { %v8301_v25 = vrot.slane %v8288_v22, 4  ;;  %v8304_v52 = vsel %vm1131_vm1, %v8288_v22, %v8303_v53 }
0x1ee2   : > { %v8312_v41 = vperm.slane %v8304_v52, %v10552_v35 }
0x1ee3   : > { %v8302_v38 = vsel %vm1131_vm1, %v8301_v25, %v8282_v54 }
0x1ee4   : > { %v8317_v43 = vrot.slane %v8312_v41, 4  ;;  %v8320_v45 = vsel %vm1131_vm1, %v8312_v41, %v8319_v31  ;;  %v8308_v19 = vperm.slane %v8302_v38, %v10552_v35 }
0x1ee5   : > { %v10052_v27 = vpop.trf.xlu0  ;;  %v8405_v12 = vshrl.u32 %v8320_v45, 16 }
0x1ee6   : > { %v8340_v49 = vsel %vm1131_vm1, %v8339_v34, %v10052_v27  ;;  %v8318_v48 = vsel %vm1131_vm1, %v8317_v43, %v8300_v42  ;;  %v8313_v32 = vrot.slane %v8308_v19, 4  ;;  %v8316_v30 = vsel %vm1131_vm1, %v8308_v19, %v8315_v63  ;;  %v7972_v27 = vpop.xlane.xlu2 %7971 }
0x1ee7   : > { %v8344_v46 = vperm.slane %v8340_v49, %v10544_v23  ;;  %v8397_v10 = vshrl.u32 %v8318_v48, 16  ;;  %v8389_v21 = vshrl.u32 %v8316_v30, 16 }
0x1ee8   : > { %v8314_v18 = vsel %vm1131_vm1, %v8313_v32, %v8296_v24 }
0x1ee9   : > { %v8357_v60 = vrot.slane %v8344_v46, 4  ;;  %v8360_v61 = vsel %vm1131_vm1, %v8344_v46, %v8359_v55  ;;  %v8381_v53 = vshrl.u32 %v8314_v18, 16 }
0x1eea   : > { %v8368_v47 = vperm.slane %v8360_v61, %v10552_v35 }
0x1eeb   : > { %v8358_v26 = vsel %vm1131_vm1, %v8357_v60, %v8338_v28 }
0x1eec   : > { %v8364_v57 = vperm.slane %v8358_v26, %v10552_v35  ;;  %v8373_v56 = vrot.slane %v8368_v47, 4  ;;  %v8376_v15 = vsel %vm1131_vm1, %v8368_v47, %v8375_v0 }
0x1eed   : > { %v8406_v58 = vshrl.u32 %v8376_v15, 16  ;;  %v8403_v16 = vpack.i.b16 %v8376_v15, %v8320_v45 }
0x1eee   : > { %v8369_v40 = vrot.slane %v8364_v57, 4  ;;  %v8374_v17 = vsel %vm1131_vm1, %v8373_v56, %v8356_v51  ;;  %v8372_v7 = vsel %vm1131_vm1, %v8364_v57, %v8371_v2  ;;  %v7976_v51 = vsub.f32 %v11881_v9, %v7972_v27 }
0x1eef   : > { %v8407_v20 = vpack.i.b16 %v8406_v58, %v8405_v12  ;;  %v8395_v50 = vpack.i.b16 %v8374_v17, %v8318_v48  ;;  %v8398_v54 = vshrl.u32 %v8374_v17, 16  ;;  %v8387_v13 = vpack.i.b16 %v8372_v7, %v8316_v30 }
0x1ef0   : > { %v8390_v44 = vshrl.u32 %v8372_v7, 16  ;;  %v8370_v42 = vsel %vm1131_vm1, %v8369_v40, %v8352_v36  ;;  %v7983_v19 = vmul.f32 1.442695, %v7976_v51 }
0x1ef1   : > { %10053 = vxpose.binary.xlu1.c.b16.start.end [1/2] (short) (narrow) %v8407_v20, %v8403_v16, 16  ;;  %v8399_v59 = vpack.i.b16 %v8398_v54, %v8397_v10  ;;  %v8379_v29 = vpack.i.b16 %v8370_v42, %v8314_v18  ;;  %v8382_v22 = vshrl.u32 %v8370_v42, 16 }
0x1ef2   : > { %v8391_v6 = vpack.i.b16 %v8390_v44, %v8389_v21 }
0x1ef3   : > { %10059 = vxpose.binary.xlu0.c.b16.start.end [1/2] (short) (narrow) %v8399_v59, %v8395_v50, 16  ;;  %v8383_v3 = vpack.i.b16 %v8382_v22, %v8381_v53 }
0x1ef4   : > { %10056 = vxpose.binary.xlu2.c.b16.start.end [1/2] (short) (narrow) %v8391_v6, %v8387_v13, 16 }
0x1f0c   : > { %v7990_v14 = vpop.xlane.xlu1 %7989 }
0x1f0d   : > { %10176 = vrcp.f32 %v7990_v14 }
0x1f13   : > { %v10177_v5 = vpop.eup %10176 }
0x1f14   : > { %v7993_v25 = vpop.xlane.xlu1 %7992  ;;  %v8002_v52 = vmul.f32 %v10177_v5, %v11892_v1 }
0x1f15   : > { %10178 = vrcp.f32 %v7993_v25  ;;  %v7987_v31 = vpop.xlane.xlu0 %7986 }
0x1f16   : > { %10180 = vrcp.f32 %v7987_v31  ;;  %v8006_v34 = vpack.c.bf16 %v8002_v52, %v8002_v52 }
0x1f17   : > { %10182 = vpow2.f32 %v7983_v19 }
0x1f18   : > { %v8612_v41 = vsel %vm2641_vm4, %v8006_v34, 0 }
0x1f19   : > { %8621 = vmatpush.bf16.xpose.msrb.mxu1 %v8612_v41 }
0x1f1b   : > { %v10179_v37 = vpop.eup %10178 }
0x1f1c   : > { %v10181_v28 = vpop.eup %10180  ;;  %v8003_v38 = vmul.f32 %v10179_v37, %v11896_v4 }
0x1f1d   : > { %v8001_v39 = vmul.f32 %v10181_v28, %v11898_v8  ;;  %v10183_v49 = vpop.eup %10182 }
0x1f1e   : > { %v8007_v62 = vpack.c.bf16 %v8003_v38, %v8003_v38  ;;  %v7994_v48 = vsel %vm2641_vm4, %v10183_v49, 0.0 }
0x1f1f   : > { %v8005_v43 = vpack.c.bf16 %v8001_v39, %v8001_v39 }
0x1f20   : > { %v8631_v45 = vsel %vm2641_vm4, %v8007_v62, 0 }
0x1f21   : > { %8640 = vmatpush.bf16.xpose.msrb.mxu2 %v8631_v45  ;;  %v8593_v1 = vsel %vm2641_vm4, %v8005_v43, 0 }
0x1f22   : > { %8602 = vmatpush.bf16.xpose.msrb.mxu0 %v8593_v1 }
0x1f65   : > { %7995 = vadd.xlane.f32.xlu2 %v7994_v48 }
0x1f8e   : > { %10062 = vxpose.binary.xlu2.c.b16.start.end [1/2] (short) (narrow) %v8383_v3, %v8379_v29, 16 }
0x1f95   : > { %v10057_v4 = vpop.trf.xlu2 }
0x1f9d   : > { %v10058_v8 = vpop.trf.xlu2  ;;  %v10054_v61 = vpop.trf.xlu1 }
0x1f9e   : > { %v8543_v0 = vrot.slane %v10054_v61, 4 }
0x1f9f   : > { %v10060_v9 = vpop.trf.xlu0 }
0x1fa0   : > { %v8544_v32 = vsel %vm1131_vm1, %v8543_v0, %v10057_v4  ;;  %v8537_v63 = vrot.slane %v10060_v9, 4 }
0x1fa1   : > { %v8548_v2 = vperm.slane %v8544_v32, %v10544_v23 }
0x1fa3   : > { %v8549_v56 = vrot.slane %v8548_v2, 4 }
0x1fa5   : > { %v10055_v47 = vpop.trf.xlu1 }
0x1fa6   : > { %v8563_v26 = vrot.slane %v10055_v47, 4 }
0x1fa7   : > { %v10061_v58 = vpop.trf.xlu0 }
0x1fa8   : > { %v8564_v16 = vsel %vm1131_vm1, %v8563_v26, %v10058_v8  ;;  %v8557_v30 = vrot.slane %v10061_v58, 4 }
0x1fa9   : > { %v8568_v40 = vperm.slane %v8564_v16, %v10544_v23 }
0x1fab   : > { %v8569_v20 = vrot.slane %v8568_v40, 4 }
0x1fd8   : > { %v7996_v24 = vpop.xlane.xlu2 %7995 }
0x1fd9   : > { %10184 = vrcp.f32 %v7996_v24 }
0x1fdf   : > { %v10185_v36 = vpop.eup %10184 }
0x1fe0   : > { %v8004_v55 = vmul.f32 %v10185_v36, %v10183_v49 }
0x1fe2   : > { %v8008_v46 = vpack.c.bf16 %v8004_v55, %v8004_v55 }
0x1fe4   : > { %v8650_v60 = vsel %vm2641_vm4, %v8008_v46, 0 }
0x1fe5   : > { %8659 = vmatpush.bf16.xpose.msra.mxu3 %v8650_v60 }
0x202f   : > { %v10063_v12 = vpop.trf.xlu2 }
0x2030   : > { %v8538_v57 = vsel %vm1131_vm1, %v8537_v63, %v10063_v12 }
0x2031   : > { %v8542_v15 = vperm.slane %v8538_v57, %v10544_v23 }
0x2033   : > { %v8550_v10 = vsel %vm1131_vm1, %v8549_v56, %v8542_v15 }
0x2034   : > { %v8554_v17 = vperm.slane %v8550_v10, %v10552_v35 }
0x2036   : > { %v8555_v54 = vrot.slane %v8554_v17, 4  ;;  %v8580_v44 = vshrl.u32 %v8554_v17, 16 }
0x2037   : > { %v10064_v7 = vpop.trf.xlu2 }
0x2038   : > { %v8558_v18 = vsel %vm1131_vm1, %v8557_v30, %v10064_v7  ;;  %v8556_v53 = vsel %vm1131_vm1, 0, %v8555_v54 }
0x2039   : > { %v8562_v50 = vperm.slane %v8558_v18, %v10544_v23  ;;  %v8586_v14 = vshrl.u32 %v8556_v53, 16 }
0x203b   : > { %v8570_v13 = vsel %vm1131_vm1, %v8569_v20, %v8562_v50 }
0x203c   : > { %v8574_v21 = vperm.slane %v8570_v13, %v10552_v35 }
0x203e   : > { %v8575_v42 = vrot.slane %v8574_v21, 4  ;;  %v8581_v59 = vshrl.u32 %v8574_v21, 16  ;;  %v8579_v29 = vpack.i.b16 %v8574_v21, %v8554_v17 }
0x2040   : > { %9515 = vmatmul.msk.bf16.vlgmr.msrb.gmra.mxu0 %vm2641_vm4, %v8579_v29  ;;  %v8582_v22 = vpack.i.b16 %v8581_v59, %v8580_v44  ;;  %v8576_v6 = vsel %vm1131_vm1, 0, %v8575_v42 }
0x2041   : > { %v8585_v3 = vpack.i.b16 %v8576_v6, %v8556_v53  ;;  %v8587_v5 = vshrl.u32 %v8576_v6, 16 }
0x2042   : > { %9516 = vmatmul.msk.bf16.vlgmr.msrb.gmra.mxu1 %vm2641_vm4, %v8582_v22 }
0x2043   : > { %v8588_v25 = vpack.i.b16 %v8587_v5, %v8586_v14  ;;  %9517 = vmatmul.msk.bf16.vlgmr.msrb.gmra.mxu2 %vm2641_vm4, %v8585_v3 }
0x2045   : > { %9518 = vmatmul.msk.bf16.vlgmr.msra.gmra.mxu3 %vm2641_vm4, %v8588_v25 }
0x20bd   : > { %v8604_v52 = vpop.f32.mrf.mxu0 }
0x20bf   : > { %v8623_v31 = vpop.f32.mrf.mxu1 }
0x20c5   : > { %v8606_v34 = vpop.f32.mrf.mxu0 }
0x20c6   : > { %v8642_v41 = vpop.f32.mrf.mxu2 }
0x20c7   : > { %v10065_v37 = vpack.i.bf16 %v8604_v52, %v8642_v41  ;;  %v8625_v28 = vpop.f32.mrf.mxu1 }
0x20c8   : > { %v8661_v38 = vpop.f32.mrf.mxu3 }
0x20c9   : > { %v10072_v39 = vpack.i.bf16 %v8623_v31, %v8661_v38  ;;  %10066 = vxpose.xlu0.b32.start.end [1/1] (short) (narrow) %v10065_v37, 8 }
0x20cb   : > { %10073 = vxpose.xlu1.b32.start.end [1/1] (short) (narrow) %v10072_v39, 8 }
0x20ce   : > { %v8644_v62 = vpop.f32.mrf.mxu2 }
0x20d0   : > { %v8663_v43 = vpop.f32.mrf.mxu3 }
0x216d   : > { %v10067_v45 = vpop.trf.xlu0 }
0x216e   : > { %v10071_v1 = vunpack.i.h.bf16 %v10067_v45  ;;  %v10068_v27 = vunpack.i.l.bf16 %v10067_v45 }
0x216f   : > { %v10074_v51 = vpop.trf.xlu1 }
0x2170   : > { %v8795_v19 = vrot.slane %v10071_v1, 4  ;;  %v8793_v49 = vrot.slane %v10068_v27, 4  ;;  %v10078_v48 = vunpack.i.h.bf16 %v10074_v51  ;;  %v10075_v4 = vunpack.i.l.bf16 %v10074_v51 }
0x2172   : > { %v8794_v8 = vsel %vm1131_vm1, %v8793_v49, %v10071_v1  ;;  %v8796_v24 = vsel %vm1131_vm1, %v10068_v27, %v8795_v19  ;;  %v8807_v36 = vrot.slane %v10078_v48, 4  ;;  %v8805_v60 = vrot.slane %v10075_v4, 4 }
0x2173   : > { %v8800_v55 = vperm.slane %v8794_v8, %v10544_v23  ;;  %v8804_v46 = vperm.slane %v8796_v24, %v10544_v23 }
0x2174   : > { %v8808_v61 = vsel %vm1131_vm1, %v10075_v4, %v8807_v36  ;;  %v8806_v32 = vsel %vm1131_vm1, %v8805_v60, %v10078_v48  ;;  %v9622_v4 = vld [vmem:[%s12201_s9 + $0x18] sm:$0xff] }
0x2175   : > { %v8819_v0 = vrot.slane %v8800_v55, 4  ;;  %v8831_v9 = vrot.slane %v8804_v46, 4  ;;  %v8816_v47 = vperm.slane %v8808_v61, %v10544_v23  ;;  %v8812_v63 = vperm.slane %v8806_v32, %v10544_v23  ;;  %8943 = vmatpush.bf16.msra.mxu0 %v9622_v4 }
0x2177   : > { %v8829_v2 = vrot.slane %v8816_v47, 4  ;;  %v8832_v26 = vsel %vm1131_vm1, %v8816_v47, %v8831_v9  ;;  %v8817_v12 = vrot.slane %v8812_v63, 4  ;;  %v8820_v57 = vsel %vm1131_vm1, %v8812_v63, %v8819_v0  ;;  %v10104_v0 = vld [vmem:[%s12202_s18 + $0x1] ss:$0 sm:$0xff]  ;;  %s12208_s18 = smov %s12207_s1 }
0x2178   : > { %v8840_v56 = vperm.slane %v8832_v26, %v10552_v35  ;;  %v8828_v15 = vperm.slane %v8820_v57, %v10552_v35 }
0x2179   : > { %v8830_v58 = vsel %vm1131_vm1, %v8829_v2, %v8804_v46  ;;  %v8818_v16 = vsel %vm1131_vm1, %v8817_v12, %v8800_v55 }
0x217a   : > { %v8836_v10 = vperm.slane %v8830_v58, %v10552_v35  ;;  %v8847_v30 = vrot.slane %v8840_v56, 4  ;;  %v8824_v40 = vperm.slane %v8818_v16, %v10552_v35  ;;  %v8843_v17 = vrot.slane %v8828_v15, 4 }
0x217c   : > { %v8848_v7 = vsel %vm1131_vm1, 0.0, %v8847_v30  ;;  %v8845_v18 = vrot.slane %v8836_v10, 4  ;;  %v8860_v20 = vsel %vm1131_vm1, %v8847_v30, %v8836_v10  ;;  %v8841_v54 = vrot.slane %v8824_v40, 4  ;;  %v9628_v30 = vld [vmem:[%s12191_s17 + $0x38] sm:$0xff] }
0x217d   : > { %v8865_v50 = vrot.slane %v8848_v7, 4  ;;  %v8844_v13 = vsel %vm1131_vm1, 0.0, %v8843_v17  ;;  %v8849_v21 = vsel %vm1131_vm1, %v8843_v17, %v8824_v40  ;;  %v8864_v29 = vperm.slane %v8860_v20, %v10544_v23  ;;  %9073 = vmatpush.bf16.msra.mxu2 %v9628_v30  ;;  %v9627_v17 = vld [vmem:[%s12191_s17 + $0x30] sm:$0xff] }
0x217e   : > { %v8846_v44 = vsel %vm1131_vm1, 0.0, %v8845_v18  ;;  %v8853_v42 = vperm.slane %v8849_v21, %v10544_v23  ;;  %v8854_v59 = vrot.slane %v8844_v13, 4  ;;  %v8842_v53 = vsel %vm1131_vm1, 0.0, %v8841_v54 }
0x217f   : > { %v8866_v22 = vsel %vm1131_vm1, %v8865_v50, %v8846_v44  ;;  %v8885_v5 = vrot.slane %v8864_v29, 4 }
0x2180   : > { %v8855_v6 = vsel %vm1131_vm1, %v8854_v59, %v8842_v53  ;;  %v8870_v3 = vperm.slane %v8866_v22, %v10544_v23  ;;  %v8873_v14 = vrot.slane %v8853_v42, 4 }
0x2181   : > { %v8859_v25 = vperm.slane %v8855_v6, %v10544_v23  ;;  %9074 = vmatpush.bf16.msra.mxu2 %v9627_v17 }
0x2182   : > { %v8886_v52 = vsel %vm1131_vm1, %v8870_v3, %v8885_v5  ;;  %v8883_v31 = vrot.slane %v8870_v3, 4  ;;  %v9625_v5 = vld [vmem:[%s12191_s17 + $0x20] sm:$0xff] }
0x2183   : > { %v8874_v34 = vsel %vm1131_vm1, %v8859_v25, %v8873_v14  ;;  %v8894_v41 = vperm.slane %v8886_v52, %v10552_v35  ;;  %v8871_v37 = vrot.slane %v8859_v25, 4  ;;  %v9626_v14 = vld [vmem:[%s12191_s17 + $0x28] sm:$0xff] }
0x2184   : > { %v8882_v28 = vperm.slane %v8874_v34, %v10552_v35  ;;  %v8884_v38 = vsel %vm1131_vm1, %v8883_v31, %v8864_v29  ;;  %v10106_v29 = vld [vmem:[%s12194_s22 + $0x1] ss:$0 sm:$0xff] }
0x2185   : > { %v8899_v39 = vrot.slane %v8894_v41, 4  ;;  %v8872_v62 = vsel %vm1131_vm1, %v8871_v37, %v8853_v42  ;;  %v8890_v43 = vperm.slane %v8884_v38, %v10552_v35  ;;  %v10105_v42 = vld [vmem:[%s12193_s6 + $0x1] ss:$0 sm:$0xff]  ;;  %9075 = vmatpush.bf16.msra.mxu2 %v9626_v14 }
0x2186   : > { %v8901_v23 = vrot.slane %v8882_v28, 4  ;;  %v8878_v45 = vperm.slane %v8872_v62, %v10552_v35  ;;  %v9621_v35 = vld [vmem:[%s12201_s9 + $0x10] sm:$0xff] }
0x2187   : > { %v8900_v1 = vsel %vm1131_vm1, %v8899_v39, %v8882_v28  ;;  %v8895_v27 = vrot.slane %v8890_v43, 4  ;;  %8944 = vmatpush.bf16.msra.mxu0 %v9621_v35 }
0x2188   : > { %8908 = vrot.lane.b32.xlu0 %v8900_v1, %s12186_s7  ;;  %v8902_v51 = vsel %vm1131_vm1, %v8894_v41, %v8901_v23  ;;  %v8897_v19 = vrot.slane %v8878_v45, 4  ;;  %s12203_s7 = sld [smem:[#allocation22_spill]] }
0x2189   : > { %8912 = vrot.lane.b32.xlu1 %v8902_v51, %s12185_s28  ;;  %v8896_v49 = vsel %vm1131_vm1, %v8895_v27, %v8878_v45  ;;  %s12206_s28 = sld [smem:[#allocation25_spill]]  ;;  %9076 = vmatpush.bf16.msra.mxu2 %v9625_v5  ;;  %v9630_v27 = vld [vmem:[%s12207_s1 + $0x8] sm:$0xff]  ;;  %s991_s1 = sand.u32 1, %s12209_s2  }
0x218a   : > { %v8898_v48 = vsel %vm1131_vm1, %v8890_v43, %v8897_v19  ;;  %9149 = vmatpush.bf16.msrb.mxu3 %v9630_v27  ;;  %s9280_s5 = sshll.u32 %s991_s1, 3 }
0x218b   : > { %8904 = vrot.lane.b32.xlu2 %v8898_v48, %s12188_s30  ;;  %s12205_s30 = sld [smem:[#allocation23_spill]]  ;;  %s993_s9 = scalar_lea.vmem [#allocation2], %s9280_s5 }
0x218c   : > { %s9170_s10 = sshll.u32 %s993_s9, 4  ;;  %s9171_s10 = int_to_ptr.vmem [resolvable:$true] %s9170_s10 }
0x218e   : > { %s12204_s16 = smov %s12203_s7  ;;  %v9624_v57 = vld [vmem:[%s12203_s7 + $0x18] sm:$0xff]  ;;  %s12210_s7 = sld [smem:[#allocation33_spill]] }
0x218f   : > { %9019 = vmatpush.bf16.msra.mxu1 %v9624_v57  ;;  %v9623_v56 = vld [vmem:[%s12204_s16 + $0x10] sm:$0xff]  ;;  %v10108_v28 = vld [vmem:[%s12206_s28 + $0x1] ss:$0 sm:$0xff]  ;;  %s12212_s28 = sld [smem:[#allocation27_spill]] }
0x2191   : > { %v10107_v25 = vld [vmem:[%s12205_s30 + $0x1] ss:$0 sm:$0xff]  ;;  %s12211_s30 = sld [smem:[#allocation28_spill]] }
0x2193   : > { %9020 = vmatpush.bf16.msra.mxu1 %v9623_v56 }
0x2194   : > { %s9582_s3 = sshll.u32 %s12210_s7, 3 }
0x2195   : > { %v10111_v57 = vld [vmem:[%s12212_s28] ss:$0 sm:$0xff] }
0x2197   : > { %s9168_s8 = scalar_lea.hbm %s12211_s30, %s9582_s3  ;;  %s10213_s3 = scalar_lea.hbm %s12211_s30, 16 }
0x21e5   : > { %v8905_v8 = vpop.permute.xlu2 %8904 }
0x21e6   : > { %v8915_v24 = vsel %vm1792_vm3, %v8896_v49, %v8905_v8  ;;  %v9629_v49 = vld [vmem:[%s12208_s18] sm:$0xff] }
0x21e7   : > { %9150 = vmatpush.bf16.msrb.mxu3 %v9629_v49 }
0x21fa   : > { %v8909_v36 = vpop.permute.xlu0 %8908 }
0x21fb   : > { %v8916_v55 = vsel %vm2641_vm4, %v8915_v24, %v8909_v36  ;;  %v8913_v46 = vpop.permute.xlu1 %8912 }
0x21fc   : > { %v8917_v60 = vsel %vm2643_vm5, %v8916_v55, %v8913_v46 }
0x21fd   : > { %v8918_v61 = vpack.c.bf16 %v8917_v60, %v8917_v60 }
0x21ff   : > { %9527 = vmatmul.msk.bf16.vlgmr.msra.gmra.mxu0 %vm1047_vm0, %v8918_v61 }
0x227c   : > { %v8946_v9 = vpop.f32.mrf.mxu0 }
0x227d   : > { %v8947_v32 = vadd.f32 %v10104_v0, %v8946_v9 }
0x227f   : > { %v8950_v47 = vadd.f32 %v8947_v32, %v11729_v11  ;;  %v10109_v32 = vld [vmem:[%s12198_s4 + $0x1] ss:$0 sm:$0xff]  ;;  %s9172_s4 = sshll.u32 %s9168_s8, 4  ;;  %s9173_s4 = int_to_ptr.hbm [resolvable:$true] %s9172_s4 }
0x2280   : > { %s10207_s11 = sshra.s32 %s9173_s4, 4  ;;  %s10208_s11 = int_to_ptr.hbm [resolvable:$true] %s10207_s11 }
0x2281   : > { %v8955_v63 = vsel %vm1047_vm0, %v8950_v47, 0.0  ;;  %v8959_v2 = vmul.f32 %v8950_v47, %v8950_v47  ;;  %s10209_s12 = scalar_lea.hbm %s10208_s11, 8  ;;  %p10214_p1 = scmp.lt.s32.totalorder %s10208_s11, %s12211_s30 }
0x2282   : > { %8956 = vadd.xlane.f32.xlu1 %v8955_v63  ;;  %p10210_p12 = scmp.ne.s32.totalorder %s10208_s11, %s10209_s12  ;;  %p10215_p2 = scmp.lt.s32.totalorder %s10213_s3, %s10209_s12 }
0x2283   : > { %v8960_v26 = vsel %vm1047_vm0, %v8959_v2, 0.0 }
0x2284   : > { %v8948_v12 = vpop.f32.mrf.mxu0  ;;  %8961 = vadd.xlane.f32.xlu2 %v8960_v26  ;;  %p10211_p13 = pnand %p10210_p12, %p10506_p5  ;;  %p10216_p3 = por %p10215_p2, %p10214_p1 }
0x2286   : > { %p10212_p0 = pneg %p10211_p13 }
0x2288   : > { %p10217_p4 = pnand %p10216_p3, %p10212_p0 }
0x22f5   : > { %v8957_v15 = vpop.xlane.xlu1 %8956 }
0x22f6   : > { %v8958_v58 = vmul.f32 %v8957_v15, %v10910_v33 }
0x22f7   : > { %v8962_v16 = vpop.xlane.xlu2 %8961 }
0x22f8   : > { %v8964_v10 = vmul.f32 %v8958_v58, %v8958_v58  ;;  %v8963_v11 = vmul.f32 %v8962_v16, %v10910_v33  ;;  %v8966_v44 = vsub.f32 %v8950_v47, %v8958_v58  ;;  %v10110_v47 = vld [vmem:[%s12200_s0 + $0x1] ss:$0 sm:$0xff]  ;;  %s9158_s0 = scalar_lea.sflag [#allocation3], %s991_s1 }
0x22fa   : > { %v8965_v40 = vsub.f32 %v8963_v11, %v8964_v10 }
0x22fc   : > { %v8967_v7 = vadd.f32 1e-05, %v8965_v40 }
0x22fe   : > { %10186 = vrsqrt.f32 %v8967_v7  ;;  %vm8974_vm2 = vweird.f32 %v8967_v7 }
0x2304   : > { %v10187_v18 = vpop.eup %10186 }
0x2305   : > { %v8969_v20 = vmul.f32 %v10187_v18, %v8967_v7  ;;  %vm8975_vm1 = vweird.f32 %v10187_v18 }
0x2306   : > { %vm8976_vm3 = vmor %vm8974_vm2, %vm8975_vm1 }
0x2307   : > { %v8970_v50 = vmul.f32 %v10187_v18, %v8969_v20 }
0x2309   : > { %v8971_v54 = vmul.f32 0.5, %v8970_v50 }
0x230b   : > { %v8972_v13 = vsub.f32 1.5, %v8971_v54 }
0x230d   : > { %v8973_v21 = vmul.f32 %v10187_v18, %v8972_v13 }
0x230f   : > { %v8977_v59 = vsel %vm8976_vm3, %v10187_v18, %v8973_v21 }
0x2310   : > { %v8978_v53 = vmul.f32 %v8977_v59, %v8966_v44 }
0x2312   : > { %v8982_v22 = vmul.f32 %v10105_v42, %v8978_v53 }
0x2314   : > { %v8986_v6 = vadd.f32 %v10106_v29, %v8982_v22 }
0x2316   : > { %v8987_v3 = vpack.c.bf16 %v8986_v6, %v8986_v6 }
0x2318   : > { %9543 = vmatmul.msk.bf16.vlgmr.msra.gmra.mxu1 %vm1047_vm0, %v8987_v3 }
0x2395   : > { %v9022_v52 = vpop.f32.mrf.mxu1 }
0x2396   : > { %v9023_v31 = vadd.f32 %v10107_v25, %v9022_v52 }
0x2398   : > { %v9026_v34 = vmax.f32 %v9023_v31, 0.0 }
0x239a   : > { %v9027_v41 = vpack.c.bf16 %v9026_v34, %v9026_v34 }
0x239c   : > { %9569 = vmatmul.msk.bf16.vlgmr.msra.gmra.mxu2 %vm5009_vm13, %v9027_v41 }
0x239d   : > { %v9024_v37 = vpop.f32.mrf.mxu1 }
0x241f   : > { %v9078_v38 = vpop.f32.mrf.mxu2 }
0x2420   : > { %v9079_v39 = vadd.f32 %v10108_v28, %v9078_v38 }
0x2422   : > { %v9082_v62 = vadd.f32 %v9079_v39, %v8986_v6 }
0x2424   : > { %v9087_v43 = vsel %vm1047_vm0, %v9082_v62, 0.0  ;;  %v9091_v23 = vmul.f32 %v9082_v62, %v9082_v62 }
0x2425   : > { %9088 = vadd.xlane.f32.xlu0 %v9087_v43 }
0x2426   : > { %v9092_v45 = vsel %vm1047_vm0, %v9091_v23, 0.0 }
0x2427   : > { %v9080_v1 = vpop.f32.mrf.mxu2  ;;  %9093 = vadd.xlane.f32.xlu1 %v9092_v45 }
0x2498   : > { %v9089_v51 = vpop.xlane.xlu0 %9088 }
0x2499   : > { %v9090_v19 = vmul.f32 %v9089_v51, %v10910_v33 }
0x249a   : > { %v9094_v48 = vpop.xlane.xlu1 %9093 }
0x249b   : > { %v9096_v4 = vmul.f32 %v9090_v19, %v9090_v19  ;;  %v9095_v35 = vmul.f32 %v9094_v48, %v10910_v33  ;;  %v9098_v9 = vsub.f32 %v9082_v62, %v9090_v19 }
0x249d   : > { %v9097_v8 = vsub.f32 %v9095_v35, %v9096_v4 }
0x249f   : > { %v9099_v24 = vadd.f32 1e-05, %v9097_v8 }
0x24a1   : > { %10188 = vrsqrt.f32 %v9099_v24  ;;  %vm9106_vm5 = vweird.f32 %v9099_v24 }
0x24a7   : > { %v10189_v36 = vpop.eup %10188 }
0x24a8   : > { %v9101_v55 = vmul.f32 %v10189_v36, %v9099_v24  ;;  %vm9107_vm4 = vweird.f32 %v10189_v36 }
0x24a9   : > { %vm9108_vm10 = vmor %vm9106_vm5, %vm9107_vm4 }
0x24aa   : > { %v9102_v46 = vmul.f32 %v10189_v36, %v9101_v55 }
0x24ac   : > { %v9103_v60 = vmul.f32 0.5, %v9102_v46 }
0x24ae   : > { %v9104_v61 = vsub.f32 1.5, %v9103_v60 }
0x24b0   : > { %v9105_v0 = vmul.f32 %v10189_v36, %v9104_v61 }
0x24b2   : > { %v9109_v33 = vsel %vm9108_vm10, %v10189_v36, %v9105_v0 }
0x24b3   : > { %v9110_v63 = vmul.f32 %v9109_v33, %v9098_v9 }
0x24b5   : > { %v9114_v2 = vmul.f32 %v10109_v32, %v9110_v63 }
0x24b7   : > { %v9118_v26 = vadd.f32 %v10110_v47, %v9114_v2 }
0x24b9   : > { %v9119_v12 = vpack.c.bf16 %v9118_v26, %v9118_v26 }
0x24bb   : > { %9580 = vmatmul.msk.bf16.vlgmr.msrb.gmra.mxu3 %vm1047_vm0, %v9119_v12 }
0x253e   : > { %v9152_v56 = vpop.f32.mrf.mxu3 }
0x253f   : > { %v9153_v15 = vadd.f32 %v10111_v57, %v9152_v56 }
0x2541   : > { %9156 = vst [vmem:[%s993_s9] sm:$0xff] %v9153_v15 }
0x2542   : > { %10220 = shalt.err (!%p10217_p4)
}
0x2543   : > { %9631 = dma.vmem_to_hbm [thread:$0]  (%p10506_p5), %s9171_s10, 128, %s9173_s4, %s9158_s0  }
0x2546   : > { %v9154_v58 = vpop.f32.mrf.mxu3 }
0x2547 PF: > { %s12214_s5 = sld [smem:[#allocation32_spill]] }
0x2548   : > { %s12215_s8 = sld [smem:[#allocation29_spill]] }
0x254d   : > { %p9637_p7 = scmp.ge.s32.totalorder %s12214_s5, 2 }
0x254e   : > { %s9184_s2 = sand.u32 1, %s12215_s8  }
0x254f   : > { %p9634_p8 = pnand %p9637_p7, %p10510_p6  ;;  %s9185_s7 = scalar_lea.sflag [#allocation3], %s9184_s2 }
0x2551   : > { %p9635_p9 = pneg %p9634_p8 }
0x2553   : > { %10238 = dma.done.wait (%p9635_p9), %s9185_s7, 128  }
0x2554   : > { %10240 = vsyncadd (%p9635_p9), %s9185_s7, 4294967168  ;;  %s12217_s7 = sld [smem:[#allocation34_spill]] }
0x2555   : > { %s12218_s28 = sld [smem:[#allocation30_spill]] }
0x2556   : > { %s12219_s1 = sld [smem:[#allocation31_spill]] }
0x2557   : > { %s12220_s2 = sld [smem:[#allocation35_spill]] }
0x255a   : > { %p75_p10 = scmp.ge.s32.totalorder %s12217_s7, 4  }
0x255c   :  { %77 = sbr.rel (!%p75_p10) target bundleno = 68 (0x44), region = 244 }
0x2561   :  { %9191 = vsyncpa [#allocation3], 1 }
0x2562   :  { %9193 = vsyncpa [#allocation3 + $0x1], 1 }

</bundles_post_ra>
